<compile_context>
chip_gen: v5e
topology: v5e:2x2
jax: 0.10.0
libtpu: 0.0.40
codegen_flags: <defaults>
</compile_context>

<pallas_src>
import functools
import math

import jax
import jax.numpy as jnp
from jax.experimental import pallas as pl
from jax.experimental.pallas import tpu as pltpu


VMEM_LIMIT_BYTES = 48 * 1024 * 1024   # fits v7x's 64 MiB VMEM with headroom
FFN_TILE_M = 256
LIN_TILE_M = 256
LIN_TILE_N = 512


# -----------------------------------------------------------------------------
# Pallas kernels
# -----------------------------------------------------------------------------
def _mha_ln_kernel(xq_ref, xkv_ref, kpad_ref,
                   wq_ref, wk_ref, wv_ref, wo_ref,
                   bq_ref, bk_ref, bv_ref, bo_ref,
                   g_ref, beta_ref, o_ref,
                   *, n_heads, causal, eps):
    """Fused MHA + residual + LayerNorm for one batch element.

    xq_ref:  [1, Sq, D] f32     xkv_ref: [1, Sk, D] f32
    kpad_ref:[1, 1, Sk] f32 (1.0 = padded key position)
    wq/wk/wv/wo_ref: [D, D] bf16 (scale 1/sqrt(depth) folded into Wq at init)
    bq/bk/bv/bo/g/beta_ref: [1, D] f32
    """
    xq = xq_ref[0]                                  # [Sq, D] f32
    xkv = xkv_ref[0]                                # [Sk, D] f32
    sq, d = xq.shape
    sk = xkv.shape[0]
    dh = d // n_heads

    xq_b = xq.astype(jnp.bfloat16)
    xkv_b = xkv.astype(jnp.bfloat16)

    # Wide projections: three [S,D]x[D,D] bf16 matmuls, f32 accumulation.
    q = jnp.dot(xq_b, wq_ref[...], preferred_element_type=jnp.float32) + bq_ref[...]
    k = jnp.dot(xkv_b, wk_ref[...], preferred_element_type=jnp.float32) + bk_ref[...]
    v = jnp.dot(xkv_b, wv_ref[...], preferred_element_type=jnp.float32) + bv_ref[...]

    # Mask bias built in-kernel (no O(S^2) mask DMA from HBM).
    kpad = kpad_ref[0]                              # [1, Sk]
    masked = jnp.broadcast_to(kpad > 0.0, (sq, sk))
    if causal:
        row = jax.lax.broadcasted_iota(jnp.int32, (sq, sk), 0)
        col = jax.lax.broadcasted_iota(jnp.int32, (sq, sk), 1)
        masked = jnp.logical_or(masked, col > row)
    bias = jnp.where(masked, -1e9, 0.0)             # [Sq, Sk] f32

    # Per-head scaled-dot-product attention; heads stay resident in VMEM.
    heads = []
    for h in range(n_heads):                        # static unroll
        qh = q[:, h * dh:(h + 1) * dh].astype(jnp.bfloat16)
        kh = k[:, h * dh:(h + 1) * dh].astype(jnp.bfloat16)
        vh = v[:, h * dh:(h + 1) * dh].astype(jnp.bfloat16)

        s = jax.lax.dot_general(qh, kh, (((1,), (1,)), ((), ())),
                                preferred_element_type=jnp.float32)
        s = s + bias
        s = s - jnp.max(s, axis=-1, keepdims=True)
        p = jnp.exp(s)
        p = p * pl.reciprocal(jnp.sum(p, axis=-1, keepdims=True), approx=True)

        heads.append(jnp.dot(p.astype(jnp.bfloat16), vh,
                             preferred_element_type=jnp.float32))

    ctx = jnp.concatenate(heads, axis=-1)           # [Sq, D]
    # Single wide output projection over the concatenated heads.
    y = (jnp.dot(ctx.astype(jnp.bfloat16), wo_ref[...],
                 preferred_element_type=jnp.float32) + bo_ref[...])

    r = xq + y                                      # residual (f32)
    mean = jnp.mean(r, axis=-1, keepdims=True)
    var = jnp.mean(r * r, axis=-1, keepdims=True) - mean * mean
    o_ref[0] = (r - mean) * jax.lax.rsqrt(var + eps) * g_ref[...] + beta_ref[...]


def _ffn_ln_kernel(x_ref, w1_ref, b1_ref, w2_ref, b2_ref, g_ref, beta_ref, o_ref,
                   *, eps):
    """Fused FFN (W1+ReLU, W2) + residual + LayerNorm for one M tile."""
    x = x_ref[...]                                               # [TM, D] f32
    h = (jnp.dot(x.astype(jnp.bfloat16), w1_ref[...],
                 preferred_element_type=jnp.float32) + b1_ref[...])
    h = jnp.maximum(h, 0.0)                                      # [TM, F]
    y = (jnp.dot(h.astype(jnp.bfloat16), w2_ref[...],
                 preferred_element_type=jnp.float32) + b2_ref[...])
    r = x + y
    mean = jnp.mean(r, axis=-1, keepdims=True)
    var = jnp.mean(r * r, axis=-1, keepdims=True) - mean * mean
    o_ref[...] = (r - mean) * jax.lax.rsqrt(var + eps) * g_ref[...] + beta_ref[...]


def _linear_kernel(x_ref, w_ref, b_ref, o_ref):
    o_ref[...] = (jnp.dot(x_ref[...].astype(jnp.bfloat16), w_ref[...],
                          preferred_element_type=jnp.float32) + b_ref[...])


# -----------------------------------------------------------------------------
# Pallas wrappers
# -----------------------------------------------------------------------------
def fused_mha_layernorm(x_q, x_kv, key_pad, p, gamma, beta, n_heads,
                        causal=False, eps=1e-5):
    """x_q: [B,Sq,D], x_kv: [B,Sk,D], key_pad: [B,1,Sk] (1.0 = padded key)."""
    B, Sq, D = x_q.shape
    Sk = x_kv.shape[1]

    def rep(shape):
        return pl.BlockSpec(shape, lambda b, n=len(shape): (0,) * n)

    return pl.pallas_call(
        functools.partial(_mha_ln_kernel, n_heads=n_heads, causal=causal, eps=eps),
        out_shape=jax.ShapeDtypeStruct((B, Sq, D), jnp.float32),
        grid=(B,),
        in_specs=[
            pl.BlockSpec((1, Sq, D), lambda b: (b, 0, 0)),
            pl.BlockSpec((1, Sk, D), lambda b: (b, 0, 0)),
            pl.BlockSpec((1, 1, Sk), lambda b: (b, 0, 0)),
            rep((D, D)), rep((D, D)), rep((D, D)), rep((D, D)),
            rep((1, D)), rep((1, D)), rep((1, D)), rep((1, D)),
            rep((1, D)), rep((1, D)),
        ],
        out_specs=pl.BlockSpec((1, Sq, D), lambda b: (b, 0, 0)),
        compiler_params=pltpu.CompilerParams(
            dimension_semantics=("parallel",),
            vmem_limit_bytes=VMEM_LIMIT_BYTES),
    )(x_q, x_kv, key_pad,
      p["wq"], p["wk"], p["wv"], p["wo"],
      p["bq"], p["bk"], p["bv"], p["bo"],
      gamma, beta)


def fused_ffn_layernorm(x, p, gamma, beta, eps=1e-5):
    """x: [B,S,D] -> LayerNorm(x + FFN(x)); tiled over M, weights resident."""
    B, S, D = x.shape
    M = B * S
    F = p["ffn_w1"].shape[1]
    tile_m = FFN_TILE_M if M % FFN_TILE_M == 0 else M

    def rep(shape):
        return pl.BlockSpec(shape, lambda i, n=len(shape): (0,) * n)

    out = pl.pallas_call(
        functools.partial(_ffn_ln_kernel, eps=eps),
        out_shape=jax.ShapeDtypeStruct((M, D), jnp.float32),
        grid=(M // tile_m,),
        in_specs=[
            pl.BlockSpec((tile_m, D), lambda i: (i, 0)),
            rep((D, F)), rep((1, F)), rep((F, D)), rep((1, D)),
            rep((1, D)), rep((1, D)),
        ],
        out_specs=pl.BlockSpec((tile_m, D), lambda i: (i, 0)),
        compiler_params=pltpu.CompilerParams(
            dimension_semantics=("parallel",),
            vmem_limit_bytes=VMEM_LIMIT_BYTES),
    )(x.reshape(M, D),
      p["ffn_w1"], p["ffn_b1"], p["ffn_w2"], p["ffn_b2"], gamma, beta)
    return out.reshape(B, S, D)


def pallas_linear(x2d, w_pad, b_pad):
    """x2d: [M,K] f32, w_pad: [K,Np] bf16, b_pad: [1,Np] f32 (Np % 128 == 0)."""
    M, K = x2d.shape
    Np = w_pad.shape[1]
    tile_m = LIN_TILE_M if M % LIN_TILE_M == 0 else M
    tile_n = LIN_TILE_N if Np % LIN_TILE_N == 0 else Np
    return pl.pallas_call(
        _linear_kernel,
        out_shape=jax.ShapeDtypeStruct((M, Np), jnp.float32),
        grid=(M // tile_m, Np // tile_n),
        in_specs=[
            pl.BlockSpec((tile_m, K), lambda i, j: (i, 0)),
            pl.BlockSpec((K, tile_n), lambda i, j: (0, j)),
            pl.BlockSpec((1, tile_n), lambda i, j: (0, j)),
        ],
        out_specs=pl.BlockSpec((tile_m, tile_n), lambda i, j: (i, j)),
        compiler_params=pltpu.CompilerParams(
            dimension_semantics=("parallel", "parallel"),
            vmem_limit_bytes=VMEM_LIMIT_BYTES),
    )(x2d, w_pad, b_pad)


# -----------------------------------------------------------------------------
# Model glue (plain JAX around the Pallas kernels)
# -----------------------------------------------------------------------------
def positional_encoding(seq_len, d_model):
    pos = jnp.arange(seq_len, dtype=jnp.float32)[:, None]
    i = jnp.arange(d_model, dtype=jnp.float32)[None, :]
    angle_rates = 1.0 / jnp.power(10000.0, (2.0 * jnp.floor(i / 2.0)) / d_model)
    angles = pos * angle_rates
    return jnp.where(jnp.arange(d_model)[None, :] % 2 == 0,
                     jnp.sin(angles), jnp.cos(angles))


def encoder_layer(x, key_pad, p, n_heads):
    out1 = fused_mha_layernorm(x, x, key_pad, p["mha"], p["ln1_g"], p["ln1_b"],
                               n_heads, causal=False)
    return fused_ffn_layernorm(out1, p, p["ln2_g"], p["ln2_b"])


def decoder_layer(x, enc_out, dec_pad, enc_pad, p, n_heads):
    out1 = fused_mha_layernorm(x, x, dec_pad, p["mha1"], p["ln1_g"], p["ln1_b"],
                               n_heads, causal=True)
    out2 = fused_mha_layernorm(out1, enc_out, enc_pad, p["mha2"],
                               p["ln2_g"], p["ln2_b"], n_heads, causal=False)
    return fused_ffn_layernorm(out2, p, p["ln3_g"], p["ln3_b"])


def encoder(tokens, enc_pad, params, pe, d_model, n_heads):
    S = tokens.shape[1]
    # embedding gather + positional encoding stay in plain JAX
    x = jnp.take(params["embedding"], tokens, axis=0) * math.sqrt(d_model)
    x = x + pe[None, :S, :]
    for lp in params["layers"]:
        x = encoder_layer(x, enc_pad, lp, n_heads)
    return x


def decoder(tokens, enc_out, dec_pad, enc_pad, params, pe, d_model, n_heads):
    S = tokens.shape[1]
    x = jnp.take(params["embedding"], tokens, axis=0) * math.sqrt(d_model)
    x = x + pe[None, :S, :]
    for lp in params["layers"]:
        x = decoder_layer(x, enc_out, dec_pad, enc_pad, lp, n_heads)
    return x


def transformer_forward(params, enc_inputs, dec_inputs, *, d_model, n_heads, vocab_dec):
    B, Se = enc_inputs.shape
    Sd = dec_inputs.shape[1]
    # Only thin per-batch key-padding vectors cross the HBM boundary; causal
    # triangles are generated inside the attention kernel.
    enc_pad = (enc_inputs == 0).astype(jnp.float32).reshape(B, 1, Se)
    dec_pad = (dec_inputs == 0).astype(jnp.float32).reshape(B, 1, Sd)

    enc_out = encoder(enc_inputs, enc_pad, params["encoder"], params["pe"],
                      d_model, n_heads)
    dec_out = decoder(dec_inputs, enc_out, dec_pad, enc_pad,
                      params["decoder"], params["pe"], d_model, n_heads)

    B_, Sd_, D = dec_out.shape
    logits = pallas_linear(dec_out.reshape(-1, D), params["last_w"], params["last_b"])
    return logits[:, :vocab_dec].reshape(B_, Sd_, vocab_dec)


# -----------------------------------------------------------------------------
# Deterministic parameter initialization (kernel-ready layouts, no per-call work)
# -----------------------------------------------------------------------------
def _init_mha(key, d_model, n_heads):
    ks = jax.random.split(key, 4)
    s = 0.02
    depth = d_model // n_heads
    scale = 1.0 / math.sqrt(depth)          # folded into Wq (and bq) at init
    return {
        "wq": (s * scale * jax.random.normal(ks[0], (d_model, d_model), jnp.float32)
               ).astype(jnp.bfloat16),
        "bq": jnp.zeros((1, d_model), jnp.float32),   # zeros * scale == zeros
        "wk": (s * jax.random.normal(ks[1], (d_model, d_model), jnp.float32)
               ).astype(jnp.bfloat16),
        "bk": jnp.zeros((1, d_model), jnp.float32),
        "wv": (s * jax.random.normal(ks[2], (d_model, d_model), jnp.float32)
               ).astype(jnp.bfloat16),
        "bv": jnp.zeros((1, d_model), jnp.float32),
        "wo": (s * jax.random.normal(ks[3], (d_model, d_model), jnp.float32)
               ).astype(jnp.bfloat16),
        "bo": jnp.zeros((1, d_model), jnp.float32),
    }


def _init_ffn(key, d_model, ffn_units):
    k1, k2 = jax.random.split(key, 2)
    s = 0.02
    return {
        "ffn_w1": (s * jax.random.normal(k1, (d_model, ffn_units), jnp.float32)
                   ).astype(jnp.bfloat16),
        "ffn_b1": jnp.zeros((1, ffn_units), jnp.float32),
        "ffn_w2": (s * jax.random.normal(k2, (ffn_units, d_model), jnp.float32)
                   ).astype(jnp.bfloat16),
        "ffn_b2": jnp.zeros((1, d_model), jnp.float32),
    }


def _ln(d_model):
    return jnp.ones((1, d_model), jnp.float32), jnp.zeros((1, d_model), jnp.float32)


def _init_enc_layer(key, d_model, ffn_units, n_heads):
    k1, k2 = jax.random.split(key, 2)
    p = {"mha": _init_mha(k1, d_model, n_heads)}
    p.update(_init_ffn(k2, d_model, ffn_units))
    p["ln1_g"], p["ln1_b"] = _ln(d_model)
    p["ln2_g"], p["ln2_b"] = _ln(d_model)
    return p


def _init_dec_layer(key, d_model, ffn_units, n_heads):
    k1, k2, k3 = jax.random.split(key, 3)
    p = {"mha1": _init_mha(k1, d_model, n_heads),
         "mha2": _init_mha(k2, d_model, n_heads)}
    p.update(_init_ffn(k3, d_model, ffn_units))
    p["ln1_g"], p["ln1_b"] = _ln(d_model)
    p["ln2_g"], p["ln2_b"] = _ln(d_model)
    p["ln3_g"], p["ln3_b"] = _ln(d_model)
    return p


def init_transformer_params(key, vocab_enc, vocab_dec, d_model, n_layers, ffn_units,
                            n_heads, max_seq_len):
    keys = jax.random.split(key, 2 * n_layers + 3)
    s = 0.02
    enc_layers = [_init_enc_layer(keys[i], d_model, ffn_units, n_heads)
                  for i in range(n_layers)]
    dec_layers = [_init_dec_layer(keys[n_layers + i], d_model, ffn_units, n_heads)
                  for i in range(n_layers)]
    # Final vocab projection padded once to a multiple of 128 lanes.
    vocab_pad = ((vocab_dec + 127) // 128) * 128
    last_w = s * jax.random.normal(keys[-1], (d_model, vocab_dec), jnp.float32)
    last_w = jnp.pad(last_w, ((0, 0), (0, vocab_pad - vocab_dec))).astype(jnp.bfloat16)
    last_b = jnp.zeros((1, vocab_pad), jnp.float32)
    return {
        "encoder": {
            "embedding": s * jax.random.normal(keys[-3], (vocab_enc, d_model), jnp.float32),
            "layers": enc_layers,
        },
        "decoder": {
            "embedding": s * jax.random.normal(keys[-2], (vocab_dec, d_model), jnp.float32),
            "layers": dec_layers,
        },
        "last_w": last_w,
        "last_b": last_b,
        "pe": positional_encoding(max_seq_len, d_model),
    }


# -----------------------------------------------------------------------------
# Main
# -----------------------------------------------------------------------------
if __name__ == "__main__":
    VOCAB_ENC = 37
    VOCAB_DEC = 41
    D_MODEL = 32
    N_LAYERS = 2
    FFN_UNITS = 64
    N_HEADS = 4
    # dropout_rate is a constructor arg; forward here is inference -> identity.

    B, S_ENC, S_DEC = 2, 8, 8

    key = jax.random.PRNGKey(0)
    k_param, k_enc, k_dec = jax.random.split(key, 3)
    params = init_transformer_params(k_param, VOCAB_ENC, VOCAB_DEC,
                                     D_MODEL, N_LAYERS, FFN_UNITS, N_HEADS,
                                     max_seq_len=max(S_ENC, S_DEC))

    enc_inputs = jax.random.randint(k_enc, (B, S_ENC), 0, VOCAB_ENC, dtype=jnp.int32)
    dec_inputs = jax.random.randint(k_dec, (B, S_DEC), 0, VOCAB_DEC, dtype=jnp.int32)
    # ensure some padding (token id 0) so padding masks are exercised
    enc_inputs = enc_inputs.at[:, -2:].set(0)
    dec_inputs = dec_inputs.at[:, -1:].set(0)

    fwd = jax.jit(functools.partial(transformer_forward,
                                    d_model=D_MODEL, n_heads=N_HEADS,
                                    vocab_dec=VOCAB_DEC))

    logits = fwd(params, enc_inputs, dec_inputs)
    logits = jax.block_until_ready(logits)
    assert logits.shape == (B, S_DEC, VOCAB_DEC)
    assert bool(jnp.all(jnp.isfinite(logits)))
    print("KERNEL_OK")
</pallas_src>

<mosaic_0001>
module attributes {stable_mosaic.version = 11 : i64} {
  func.func @_ffn_ln_kernel(%arg0: i32, %arg1: memref<16x32xf32, #tpu.memory_space<vmem>>, %arg2: memref<32x64xbf16, #tpu.memory_space<vmem>>, %arg3: memref<1x64xf32, #tpu.memory_space<vmem>>, %arg4: memref<64x32xbf16, #tpu.memory_space<vmem>>, %arg5: memref<1x32xf32, #tpu.memory_space<vmem>>, %arg6: memref<1x32xf32, #tpu.memory_space<vmem>>, %arg7: memref<1x32xf32, #tpu.memory_space<vmem>>, %arg8: memref<16x32xf32, #tpu.memory_space<vmem>>) attributes {dimension_semantics = [#tpu.dimension_semantics<parallel>], iteration_bounds = array<i64: 1>, scalar_prefetch = 0 : i64, scratch_operands = 0 : i64, tpu.core_type = #tpu.core_type<tc>, window_params = [{transform_indices = @transform_0, window_bounds = array<i64: 16, 32>}, {pipeline_mode = #tpu.pipeline_mode<synchronous>, transform_indices = @transform_1, window_bounds = array<i64: 32, 64>}, {pipeline_mode = #tpu.pipeline_mode<synchronous>, transform_indices = @transform_2, window_bounds = array<i64: 1, 64>}, {pipeline_mode = #tpu.pipeline_mode<synchronous>, transform_indices = @transform_3, window_bounds = array<i64: 64, 32>}, {pipeline_mode = #tpu.pipeline_mode<synchronous>, transform_indices = @transform_4, window_bounds = array<i64: 1, 32>}, {pipeline_mode = #tpu.pipeline_mode<synchronous>, transform_indices = @transform_5, window_bounds = array<i64: 1, 32>}, {pipeline_mode = #tpu.pipeline_mode<synchronous>, transform_indices = @transform_6, window_bounds = array<i64: 1, 32>}, {transform_indices = @transform_7, window_bounds = array<i64: 16, 32>}]} {
    %c0 = arith.constant 0 : index
    %c0_0 = arith.constant 0 : index
    %0 = vector.load %arg1[%c0, %c0_0] : memref<16x32xf32, #tpu.memory_space<vmem>>, vector<16x32xf32>
    %1 = arith.truncf %0 : vector<16x32xf32> to vector<16x32xbf16>
    %c0_1 = arith.constant 0 : index
    %c0_2 = arith.constant 0 : index
    %2 = vector.load %arg2[%c0_1, %c0_2] : memref<32x64xbf16, #tpu.memory_space<vmem>>, vector<32x64xbf16>
    %cst = arith.constant dense<0.000000e+00> : vector<16x64xf32>
    %3 = tpu.matmul %1, %2, %cst {dimension_numbers = #tpu.dot_dimension_numbers<[1], [0], [0], [1], [0, 0, 1, 1], [], []>} : vector<16x32xbf16>, vector<32x64xbf16>, vector<16x64xf32> -> vector<16x64xf32>
    %c0_3 = arith.constant 0 : index
    %c0_4 = arith.constant 0 : index
    %4 = vector.load %arg3[%c0_3, %c0_4] : memref<1x64xf32, #tpu.memory_space<vmem>>, vector<1x64xf32>
    %5 = vector.broadcast %4 : vector<1x64xf32> to vector<16x64xf32>
    %6 = arith.addf %3, %5 : vector<16x64xf32>
    %cst_5 = arith.constant 0.000000e+00 : f32
    %7 = vector.broadcast %cst_5 : f32 to vector<16x64xf32>
    %8 = arith.maximumf %6, %7 : vector<16x64xf32>
    %9 = arith.truncf %8 : vector<16x64xf32> to vector<16x64xbf16>
    %c0_6 = arith.constant 0 : index
    %c0_7 = arith.constant 0 : index
    %10 = vector.load %arg4[%c0_6, %c0_7] : memref<64x32xbf16, #tpu.memory_space<vmem>>, vector<64x32xbf16>
    %cst_8 = arith.constant dense<0.000000e+00> : vector<16x32xf32>
    %11 = tpu.matmul %9, %10, %cst_8 {dimension_numbers = #tpu.dot_dimension_numbers<[1], [0], [0], [1], [0, 0, 1, 1], [], []>} : vector<16x64xbf16>, vector<64x32xbf16>, vector<16x32xf32> -> vector<16x32xf32>
    %c0_9 = arith.constant 0 : index
    %c0_10 = arith.constant 0 : index
    %12 = vector.load %arg5[%c0_9, %c0_10] : memref<1x32xf32, #tpu.memory_space<vmem>>, vector<1x32xf32>
    %13 = vector.broadcast %12 : vector<1x32xf32> to vector<16x32xf32>
    %14 = arith.addf %11, %13 : vector<16x32xf32>
    %15 = arith.addf %0, %14 : vector<16x32xf32>
    %cst_11 = arith.constant dense<0.000000e+00> : vector<16xf32>
    %16 = vector.multi_reduction <add>, %15, %cst_11 [1] : vector<16x32xf32> to vector<16xf32>
    %17 = vector.shape_cast %16 : vector<16xf32> to vector<16x1xf32>
    %cst_12 = arith.constant 3.200000e+01 : f32
    %18 = vector.broadcast %cst_12 : f32 to vector<16x1xf32>
    %19 = arith.divf %17, %18 : vector<16x1xf32>
    %20 = arith.mulf %15, %15 : vector<16x32xf32>
    %cst_13 = arith.constant dense<0.000000e+00> : vector<16xf32>
    %21 = vector.multi_reduction <add>, %20, %cst_13 [1] : vector<16x32xf32> to vector<16xf32>
    %22 = vector.shape_cast %21 : vector<16xf32> to vector<16x1xf32>
    %cst_14 = arith.constant 3.200000e+01 : f32
    %23 = vector.broadcast %cst_14 : f32 to vector<16x1xf32>
    %24 = arith.divf %22, %23 : vector<16x1xf32>
    %25 = arith.mulf %19, %19 : vector<16x1xf32>
    %26 = arith.subf %24, %25 : vector<16x1xf32>
    %27 = vector.broadcast %19 : vector<16x1xf32> to vector<16x32xf32>
    %28 = arith.subf %15, %27 : vector<16x32xf32>
    %cst_15 = arith.constant 9.99999974E-6 : f32
    %29 = vector.broadcast %cst_15 : f32 to vector<16x1xf32>
    %30 = arith.addf %26, %29 : vector<16x1xf32>
    %31 = math.rsqrt %30 : vector<16x1xf32>
    %32 = vector.broadcast %31 : vector<16x1xf32> to vector<16x32xf32>
    %33 = arith.mulf %28, %32 : vector<16x32xf32>
    %c0_16 = arith.constant 0 : index
    %c0_17 = arith.constant 0 : index
    %34 = vector.load %arg6[%c0_16, %c0_17] : memref<1x32xf32, #tpu.memory_space<vmem>>, vector<1x32xf32>
    %35 = vector.broadcast %34 : vector<1x32xf32> to vector<16x32xf32>
    %36 = arith.mulf %33, %35 : vector<16x32xf32>
    %c0_18 = arith.constant 0 : index
    %c0_19 = arith.constant 0 : index
    %37 = vector.load %arg7[%c0_18, %c0_19] : memref<1x32xf32, #tpu.memory_space<vmem>>, vector<1x32xf32>
    %38 = vector.broadcast %37 : vector<1x32xf32> to vector<16x32xf32>
    %39 = arith.addf %36, %38 : vector<16x32xf32>
    %c0_20 = arith.constant 0 : index
    %c0_21 = arith.constant 0 : index
    %40 = vector.load %arg8[%c0_20, %c0_21] : memref<16x32xf32, #tpu.memory_space<vmem>>, vector<16x32xf32>
    tpu.vector_store %arg8[%c0_20, %c0_21], %39 {strides = array<i32>} : memref<16x32xf32, #tpu.memory_space<vmem>>, vector<16x32xf32>,
    return
  }
  func.func @transform_0(%arg0: i32) -> (i32, i32) {
    %c0_i32 = arith.constant 0 : i32
    %c0_i32_0 = arith.constant 0 : i32
    return %arg0, %c0_i32 : i32, i32
  }
  func.func @transform_1(%arg0: i32) -> (i32, i32) {
    %c0_i32 = arith.constant 0 : i32
    %c0_i32_0 = arith.constant 0 : i32
    %c0_i32_1 = arith.constant 0 : i32
    return %c0_i32, %c0_i32_0 : i32, i32
  }
  func.func @transform_2(%arg0: i32) -> (i32, i32) {
    %c0_i32 = arith.constant 0 : i32
    %c0_i32_0 = arith.constant 0 : i32
    %c0_i32_1 = arith.constant 0 : i32
    return %c0_i32, %c0_i32_0 : i32, i32
  }
  func.func @transform_3(%arg0: i32) -> (i32, i32) {
    %c0_i32 = arith.constant 0 : i32
    %c0_i32_0 = arith.constant 0 : i32
    %c0_i32_1 = arith.constant 0 : i32
    return %c0_i32, %c0_i32_0 : i32, i32
  }
  func.func @transform_4(%arg0: i32) -> (i32, i32) {
    %c0_i32 = arith.constant 0 : i32
    %c0_i32_0 = arith.constant 0 : i32
    %c0_i32_1 = arith.constant 0 : i32
    return %c0_i32, %c0_i32_0 : i32, i32
  }
  func.func @transform_5(%arg0: i32) -> (i32, i32) {
    %c0_i32 = arith.constant 0 : i32
    %c0_i32_0 = arith.constant 0 : i32
    %c0_i32_1 = arith.constant 0 : i32
    return %c0_i32, %c0_i32_0 : i32, i32
  }
  func.func @transform_6(%arg0: i32) -> (i32, i32) {
    %c0_i32 = arith.constant 0 : i32
    %c0_i32_0 = arith.constant 0 : i32
    %c0_i32_1 = arith.constant 0 : i32
    return %c0_i32, %c0_i32_0 : i32, i32
  }
  func.func @transform_7(%arg0: i32) -> (i32, i32) {
    %c0_i32 = arith.constant 0 : i32
    %c0_i32_0 = arith.constant 0 : i32
    return %arg0, %c0_i32 : i32, i32
  }
}

module attributes {stable_mosaic.version = 11 : i64} {
  func.func @_mha_ln_kernel(%arg0: i32, %arg1: memref<1x8x32xf32, #tpu.memory_space<vmem>>, %arg2: memref<1x8x32xf32, #tpu.memory_space<vmem>>, %arg3: memref<1x1x8xf32, #tpu.memory_space<vmem>>, %arg4: memref<32x32xbf16, #tpu.memory_space<vmem>>, %arg5: memref<32x32xbf16, #tpu.memory_space<vmem>>, %arg6: memref<32x32xbf16, #tpu.memory_space<vmem>>, %arg7: memref<32x32xbf16, #tpu.memory_space<vmem>>, %arg8: memref<1x32xf32, #tpu.memory_space<vmem>>, %arg9: memref<1x32xf32, #tpu.memory_space<vmem>>, %arg10: memref<1x32xf32, #tpu.memory_space<vmem>>, %arg11: memref<1x32xf32, #tpu.memory_space<vmem>>, %arg12: memref<1x32xf32, #tpu.memory_space<vmem>>, %arg13: memref<1x32xf32, #tpu.memory_space<vmem>>, %arg14: memref<1x8x32xf32, #tpu.memory_space<vmem>>) attributes {dimension_semantics = [#tpu.dimension_semantics<parallel>], iteration_bounds = array<i64: 2>, scalar_prefetch = 0 : i64, scratch_operands = 0 : i64, tpu.core_type = #tpu.core_type<tc>, window_params = [{transform_indices = @transform_0, window_bounds = array<i64: 1, 8, 32>}, {transform_indices = @transform_1, window_bounds = array<i64: 1, 8, 32>}, {transform_indices = @transform_2, window_bounds = array<i64: 1, 1, 8>}, {pipeline_mode = #tpu.pipeline_mode<synchronous>, transform_indices = @transform_3, window_bounds = array<i64: 32, 32>}, {pipeline_mode = #tpu.pipeline_mode<synchronous>, transform_indices = @transform_4, window_bounds = array<i64: 32, 32>}, {pipeline_mode = #tpu.pipeline_mode<synchronous>, transform_indices = @transform_5, window_bounds = array<i64: 32, 32>}, {pipeline_mode = #tpu.pipeline_mode<synchronous>, transform_indices = @transform_6, window_bounds = array<i64: 32, 32>}, {pipeline_mode = #tpu.pipeline_mode<synchronous>, transform_indices = @transform_7, window_bounds = array<i64: 1, 32>}, {pipeline_mode = #tpu.pipeline_mode<synchronous>, transform_indices = @transform_8, window_bounds = array<i64: 1, 32>}, {pipeline_mode = #tpu.pipeline_mode<synchronous>, transform_indices = @transform_9, window_bounds = array<i64: 1, 32>}, {pipeline_mode = #tpu.pipeline_mode<synchronous>, transform_indices = @transform_10, window_bounds = array<i64: 1, 32>}, {pipeline_mode = #tpu.pipeline_mode<synchronous>, transform_indices = @transform_11, window_bounds = array<i64: 1, 32>}, {pipeline_mode = #tpu.pipeline_mode<synchronous>, transform_indices = @transform_12, window_bounds = array<i64: 1, 32>}, {transform_indices = @transform_13, window_bounds = array<i64: 1, 8, 32>}]} {
    %c0 = arith.constant 0 : index
    %c0_0 = arith.constant 0 : index
    %c0_1 = arith.constant 0 : index
    %0 = vector.load %arg1[%c0, %c0_0, %c0_1] : memref<1x8x32xf32, #tpu.memory_space<vmem>>, vector<1x8x32xf32>
    %1 = vector.shape_cast %0 : vector<1x8x32xf32> to vector<8x32xf32>
    %c0_2 = arith.constant 0 : index
    %c0_3 = arith.constant 0 : index
    %c0_4 = arith.constant 0 : index
    %2 = vector.load %arg2[%c0_2, %c0_3, %c0_4] : memref<1x8x32xf32, #tpu.memory_space<vmem>>, vector<1x8x32xf32>
    %3 = vector.shape_cast %2 : vector<1x8x32xf32> to vector<8x32xf32>
    %4 = arith.truncf %1 : vector<8x32xf32> to vector<8x32xbf16>
    %5 = arith.truncf %3 : vector<8x32xf32> to vector<8x32xbf16>
    %c0_5 = arith.constant 0 : index
    %c0_6 = arith.constant 0 : index
    %6 = vector.load %arg4[%c0_5, %c0_6] : memref<32x32xbf16, #tpu.memory_space<vmem>>, vector<32x32xbf16>
    %cst = arith.constant dense<0.000000e+00> : vector<8x32xf32>
    %7 = tpu.matmul %4, %6, %cst {dimension_numbers = #tpu.dot_dimension_numbers<[1], [0], [0], [1], [0, 0, 1, 1], [], []>} : vector<8x32xbf16>, vector<32x32xbf16>, vector<8x32xf32> -> vector<8x32xf32>
    %c0_7 = arith.constant 0 : index
    %c0_8 = arith.constant 0 : index
    %8 = vector.load %arg8[%c0_7, %c0_8] : memref<1x32xf32, #tpu.memory_space<vmem>>, vector<1x32xf32>
    %9 = vector.broadcast %8 : vector<1x32xf32> to vector<8x32xf32>
    %10 = arith.addf %7, %9 : vector<8x32xf32>
    %c0_9 = arith.constant 0 : index
    %c0_10 = arith.constant 0 : index
    %11 = vector.load %arg5[%c0_9, %c0_10] : memref<32x32xbf16, #tpu.memory_space<vmem>>, vector<32x32xbf16>
    %cst_11 = arith.constant dense<0.000000e+00> : vector<8x32xf32>
    %12 = tpu.matmul %5, %11, %cst_11 {dimension_numbers = #tpu.dot_dimension_numbers<[1], [0], [0], [1], [0, 0, 1, 1], [], []>} : vector<8x32xbf16>, vector<32x32xbf16>, vector<8x32xf32> -> vector<8x32xf32>
    %c0_12 = arith.constant 0 : index
    %c0_13 = arith.constant 0 : index
    %13 = vector.load %arg9[%c0_12, %c0_13] : memref<1x32xf32, #tpu.memory_space<vmem>>, vector<1x32xf32>
    %14 = vector.broadcast %13 : vector<1x32xf32> to vector<8x32xf32>
    %15 = arith.addf %12, %14 : vector<8x32xf32>
    %c0_14 = arith.constant 0 : index
    %c0_15 = arith.constant 0 : index
    %16 = vector.load %arg6[%c0_14, %c0_15] : memref<32x32xbf16, #tpu.memory_space<vmem>>, vector<32x32xbf16>
    %cst_16 = arith.constant dense<0.000000e+00> : vector<8x32xf32>
    %17 = tpu.matmul %5, %16, %cst_16 {dimension_numbers = #tpu.dot_dimension_numbers<[1], [0], [0], [1], [0, 0, 1, 1], [], []>} : vector<8x32xbf16>, vector<32x32xbf16>, vector<8x32xf32> -> vector<8x32xf32>
    %c0_17 = arith.constant 0 : index
    %c0_18 = arith.constant 0 : index
    %18 = vector.load %arg10[%c0_17, %c0_18] : memref<1x32xf32, #tpu.memory_space<vmem>>, vector<1x32xf32>
    %19 = vector.broadcast %18 : vector<1x32xf32> to vector<8x32xf32>
    %20 = arith.addf %17, %19 : vector<8x32xf32>
    %c0_19 = arith.constant 0 : index
    %c0_20 = arith.constant 0 : index
    %c0_21 = arith.constant 0 : index
    %21 = vector.load %arg3[%c0_19, %c0_20, %c0_21] : memref<1x1x8xf32, #tpu.memory_space<vmem>>, vector<1x1x8xf32>
    %22 = vector.shape_cast %21 : vector<1x1x8xf32> to vector<1x8xf32>
    %cst_22 = arith.constant 0.000000e+00 : f32
    %23 = vector.broadcast %cst_22 : f32 to vector<1x8xf32>
    %24 = arith.cmpf ogt, %22, %23 : vector<1x8xf32>
    %25 = vector.shape_cast %24 : vector<1x8xi1> to vector<1x8xi1>
    %26 = vector.broadcast %25 : vector<1x8xi1> to vector<8x8xi1>
    %cst_23 = arith.constant -1.000000e+09 : f32
    %cst_24 = arith.constant 0.000000e+00 : f32
    %27 = vector.broadcast %cst_23 : f32 to vector<8x8xf32>
    %28 = vector.broadcast %cst_24 : f32 to vector<8x8xf32>
    %29 = arith.select %26, %27, %28 : vector<8x8xi1>, vector<8x8xf32>
    %30 = vector.extract_strided_slice %10 {offsets = [0, 0], sizes = [8, 8], strides = [1, 1]} : vector<8x32xf32> to vector<8x8xf32>
    %31 = arith.truncf %30 : vector<8x8xf32> to vector<8x8xbf16>
    %32 = vector.extract_strided_slice %15 {offsets = [0, 0], sizes = [8, 8], strides = [1, 1]} : vector<8x32xf32> to vector<8x8xf32>
    %33 = arith.truncf %32 : vector<8x8xf32> to vector<8x8xbf16>
    %34 = vector.extract_strided_slice %20 {offsets = [0, 0], sizes = [8, 8], strides = [1, 1]} : vector<8x32xf32> to vector<8x8xf32>
    %35 = arith.truncf %34 : vector<8x8xf32> to vector<8x8xbf16>
    %cst_25 = arith.constant dense<0.000000e+00> : vector<8x8xf32>
    %36 = tpu.matmul %31, %33, %cst_25 {dimension_numbers = #tpu.dot_dimension_numbers<[1], [1], [0], [0], [0, 0, 1, 0], [], []>} : vector<8x8xbf16>, vector<8x8xbf16>, vector<8x8xf32> -> vector<8x8xf32>
    %37 = arith.addf %36, %29 : vector<8x8xf32>
    %cst_26 = arith.constant dense<0xFF800000> : vector<8xf32>
    %38 = vector.multi_reduction <maximumf>, %37, %cst_26 [1] : vector<8x8xf32> to vector<8xf32>
    %39 = vector.shape_cast %38 : vector<8xf32> to vector<8x1xf32>
    %40 = vector.broadcast %39 : vector<8x1xf32> to vector<8x8xf32>
    %41 = arith.subf %37, %40 : vector<8x8xf32>
    %42 = math.exp %41 : vector<8x8xf32>
    %cst_27 = arith.constant dense<0.000000e+00> : vector<8xf32>
    %43 = vector.multi_reduction <add>, %42, %cst_27 [1] : vector<8x8xf32> to vector<8xf32>
    %44 = vector.shape_cast %43 : vector<8xf32> to vector<8x1xf32>
    %45 = tpu.reciprocal %44 {approx = true} : vector<8x1xf32> -> vector<8x1xf32>
    %46 = vector.broadcast %45 : vector<8x1xf32> to vector<8x8xf32>
    %47 = arith.mulf %42, %46 : vector<8x8xf32>
    %48 = arith.truncf %47 : vector<8x8xf32> to vector<8x8xbf16>
    %cst_28 = arith.constant dense<0.000000e+00> : vector<8x8xf32>
    %49 = tpu.matmul %48, %35, %cst_28 {dimension_numbers = #tpu.dot_dimension_numbers<[1], [0], [0], [1], [0, 0, 1, 1], [], []>} : vector<8x8xbf16>, vector<8x8xbf16>, vector<8x8xf32> -> vector<8x8xf32>
    %50 = vector.extract_strided_slice %10 {offsets = [0, 8], sizes = [8, 8], strides = [1, 1]} : vector<8x32xf32> to vector<8x8xf32>
    %51 = arith.truncf %50 : vector<8x8xf32> to vector<8x8xbf16>
    %52 = vector.extract_strided_slice %15 {offsets = [0, 8], sizes = [8, 8], strides = [1, 1]} : vector<8x32xf32> to vector<8x8xf32>
    %53 = arith.truncf %52 : vector<8x8xf32> to vector<8x8xbf16>
    %54 = vector.extract_strided_slice %20 {offsets = [0, 8], sizes = [8, 8], strides = [1, 1]} : vector<8x32xf32> to vector<8x8xf32>
    %55 = arith.truncf %54 : vector<8x8xf32> to vector<8x8xbf16>
    %cst_29 = arith.constant dense<0.000000e+00> : vector<8x8xf32>
    %56 = tpu.matmul %51, %53, %cst_29 {dimension_numbers = #tpu.dot_dimension_numbers<[1], [1], [0], [0], [0, 0, 1, 0], [], []>} : vector<8x8xbf16>, vector<8x8xbf16>, vector<8x8xf32> -> vector<8x8xf32>
    %57 = arith.addf %56, %29 : vector<8x8xf32>
    %cst_30 = arith.constant dense<0xFF800000> : vector<8xf32>
    %58 = vector.multi_reduction <maximumf>, %57, %cst_30 [1] : vector<8x8xf32> to vector<8xf32>
    %59 = vector.shape_cast %58 : vector<8xf32> to vector<8x1xf32>
    %60 = vector.broadcast %59 : vector<8x1xf32> to vector<8x8xf32>
    %61 = arith.subf %57, %60 : vector<8x8xf32>
    %62 = math.exp %61 : vector<8x8xf32>
    %cst_31 = arith.constant dense<0.000000e+00> : vector<8xf32>
    %63 = vector.multi_reduction <add>, %62, %cst_31 [1] : vector<8x8xf32> to vector<8xf32>
    %64 = vector.shape_cast %63 : vector<8xf32> to vector<8x1xf32>
    %65 = tpu.reciprocal %64 {approx = true} : vector<8x1xf32> -> vector<8x1xf32>
    %66 = vector.broadcast %65 : vector<8x1xf32> to vector<8x8xf32>
    %67 = arith.mulf %62, %66 : vector<8x8xf32>
    %68 = arith.truncf %67 : vector<8x8xf32> to vector<8x8xbf16>
    %cst_32 = arith.constant dense<0.000000e+00> : vector<8x8xf32>
    %69 = tpu.matmul %68, %55, %cst_32 {dimension_numbers = #tpu.dot_dimension_numbers<[1], [0], [0], [1], [0, 0, 1, 1], [], []>} : vector<8x8xbf16>, vector<8x8xbf16>, vector<8x8xf32> -> vector<8x8xf32>
    %70 = vector.extract_strided_slice %10 {offsets = [0, 16], sizes = [8, 8], strides = [1, 1]} : vector<8x32xf32> to vector<8x8xf32>
    %71 = arith.truncf %70 : vector<8x8xf32> to vector<8x8xbf16>
    %72 = vector.extract_strided_slice %15 {offsets = [0, 16], sizes = [8, 8], strides = [1, 1]} : vector<8x32xf32> to vector<8x8xf32>
    %73 = arith.truncf %72 : vector<8x8xf32> to vector<8x8xbf16>
    %74 = vector.extract_strided_slice %20 {offsets = [0, 16], sizes = [8, 8], strides = [1, 1]} : vector<8x32xf32> to vector<8x8xf32>
    %75 = arith.truncf %74 : vector<8x8xf32> to vector<8x8xbf16>
    %cst_33 = arith.constant dense<0.000000e+00> : vector<8x8xf32>
    %76 = tpu.matmul %71, %73, %cst_33 {dimension_numbers = #tpu.dot_dimension_numbers<[1], [1], [0], [0], [0, 0, 1, 0], [], []>} : vector<8x8xbf16>, vector<8x8xbf16>, vector<8x8xf32> -> vector<8x8xf32>
    %77 = arith.addf %76, %29 : vector<8x8xf32>
    %cst_34 = arith.constant dense<0xFF800000> : vector<8xf32>
    %78 = vector.multi_reduction <maximumf>, %77, %cst_34 [1] : vector<8x8xf32> to vector<8xf32>
    %79 = vector.shape_cast %78 : vector<8xf32> to vector<8x1xf32>
    %80 = vector.broadcast %79 : vector<8x1xf32> to vector<8x8xf32>
    %81 = arith.subf %77, %80 : vector<8x8xf32>
    %82 = math.exp %81 : vector<8x8xf32>
    %cst_35 = arith.constant dense<0.000000e+00> : vector<8xf32>
    %83 = vector.multi_reduction <add>, %82, %cst_35 [1] : vector<8x8xf32> to vector<8xf32>
    %84 = vector.shape_cast %83 : vector<8xf32> to vector<8x1xf32>
    %85 = tpu.reciprocal %84 {approx = true} : vector<8x1xf32> -> vector<8x1xf32>
    %86 = vector.broadcast %85 : vector<8x1xf32> to vector<8x8xf32>
    %87 = arith.mulf %82, %86 : vector<8x8xf32>
    %88 = arith.truncf %87 : vector<8x8xf32> to vector<8x8xbf16>
    %cst_36 = arith.constant dense<0.000000e+00> : vector<8x8xf32>
    %89 = tpu.matmul %88, %75, %cst_36 {dimension_numbers = #tpu.dot_dimension_numbers<[1], [0], [0], [1], [0, 0, 1, 1], [], []>} : vector<8x8xbf16>, vector<8x8xbf16>, vector<8x8xf32> -> vector<8x8xf32>
    %90 = vector.extract_strided_slice %10 {offsets = [0, 24], sizes = [8, 8], strides = [1, 1]} : vector<8x32xf32> to vector<8x8xf32>
    %91 = arith.truncf %90 : vector<8x8xf32> to vector<8x8xbf16>
    %92 = vector.extract_strided_slice %15 {offsets = [0, 24], sizes = [8, 8], strides = [1, 1]} : vector<8x32xf32> to vector<8x8xf32>
    %93 = arith.truncf %92 : vector<8x8xf32> to vector<8x8xbf16>
    %94 = vector.extract_strided_slice %20 {offsets = [0, 24], sizes = [8, 8], strides = [1, 1]} : vector<8x32xf32> to vector<8x8xf32>
    %95 = arith.truncf %94 : vector<8x8xf32> to vector<8x8xbf16>
    %cst_37 = arith.constant dense<0.000000e+00> : vector<8x8xf32>
    %96 = tpu.matmul %91, %93, %cst_37 {dimension_numbers = #tpu.dot_dimension_numbers<[1], [1], [0], [0], [0, 0, 1, 0], [], []>} : vector<8x8xbf16>, vector<8x8xbf16>, vector<8x8xf32> -> vector<8x8xf32>
    %97 = arith.addf %96, %29 : vector<8x8xf32>
    %cst_38 = arith.constant dense<0xFF800000> : vector<8xf32>
    %98 = vector.multi_reduction <maximumf>, %97, %cst_38 [1] : vector<8x8xf32> to vector<8xf32>
    %99 = vector.shape_cast %98 : vector<8xf32> to vector<8x1xf32>
    %100 = vector.broadcast %99 : vector<8x1xf32> to vector<8x8xf32>
    %101 = arith.subf %97, %100 : vector<8x8xf32>
    %102 = math.exp %101 : vector<8x8xf32>
    %cst_39 = arith.constant dense<0.000000e+00> : vector<8xf32>
    %103 = vector.multi_reduction <add>, %102, %cst_39 [1] : vector<8x8xf32> to vector<8xf32>
    %104 = vector.shape_cast %103 : vector<8xf32> to vector<8x1xf32>
    %105 = tpu.reciprocal %104 {approx = true} : vector<8x1xf32> -> vector<8x1xf32>
    %106 = vector.broadcast %105 : vector<8x1xf32> to vector<8x8xf32>
    %107 = arith.mulf %102, %106 : vector<8x8xf32>
    %108 = arith.truncf %107 : vector<8x8xf32> to vector<8x8xbf16>
    %cst_40 = arith.constant dense<0.000000e+00> : vector<8x8xf32>
    %109 = tpu.matmul %108, %95, %cst_40 {dimension_numbers = #tpu.dot_dimension_numbers<[1], [0], [0], [1], [0, 0, 1, 1], [], []>} : vector<8x8xbf16>, vector<8x8xbf16>, vector<8x8xf32> -> vector<8x8xf32>
    %110 = tpu.concatenate %49, %69, %89, %109 in 1 : vector<8x8xf32>, vector<8x8xf32>, vector<8x8xf32>, vector<8x8xf32> -> vector<8x32xf32>
    %111 = arith.truncf %110 : vector<8x32xf32> to vector<8x32xbf16>
    %c0_41 = arith.constant 0 : index
    %c0_42 = arith.constant 0 : index
    %112 = vector.load %arg7[%c0_41, %c0_42] : memref<32x32xbf16, #tpu.memory_space<vmem>>, vector<32x32xbf16>
    %cst_43 = arith.constant dense<0.000000e+00> : vector<8x32xf32>
    %113 = tpu.matmul %111, %112, %cst_43 {dimension_numbers = #tpu.dot_dimension_numbers<[1], [0], [0], [1], [0, 0, 1, 1], [], []>} : vector<8x32xbf16>, vector<32x32xbf16>, vector<8x32xf32> -> vector<8x32xf32>
    %c0_44 = arith.constant 0 : index
    %c0_45 = arith.constant 0 : index
    %114 = vector.load %arg11[%c0_44, %c0_45] : memref<1x32xf32, #tpu.memory_space<vmem>>, vector<1x32xf32>
    %115 = vector.broadcast %114 : vector<1x32xf32> to vector<8x32xf32>
    %116 = arith.addf %113, %115 : vector<8x32xf32>
    %117 = arith.addf %1, %116 : vector<8x32xf32>
    %cst_46 = arith.constant dense<0.000000e+00> : vector<8xf32>
    %118 = vector.multi_reduction <add>, %117, %cst_46 [1] : vector<8x32xf32> to vector<8xf32>
    %119 = vector.shape_cast %118 : vector<8xf32> to vector<8x1xf32>
    %cst_47 = arith.constant 3.200000e+01 : f32
    %120 = vector.broadcast %cst_47 : f32 to vector<8x1xf32>
    %121 = arith.divf %119, %120 : vector<8x1xf32>
    %122 = arith.mulf %117, %117 : vector<8x32xf32>
    %cst_48 = arith.constant dense<0.000000e+00> : vector<8xf32>
    %123 = vector.multi_reduction <add>, %122, %cst_48 [1] : vector<8x32xf32> to vector<8xf32>
    %124 = vector.shape_cast %123 : vector<8xf32> to vector<8x1xf32>
    %cst_49 = arith.constant 3.200000e+01 : f32
    %125 = vector.broadcast %cst_49 : f32 to vector<8x1xf32>
    %126 = arith.divf %124, %125 : vector<8x1xf32>
    %127 = arith.mulf %121, %121 : vector<8x1xf32>
    %128 = arith.subf %126, %127 : vector<8x1xf32>
    %129 = vector.broadcast %121 : vector<8x1xf32> to vector<8x32xf32>
    %130 = arith.subf %117, %129 : vector<8x32xf32>
    %cst_50 = arith.constant 9.99999974E-6 : f32
    %131 = vector.broadcast %cst_50 : f32 to vector<8x1xf32>
    %132 = arith.addf %128, %131 : vector<8x1xf32>
    %133 = math.rsqrt %132 : vector<8x1xf32>
    %134 = vector.broadcast %133 : vector<8x1xf32> to vector<8x32xf32>
    %135 = arith.mulf %130, %134 : vector<8x32xf32>
    %c0_51 = arith.constant 0 : index
    %c0_52 = arith.constant 0 : index
    %136 = vector.load %arg12[%c0_51, %c0_52] : memref<1x32xf32, #tpu.memory_space<vmem>>, vector<1x32xf32>
    %137 = vector.broadcast %136 : vector<1x32xf32> to vector<8x32xf32>
    %138 = arith.mulf %135, %137 : vector<8x32xf32>
    %c0_53 = arith.constant 0 : index
    %c0_54 = arith.constant 0 : index
    %139 = vector.load %arg13[%c0_53, %c0_54] : memref<1x32xf32, #tpu.memory_space<vmem>>, vector<1x32xf32>
    %140 = vector.broadcast %139 : vector<1x32xf32> to vector<8x32xf32>
    %141 = arith.addf %138, %140 : vector<8x32xf32>
    %c0_55 = arith.constant 0 : index
    %c0_56 = arith.constant 0 : index
    %c0_57 = arith.constant 0 : index
    %142 = vector.load %arg14[%c0_55, %c0_56, %c0_57] : memref<1x8x32xf32, #tpu.memory_space<vmem>>, vector<1x8x32xf32>
    %143 = vector.shape_cast %142 : vector<1x8x32xf32> to vector<8x32xf32>
    %144 = vector.shape_cast %141 : vector<8x32xf32> to vector<1x8x32xf32>
    tpu.vector_store %arg14[%c0_55, %c0_56, %c0_57], %144 {strides = array<i32>} : memref<1x8x32xf32, #tpu.memory_space<vmem>>, vector<1x8x32xf32>,
    return
  }
  func.func @transform_0(%arg0: i32) -> (i32, i32, i32) {
    %c0_i32 = arith.constant 0 : i32
    %c0_i32_0 = arith.constant 0 : i32
    %c0_i32_1 = arith.constant 0 : i32
    return %arg0, %c0_i32, %c0_i32_0 : i32, i32, i32
  }
  func.func @transform_1(%arg0: i32) -> (i32, i32, i32) {
    %c0_i32 = arith.constant 0 : i32
    %c0_i32_0 = arith.constant 0 : i32
    %c0_i32_1 = arith.constant 0 : i32
    return %arg0, %c0_i32, %c0_i32_0 : i32, i32, i32
  }
  func.func @transform_2(%arg0: i32) -> (i32, i32, i32) {
    %c0_i32 = arith.constant 0 : i32
    %c0_i32_0 = arith.constant 0 : i32
    %c0_i32_1 = arith.constant 0 : i32
    return %arg0, %c0_i32, %c0_i32_0 : i32, i32, i32
  }
  func.func @transform_3(%arg0: i32) -> (i32, i32) {
    %c0_i32 = arith.constant 0 : i32
    %c0_i32_0 = arith.constant 0 : i32
    %c0_i32_1 = arith.constant 0 : i32
    return %c0_i32, %c0_i32_0 : i32, i32
  }
  func.func @transform_4(%arg0: i32) -> (i32, i32) {
    %c0_i32 = arith.constant 0 : i32
    %c0_i32_0 = arith.constant 0 : i32
    %c0_i32_1 = arith.constant 0 : i32
    return %c0_i32, %c0_i32_0 : i32, i32
  }
  func.func @transform_5(%arg0: i32) -> (i32, i32) {
    %c0_i32 = arith.constant 0 : i32
    %c0_i32_0 = arith.constant 0 : i32
    %c0_i32_1 = arith.constant 0 : i32
    return %c0_i32, %c0_i32_0 : i32, i32
  }
  func.func @transform_6(%arg0: i32) -> (i32, i32) {
    %c0_i32 = arith.constant 0 : i32
    %c0_i32_0 = arith.constant 0 : i32
    %c0_i32_1 = arith.constant 0 : i32
    return %c0_i32, %c0_i32_0 : i32, i32
  }
  func.func @transform_7(%arg0: i32) -> (i32, i32) {
    %c0_i32 = arith.constant 0 : i32
    %c0_i32_0 = arith.constant 0 : i32
    %c0_i32_1 = arith.constant 0 : i32
    return %c0_i32, %c0_i32_0 : i32, i32
  }
  func.func @transform_8(%arg0: i32) -> (i32, i32) {
    %c0_i32 = arith.constant 0 : i32
    %c0_i32_0 = arith.constant 0 : i32
    %c0_i32_1 = arith.constant 0 : i32
    return %c0_i32, %c0_i32_0 : i32, i32
  }
  func.func @transform_9(%arg0: i32) -> (i32, i32) {
    %c0_i32 = arith.constant 0 : i32
    %c0_i32_0 = arith.constant 0 : i32
    %c0_i32_1 = arith.constant 0 : i32
    return %c0_i32, %c0_i32_0 : i32, i32
  }
  func.func @transform_10(%arg0: i32) -> (i32, i32) {
    %c0_i32 = arith.constant 0 : i32
    %c0_i32_0 = arith.constant 0 : i32
    %c0_i32_1 = arith.constant 0 : i32
    return %c0_i32, %c0_i32_0 : i32, i32
  }
  func.func @transform_11(%arg0: i32) -> (i32, i32) {
    %c0_i32 = arith.constant 0 : i32
    %c0_i32_0 = arith.constant 0 : i32
    %c0_i32_1 = arith.constant 0 : i32
    return %c0_i32, %c0_i32_0 : i32, i32
  }
  func.func @transform_12(%arg0: i32) -> (i32, i32) {
    %c0_i32 = arith.constant 0 : i32
    %c0_i32_0 = arith.constant 0 : i32
    %c0_i32_1 = arith.constant 0 : i32
    return %c0_i32, %c0_i32_0 : i32, i32
  }
  func.func @transform_13(%arg0: i32) -> (i32, i32, i32) {
    %c0_i32 = arith.constant 0 : i32
    %c0_i32_0 = arith.constant 0 : i32
    %c0_i32_1 = arith.constant 0 : i32
    return %arg0, %c0_i32, %c0_i32_0 : i32, i32, i32
  }
}

module attributes {stable_mosaic.version = 11 : i64} {
  func.func @_mha_ln_kernel(%arg0: i32, %arg1: memref<1x8x32xf32, #tpu.memory_space<vmem>>, %arg2: memref<1x8x32xf32, #tpu.memory_space<vmem>>, %arg3: memref<1x1x8xf32, #tpu.memory_space<vmem>>, %arg4: memref<32x32xbf16, #tpu.memory_space<vmem>>, %arg5: memref<32x32xbf16, #tpu.memory_space<vmem>>, %arg6: memref<32x32xbf16, #tpu.memory_space<vmem>>, %arg7: memref<32x32xbf16, #tpu.memory_space<vmem>>, %arg8: memref<1x32xf32, #tpu.memory_space<vmem>>, %arg9: memref<1x32xf32, #tpu.memory_space<vmem>>, %arg10: memref<1x32xf32, #tpu.memory_space<vmem>>, %arg11: memref<1x32xf32, #tpu.memory_space<vmem>>, %arg12: memref<1x32xf32, #tpu.memory_space<vmem>>, %arg13: memref<1x32xf32, #tpu.memory_space<vmem>>, %arg14: memref<1x8x32xf32, #tpu.memory_space<vmem>>) attributes {dimension_semantics = [#tpu.dimension_semantics<parallel>], iteration_bounds = array<i64: 2>, scalar_prefetch = 0 : i64, scratch_operands = 0 : i64, tpu.core_type = #tpu.core_type<tc>, window_params = [{transform_indices = @transform_0, window_bounds = array<i64: 1, 8, 32>}, {transform_indices = @transform_1, window_bounds = array<i64: 1, 8, 32>}, {transform_indices = @transform_2, window_bounds = array<i64: 1, 1, 8>}, {pipeline_mode = #tpu.pipeline_mode<synchronous>, transform_indices = @transform_3, window_bounds = array<i64: 32, 32>}, {pipeline_mode = #tpu.pipeline_mode<synchronous>, transform_indices = @transform_4, window_bounds = array<i64: 32, 32>}, {pipeline_mode = #tpu.pipeline_mode<synchronous>, transform_indices = @transform_5, window_bounds = array<i64: 32, 32>}, {pipeline_mode = #tpu.pipeline_mode<synchronous>, transform_indices = @transform_6, window_bounds = array<i64: 32, 32>}, {pipeline_mode = #tpu.pipeline_mode<synchronous>, transform_indices = @transform_7, window_bounds = array<i64: 1, 32>}, {pipeline_mode = #tpu.pipeline_mode<synchronous>, transform_indices = @transform_8, window_bounds = array<i64: 1, 32>}, {pipeline_mode = #tpu.pipeline_mode<synchronous>, transform_indices = @transform_9, window_bounds = array<i64: 1, 32>}, {pipeline_mode = #tpu.pipeline_mode<synchronous>, transform_indices = @transform_10, window_bounds = array<i64: 1, 32>}, {pipeline_mode = #tpu.pipeline_mode<synchronous>, transform_indices = @transform_11, window_bounds = array<i64: 1, 32>}, {pipeline_mode = #tpu.pipeline_mode<synchronous>, transform_indices = @transform_12, window_bounds = array<i64: 1, 32>}, {transform_indices = @transform_13, window_bounds = array<i64: 1, 8, 32>}]} {
    %c0 = arith.constant 0 : index
    %c0_0 = arith.constant 0 : index
    %c0_1 = arith.constant 0 : index
    %0 = vector.load %arg1[%c0, %c0_0, %c0_1] : memref<1x8x32xf32, #tpu.memory_space<vmem>>, vector<1x8x32xf32>
    %1 = vector.shape_cast %0 : vector<1x8x32xf32> to vector<8x32xf32>
    %c0_2 = arith.constant 0 : index
    %c0_3 = arith.constant 0 : index
    %c0_4 = arith.constant 0 : index
    %2 = vector.load %arg2[%c0_2, %c0_3, %c0_4] : memref<1x8x32xf32, #tpu.memory_space<vmem>>, vector<1x8x32xf32>
    %3 = vector.shape_cast %2 : vector<1x8x32xf32> to vector<8x32xf32>
    %4 = arith.truncf %1 : vector<8x32xf32> to vector<8x32xbf16>
    %5 = arith.truncf %3 : vector<8x32xf32> to vector<8x32xbf16>
    %c0_5 = arith.constant 0 : index
    %c0_6 = arith.constant 0 : index
    %6 = vector.load %arg4[%c0_5, %c0_6] : memref<32x32xbf16, #tpu.memory_space<vmem>>, vector<32x32xbf16>
    %cst = arith.constant dense<0.000000e+00> : vector<8x32xf32>
    %7 = tpu.matmul %4, %6, %cst {dimension_numbers = #tpu.dot_dimension_numbers<[1], [0], [0], [1], [0, 0, 1, 1], [], []>} : vector<8x32xbf16>, vector<32x32xbf16>, vector<8x32xf32> -> vector<8x32xf32>
    %c0_7 = arith.constant 0 : index
    %c0_8 = arith.constant 0 : index
    %8 = vector.load %arg8[%c0_7, %c0_8] : memref<1x32xf32, #tpu.memory_space<vmem>>, vector<1x32xf32>
    %9 = vector.broadcast %8 : vector<1x32xf32> to vector<8x32xf32>
    %10 = arith.addf %7, %9 : vector<8x32xf32>
    %c0_9 = arith.constant 0 : index
    %c0_10 = arith.constant 0 : index
    %11 = vector.load %arg5[%c0_9, %c0_10] : memref<32x32xbf16, #tpu.memory_space<vmem>>, vector<32x32xbf16>
    %cst_11 = arith.constant dense<0.000000e+00> : vector<8x32xf32>
    %12 = tpu.matmul %5, %11, %cst_11 {dimension_numbers = #tpu.dot_dimension_numbers<[1], [0], [0], [1], [0, 0, 1, 1], [], []>} : vector<8x32xbf16>, vector<32x32xbf16>, vector<8x32xf32> -> vector<8x32xf32>
    %c0_12 = arith.constant 0 : index
    %c0_13 = arith.constant 0 : index
    %13 = vector.load %arg9[%c0_12, %c0_13] : memref<1x32xf32, #tpu.memory_space<vmem>>, vector<1x32xf32>
    %14 = vector.broadcast %13 : vector<1x32xf32> to vector<8x32xf32>
    %15 = arith.addf %12, %14 : vector<8x32xf32>
    %c0_14 = arith.constant 0 : index
    %c0_15 = arith.constant 0 : index
    %16 = vector.load %arg6[%c0_14, %c0_15] : memref<32x32xbf16, #tpu.memory_space<vmem>>, vector<32x32xbf16>
    %cst_16 = arith.constant dense<0.000000e+00> : vector<8x32xf32>
    %17 = tpu.matmul %5, %16, %cst_16 {dimension_numbers = #tpu.dot_dimension_numbers<[1], [0], [0], [1], [0, 0, 1, 1], [], []>} : vector<8x32xbf16>, vector<32x32xbf16>, vector<8x32xf32> -> vector<8x32xf32>
    %c0_17 = arith.constant 0 : index
    %c0_18 = arith.constant 0 : index
    %18 = vector.load %arg10[%c0_17, %c0_18] : memref<1x32xf32, #tpu.memory_space<vmem>>, vector<1x32xf32>
    %19 = vector.broadcast %18 : vector<1x32xf32> to vector<8x32xf32>
    %20 = arith.addf %17, %19 : vector<8x32xf32>
    %c0_19 = arith.constant 0 : index
    %c0_20 = arith.constant 0 : index
    %c0_21 = arith.constant 0 : index
    %21 = vector.load %arg3[%c0_19, %c0_20, %c0_21] : memref<1x1x8xf32, #tpu.memory_space<vmem>>, vector<1x1x8xf32>
    %22 = vector.shape_cast %21 : vector<1x1x8xf32> to vector<1x8xf32>
    %cst_22 = arith.constant 0.000000e+00 : f32
    %23 = vector.broadcast %cst_22 : f32 to vector<1x8xf32>
    %24 = arith.cmpf ogt, %22, %23 : vector<1x8xf32>
    %25 = vector.shape_cast %24 : vector<1x8xi1> to vector<1x8xi1>
    %26 = vector.broadcast %25 : vector<1x8xi1> to vector<8x8xi1>
    %cst_23 = arith.constant -1.000000e+09 : f32
    %cst_24 = arith.constant 0.000000e+00 : f32
    %27 = vector.broadcast %cst_23 : f32 to vector<8x8xf32>
    %28 = vector.broadcast %cst_24 : f32 to vector<8x8xf32>
    %29 = arith.select %26, %27, %28 : vector<8x8xi1>, vector<8x8xf32>
    %30 = vector.extract_strided_slice %10 {offsets = [0, 0], sizes = [8, 8], strides = [1, 1]} : vector<8x32xf32> to vector<8x8xf32>
    %31 = arith.truncf %30 : vector<8x8xf32> to vector<8x8xbf16>
    %32 = vector.extract_strided_slice %15 {offsets = [0, 0], sizes = [8, 8], strides = [1, 1]} : vector<8x32xf32> to vector<8x8xf32>
    %33 = arith.truncf %32 : vector<8x8xf32> to vector<8x8xbf16>
    %34 = vector.extract_strided_slice %20 {offsets = [0, 0], sizes = [8, 8], strides = [1, 1]} : vector<8x32xf32> to vector<8x8xf32>
    %35 = arith.truncf %34 : vector<8x8xf32> to vector<8x8xbf16>
    %cst_25 = arith.constant dense<0.000000e+00> : vector<8x8xf32>
    %36 = tpu.matmul %31, %33, %cst_25 {dimension_numbers = #tpu.dot_dimension_numbers<[1], [1], [0], [0], [0, 0, 1, 0], [], []>} : vector<8x8xbf16>, vector<8x8xbf16>, vector<8x8xf32> -> vector<8x8xf32>
    %37 = arith.addf %36, %29 : vector<8x8xf32>
    %cst_26 = arith.constant dense<0xFF800000> : vector<8xf32>
    %38 = vector.multi_reduction <maximumf>, %37, %cst_26 [1] : vector<8x8xf32> to vector<8xf32>
    %39 = vector.shape_cast %38 : vector<8xf32> to vector<8x1xf32>
    %40 = vector.broadcast %39 : vector<8x1xf32> to vector<8x8xf32>
    %41 = arith.subf %37, %40 : vector<8x8xf32>
    %42 = math.exp %41 : vector<8x8xf32>
    %cst_27 = arith.constant dense<0.000000e+00> : vector<8xf32>
    %43 = vector.multi_reduction <add>, %42, %cst_27 [1] : vector<8x8xf32> to vector<8xf32>
    %44 = vector.shape_cast %43 : vector<8xf32> to vector<8x1xf32>
    %45 = tpu.reciprocal %44 {approx = true} : vector<8x1xf32> -> vector<8x1xf32>
    %46 = vector.broadcast %45 : vector<8x1xf32> to vector<8x8xf32>
    %47 = arith.mulf %42, %46 : vector<8x8xf32>
    %48 = arith.truncf %47 : vector<8x8xf32> to vector<8x8xbf16>
    %cst_28 = arith.constant dense<0.000000e+00> : vector<8x8xf32>
    %49 = tpu.matmul %48, %35, %cst_28 {dimension_numbers = #tpu.dot_dimension_numbers<[1], [0], [0], [1], [0, 0, 1, 1], [], []>} : vector<8x8xbf16>, vector<8x8xbf16>, vector<8x8xf32> -> vector<8x8xf32>
    %50 = vector.extract_strided_slice %10 {offsets = [0, 8], sizes = [8, 8], strides = [1, 1]} : vector<8x32xf32> to vector<8x8xf32>
    %51 = arith.truncf %50 : vector<8x8xf32> to vector<8x8xbf16>
    %52 = vector.extract_strided_slice %15 {offsets = [0, 8], sizes = [8, 8], strides = [1, 1]} : vector<8x32xf32> to vector<8x8xf32>
    %53 = arith.truncf %52 : vector<8x8xf32> to vector<8x8xbf16>
    %54 = vector.extract_strided_slice %20 {offsets = [0, 8], sizes = [8, 8], strides = [1, 1]} : vector<8x32xf32> to vector<8x8xf32>
    %55 = arith.truncf %54 : vector<8x8xf32> to vector<8x8xbf16>
    %cst_29 = arith.constant dense<0.000000e+00> : vector<8x8xf32>
    %56 = tpu.matmul %51, %53, %cst_29 {dimension_numbers = #tpu.dot_dimension_numbers<[1], [1], [0], [0], [0, 0, 1, 0], [], []>} : vector<8x8xbf16>, vector<8x8xbf16>, vector<8x8xf32> -> vector<8x8xf32>
    %57 = arith.addf %56, %29 : vector<8x8xf32>
    %cst_30 = arith.constant dense<0xFF800000> : vector<8xf32>
    %58 = vector.multi_reduction <maximumf>, %57, %cst_30 [1] : vector<8x8xf32> to vector<8xf32>
    %59 = vector.shape_cast %58 : vector<8xf32> to vector<8x1xf32>
    %60 = vector.broadcast %59 : vector<8x1xf32> to vector<8x8xf32>
    %61 = arith.subf %57, %60 : vector<8x8xf32>
    %62 = math.exp %61 : vector<8x8xf32>
    %cst_31 = arith.constant dense<0.000000e+00> : vector<8xf32>
    %63 = vector.multi_reduction <add>, %62, %cst_31 [1] : vector<8x8xf32> to vector<8xf32>
    %64 = vector.shape_cast %63 : vector<8xf32> to vector<8x1xf32>
    %65 = tpu.reciprocal %64 {approx = true} : vector<8x1xf32> -> vector<8x1xf32>
    %66 = vector.broadcast %65 : vector<8x1xf32> to vector<8x8xf32>
    %67 = arith.mulf %62, %66 : vector<8x8xf32>
    %68 = arith.truncf %67 : vector<8x8xf32> to vector<8x8xbf16>
    %cst_32 = arith.constant dense<0.000000e+00> : vector<8x8xf32>
    %69 = tpu.matmul %68, %55, %cst_32 {dimension_numbers = #tpu.dot_dimension_numbers<[1], [0], [0], [1], [0, 0, 1, 1], [], []>} : vector<8x8xbf16>, vector<8x8xbf16>, vector<8x8xf32> -> vector<8x8xf32>
    %70 = vector.extract_strided_slice %10 {offsets = [0, 16], sizes = [8, 8], strides = [1, 1]} : vector<8x32xf32> to vector<8x8xf32>
    %71 = arith.truncf %70 : vector<8x8xf32> to vector<8x8xbf16>
    %72 = vector.extract_strided_slice %15 {offsets = [0, 16], sizes = [8, 8], strides = [1, 1]} : vector<8x32xf32> to vector<8x8xf32>
    %73 = arith.truncf %72 : vector<8x8xf32> to vector<8x8xbf16>
    %74 = vector.extract_strided_slice %20 {offsets = [0, 16], sizes = [8, 8], strides = [1, 1]} : vector<8x32xf32> to vector<8x8xf32>
    %75 = arith.truncf %74 : vector<8x8xf32> to vector<8x8xbf16>
    %cst_33 = arith.constant dense<0.000000e+00> : vector<8x8xf32>
    %76 = tpu.matmul %71, %73, %cst_33 {dimension_numbers = #tpu.dot_dimension_numbers<[1], [1], [0], [0], [0, 0, 1, 0], [], []>} : vector<8x8xbf16>, vector<8x8xbf16>, vector<8x8xf32> -> vector<8x8xf32>
    %77 = arith.addf %76, %29 : vector<8x8xf32>
    %cst_34 = arith.constant dense<0xFF800000> : vector<8xf32>
    %78 = vector.multi_reduction <maximumf>, %77, %cst_34 [1] : vector<8x8xf32> to vector<8xf32>
    %79 = vector.shape_cast %78 : vector<8xf32> to vector<8x1xf32>
    %80 = vector.broadcast %79 : vector<8x1xf32> to vector<8x8xf32>
    %81 = arith.subf %77, %80 : vector<8x8xf32>
    %82 = math.exp %81 : vector<8x8xf32>
    %cst_35 = arith.constant dense<0.000000e+00> : vector<8xf32>
    %83 = vector.multi_reduction <add>, %82, %cst_35 [1] : vector<8x8xf32> to vector<8xf32>
    %84 = vector.shape_cast %83 : vector<8xf32> to vector<8x1xf32>
    %85 = tpu.reciprocal %84 {approx = true} : vector<8x1xf32> -> vector<8x1xf32>
    %86 = vector.broadcast %85 : vector<8x1xf32> to vector<8x8xf32>
    %87 = arith.mulf %82, %86 : vector<8x8xf32>
    %88 = arith.truncf %87 : vector<8x8xf32> to vector<8x8xbf16>
    %cst_36 = arith.constant dense<0.000000e+00> : vector<8x8xf32>
    %89 = tpu.matmul %88, %75, %cst_36 {dimension_numbers = #tpu.dot_dimension_numbers<[1], [0], [0], [1], [0, 0, 1, 1], [], []>} : vector<8x8xbf16>, vector<8x8xbf16>, vector<8x8xf32> -> vector<8x8xf32>
    %90 = vector.extract_strided_slice %10 {offsets = [0, 24], sizes = [8, 8], strides = [1, 1]} : vector<8x32xf32> to vector<8x8xf32>
    %91 = arith.truncf %90 : vector<8x8xf32> to vector<8x8xbf16>
    %92 = vector.extract_strided_slice %15 {offsets = [0, 24], sizes = [8, 8], strides = [1, 1]} : vector<8x32xf32> to vector<8x8xf32>
    %93 = arith.truncf %92 : vector<8x8xf32> to vector<8x8xbf16>
    %94 = vector.extract_strided_slice %20 {offsets = [0, 24], sizes = [8, 8], strides = [1, 1]} : vector<8x32xf32> to vector<8x8xf32>
    %95 = arith.truncf %94 : vector<8x8xf32> to vector<8x8xbf16>
    %cst_37 = arith.constant dense<0.000000e+00> : vector<8x8xf32>
    %96 = tpu.matmul %91, %93, %cst_37 {dimension_numbers = #tpu.dot_dimension_numbers<[1], [1], [0], [0], [0, 0, 1, 0], [], []>} : vector<8x8xbf16>, vector<8x8xbf16>, vector<8x8xf32> -> vector<8x8xf32>
    %97 = arith.addf %96, %29 : vector<8x8xf32>
    %cst_38 = arith.constant dense<0xFF800000> : vector<8xf32>
    %98 = vector.multi_reduction <maximumf>, %97, %cst_38 [1] : vector<8x8xf32> to vector<8xf32>
    %99 = vector.shape_cast %98 : vector<8xf32> to vector<8x1xf32>
    %100 = vector.broadcast %99 : vector<8x1xf32> to vector<8x8xf32>
    %101 = arith.subf %97, %100 : vector<8x8xf32>
    %102 = math.exp %101 : vector<8x8xf32>
    %cst_39 = arith.constant dense<0.000000e+00> : vector<8xf32>
    %103 = vector.multi_reduction <add>, %102, %cst_39 [1] : vector<8x8xf32> to vector<8xf32>
    %104 = vector.shape_cast %103 : vector<8xf32> to vector<8x1xf32>
    %105 = tpu.reciprocal %104 {approx = true} : vector<8x1xf32> -> vector<8x1xf32>
    %106 = vector.broadcast %105 : vector<8x1xf32> to vector<8x8xf32>
    %107 = arith.mulf %102, %106 : vector<8x8xf32>
    %108 = arith.truncf %107 : vector<8x8xf32> to vector<8x8xbf16>
    %cst_40 = arith.constant dense<0.000000e+00> : vector<8x8xf32>
    %109 = tpu.matmul %108, %95, %cst_40 {dimension_numbers = #tpu.dot_dimension_numbers<[1], [0], [0], [1], [0, 0, 1, 1], [], []>} : vector<8x8xbf16>, vector<8x8xbf16>, vector<8x8xf32> -> vector<8x8xf32>
    %110 = tpu.concatenate %49, %69, %89, %109 in 1 : vector<8x8xf32>, vector<8x8xf32>, vector<8x8xf32>, vector<8x8xf32> -> vector<8x32xf32>
    %111 = arith.truncf %110 : vector<8x32xf32> to vector<8x32xbf16>
    %c0_41 = arith.constant 0 : index
    %c0_42 = arith.constant 0 : index
    %112 = vector.load %arg7[%c0_41, %c0_42] : memref<32x32xbf16, #tpu.memory_space<vmem>>, vector<32x32xbf16>
    %cst_43 = arith.constant dense<0.000000e+00> : vector<8x32xf32>
    %113 = tpu.matmul %111, %112, %cst_43 {dimension_numbers = #tpu.dot_dimension_numbers<[1], [0], [0], [1], [0, 0, 1, 1], [], []>} : vector<8x32xbf16>, vector<32x32xbf16>, vector<8x32xf32> -> vector<8x32xf32>
    %c0_44 = arith.constant 0 : index
    %c0_45 = arith.constant 0 : index
    %114 = vector.load %arg11[%c0_44, %c0_45] : memref<1x32xf32, #tpu.memory_space<vmem>>, vector<1x32xf32>
    %115 = vector.broadcast %114 : vector<1x32xf32> to vector<8x32xf32>
    %116 = arith.addf %113, %115 : vector<8x32xf32>
    %117 = arith.addf %1, %116 : vector<8x32xf32>
    %cst_46 = arith.constant dense<0.000000e+00> : vector<8xf32>
    %118 = vector.multi_reduction <add>, %117, %cst_46 [1] : vector<8x32xf32> to vector<8xf32>
    %119 = vector.shape_cast %118 : vector<8xf32> to vector<8x1xf32>
    %cst_47 = arith.constant 3.200000e+01 : f32
    %120 = vector.broadcast %cst_47 : f32 to vector<8x1xf32>
    %121 = arith.divf %119, %120 : vector<8x1xf32>
    %122 = arith.mulf %117, %117 : vector<8x32xf32>
    %cst_48 = arith.constant dense<0.000000e+00> : vector<8xf32>
    %123 = vector.multi_reduction <add>, %122, %cst_48 [1] : vector<8x32xf32> to vector<8xf32>
    %124 = vector.shape_cast %123 : vector<8xf32> to vector<8x1xf32>
    %cst_49 = arith.constant 3.200000e+01 : f32
    %125 = vector.broadcast %cst_49 : f32 to vector<8x1xf32>
    %126 = arith.divf %124, %125 : vector<8x1xf32>
    %127 = arith.mulf %121, %121 : vector<8x1xf32>
    %128 = arith.subf %126, %127 : vector<8x1xf32>
    %129 = vector.broadcast %121 : vector<8x1xf32> to vector<8x32xf32>
    %130 = arith.subf %117, %129 : vector<8x32xf32>
    %cst_50 = arith.constant 9.99999974E-6 : f32
    %131 = vector.broadcast %cst_50 : f32 to vector<8x1xf32>
    %132 = arith.addf %128, %131 : vector<8x1xf32>
    %133 = math.rsqrt %132 : vector<8x1xf32>
    %134 = vector.broadcast %133 : vector<8x1xf32> to vector<8x32xf32>
    %135 = arith.mulf %130, %134 : vector<8x32xf32>
    %c0_51 = arith.constant 0 : index
    %c0_52 = arith.constant 0 : index
    %136 = vector.load %arg12[%c0_51, %c0_52] : memref<1x32xf32, #tpu.memory_space<vmem>>, vector<1x32xf32>
    %137 = vector.broadcast %136 : vector<1x32xf32> to vector<8x32xf32>
    %138 = arith.mulf %135, %137 : vector<8x32xf32>
    %c0_53 = arith.constant 0 : index
    %c0_54 = arith.constant 0 : index
    %139 = vector.load %arg13[%c0_53, %c0_54] : memref<1x32xf32, #tpu.memory_space<vmem>>, vector<1x32xf32>
    %140 = vector.broadcast %139 : vector<1x32xf32> to vector<8x32xf32>
    %141 = arith.addf %138, %140 : vector<8x32xf32>
    %c0_55 = arith.constant 0 : index
    %c0_56 = arith.constant 0 : index
    %c0_57 = arith.constant 0 : index
    %142 = vector.load %arg14[%c0_55, %c0_56, %c0_57] : memref<1x8x32xf32, #tpu.memory_space<vmem>>, vector<1x8x32xf32>
    %143 = vector.shape_cast %142 : vector<1x8x32xf32> to vector<8x32xf32>
    %144 = vector.shape_cast %141 : vector<8x32xf32> to vector<1x8x32xf32>
    tpu.vector_store %arg14[%c0_55, %c0_56, %c0_57], %144 {strides = array<i32>} : memref<1x8x32xf32, #tpu.memory_space<vmem>>, vector<1x8x32xf32>,
    return
  }
  func.func @transform_0(%arg0: i32) -> (i32, i32, i32) {
    %c0_i32 = arith.constant 0 : i32
    %c0_i32_0 = arith.constant 0 : i32
    %c0_i32_1 = arith.constant 0 : i32
    return %arg0, %c0_i32, %c0_i32_0 : i32, i32, i32
  }
  func.func @transform_1(%arg0: i32) -> (i32, i32, i32) {
    %c0_i32 = arith.constant 0 : i32
    %c0_i32_0 = arith.constant 0 : i32
    %c0_i32_1 = arith.constant 0 : i32
    return %arg0, %c0_i32, %c0_i32_0 : i32, i32, i32
  }
  func.func @transform_2(%arg0: i32) -> (i32, i32, i32) {
    %c0_i32 = arith.constant 0 : i32
    %c0_i32_0 = arith.constant 0 : i32
    %c0_i32_1 = arith.constant 0 : i32
    return %arg0, %c0_i32, %c0_i32_0 : i32, i32, i32
  }
  func.func @transform_3(%arg0: i32) -> (i32, i32) {
    %c0_i32 = arith.constant 0 : i32
    %c0_i32_0 = arith.constant 0 : i32
    %c0_i32_1 = arith.constant 0 : i32
    return %c0_i32, %c0_i32_0 : i32, i32
  }
  func.func @transform_4(%arg0: i32) -> (i32, i32) {
    %c0_i32 = arith.constant 0 : i32
    %c0_i32_0 = arith.constant 0 : i32
    %c0_i32_1 = arith.constant 0 : i32
    return %c0_i32, %c0_i32_0 : i32, i32
  }
  func.func @transform_5(%arg0: i32) -> (i32, i32) {
    %c0_i32 = arith.constant 0 : i32
    %c0_i32_0 = arith.constant 0 : i32
    %c0_i32_1 = arith.constant 0 : i32
    return %c0_i32, %c0_i32_0 : i32, i32
  }
  func.func @transform_6(%arg0: i32) -> (i32, i32) {
    %c0_i32 = arith.constant 0 : i32
    %c0_i32_0 = arith.constant 0 : i32
    %c0_i32_1 = arith.constant 0 : i32
    return %c0_i32, %c0_i32_0 : i32, i32
  }
  func.func @transform_7(%arg0: i32) -> (i32, i32) {
    %c0_i32 = arith.constant 0 : i32
    %c0_i32_0 = arith.constant 0 : i32
    %c0_i32_1 = arith.constant 0 : i32
    return %c0_i32, %c0_i32_0 : i32, i32
  }
  func.func @transform_8(%arg0: i32) -> (i32, i32) {
    %c0_i32 = arith.constant 0 : i32
    %c0_i32_0 = arith.constant 0 : i32
    %c0_i32_1 = arith.constant 0 : i32
    return %c0_i32, %c0_i32_0 : i32, i32
  }
  func.func @transform_9(%arg0: i32) -> (i32, i32) {
    %c0_i32 = arith.constant 0 : i32
    %c0_i32_0 = arith.constant 0 : i32
    %c0_i32_1 = arith.constant 0 : i32
    return %c0_i32, %c0_i32_0 : i32, i32
  }
  func.func @transform_10(%arg0: i32) -> (i32, i32) {
    %c0_i32 = arith.constant 0 : i32
    %c0_i32_0 = arith.constant 0 : i32
    %c0_i32_1 = arith.constant 0 : i32
    return %c0_i32, %c0_i32_0 : i32, i32
  }
  func.func @transform_11(%arg0: i32) -> (i32, i32) {
    %c0_i32 = arith.constant 0 : i32
    %c0_i32_0 = arith.constant 0 : i32
    %c0_i32_1 = arith.constant 0 : i32
    return %c0_i32, %c0_i32_0 : i32, i32
  }
  func.func @transform_12(%arg0: i32) -> (i32, i32) {
    %c0_i32 = arith.constant 0 : i32
    %c0_i32_0 = arith.constant 0 : i32
    %c0_i32_1 = arith.constant 0 : i32
    return %c0_i32, %c0_i32_0 : i32, i32
  }
  func.func @transform_13(%arg0: i32) -> (i32, i32, i32) {
    %c0_i32 = arith.constant 0 : i32
    %c0_i32_0 = arith.constant 0 : i32
    %c0_i32_1 = arith.constant 0 : i32
    return %arg0, %c0_i32, %c0_i32_0 : i32, i32, i32
  }
}

module attributes {stable_mosaic.version = 11 : i64} {
  func.func @_mha_ln_kernel(%arg0: i32, %arg1: memref<1x8x32xf32, #tpu.memory_space<vmem>>, %arg2: memref<1x8x32xf32, #tpu.memory_space<vmem>>, %arg3: memref<1x1x8xf32, #tpu.memory_space<vmem>>, %arg4: memref<32x32xbf16, #tpu.memory_space<vmem>>, %arg5: memref<32x32xbf16, #tpu.memory_space<vmem>>, %arg6: memref<32x32xbf16, #tpu.memory_space<vmem>>, %arg7: memref<32x32xbf16, #tpu.memory_space<vmem>>, %arg8: memref<1x32xf32, #tpu.memory_space<vmem>>, %arg9: memref<1x32xf32, #tpu.memory_space<vmem>>, %arg10: memref<1x32xf32, #tpu.memory_space<vmem>>, %arg11: memref<1x32xf32, #tpu.memory_space<vmem>>, %arg12: memref<1x32xf32, #tpu.memory_space<vmem>>, %arg13: memref<1x32xf32, #tpu.memory_space<vmem>>, %arg14: memref<1x8x32xf32, #tpu.memory_space<vmem>>) attributes {dimension_semantics = [#tpu.dimension_semantics<parallel>], iteration_bounds = array<i64: 2>, scalar_prefetch = 0 : i64, scratch_operands = 0 : i64, tpu.core_type = #tpu.core_type<tc>, window_params = [{transform_indices = @transform_0, window_bounds = array<i64: 1, 8, 32>}, {transform_indices = @transform_1, window_bounds = array<i64: 1, 8, 32>}, {transform_indices = @transform_2, window_bounds = array<i64: 1, 1, 8>}, {pipeline_mode = #tpu.pipeline_mode<synchronous>, transform_indices = @transform_3, window_bounds = array<i64: 32, 32>}, {pipeline_mode = #tpu.pipeline_mode<synchronous>, transform_indices = @transform_4, window_bounds = array<i64: 32, 32>}, {pipeline_mode = #tpu.pipeline_mode<synchronous>, transform_indices = @transform_5, window_bounds = array<i64: 32, 32>}, {pipeline_mode = #tpu.pipeline_mode<synchronous>, transform_indices = @transform_6, window_bounds = array<i64: 32, 32>}, {pipeline_mode = #tpu.pipeline_mode<synchronous>, transform_indices = @transform_7, window_bounds = array<i64: 1, 32>}, {pipeline_mode = #tpu.pipeline_mode<synchronous>, transform_indices = @transform_8, window_bounds = array<i64: 1, 32>}, {pipeline_mode = #tpu.pipeline_mode<synchronous>, transform_indices = @transform_9, window_bounds = array<i64: 1, 32>}, {pipeline_mode = #tpu.pipeline_mode<synchronous>, transform_indices = @transform_10, window_bounds = array<i64: 1, 32>}, {pipeline_mode = #tpu.pipeline_mode<synchronous>, transform_indices = @transform_11, window_bounds = array<i64: 1, 32>}, {pipeline_mode = #tpu.pipeline_mode<synchronous>, transform_indices = @transform_12, window_bounds = array<i64: 1, 32>}, {transform_indices = @transform_13, window_bounds = array<i64: 1, 8, 32>}]} {
    %c0 = arith.constant 0 : index
    %c0_0 = arith.constant 0 : index
    %c0_1 = arith.constant 0 : index
    %0 = vector.load %arg1[%c0, %c0_0, %c0_1] : memref<1x8x32xf32, #tpu.memory_space<vmem>>, vector<1x8x32xf32>
    %1 = vector.shape_cast %0 : vector<1x8x32xf32> to vector<8x32xf32>
    %c0_2 = arith.constant 0 : index
    %c0_3 = arith.constant 0 : index
    %c0_4 = arith.constant 0 : index
    %2 = vector.load %arg2[%c0_2, %c0_3, %c0_4] : memref<1x8x32xf32, #tpu.memory_space<vmem>>, vector<1x8x32xf32>
    %3 = vector.shape_cast %2 : vector<1x8x32xf32> to vector<8x32xf32>
    %4 = arith.truncf %1 : vector<8x32xf32> to vector<8x32xbf16>
    %5 = arith.truncf %3 : vector<8x32xf32> to vector<8x32xbf16>
    %c0_5 = arith.constant 0 : index
    %c0_6 = arith.constant 0 : index
    %6 = vector.load %arg4[%c0_5, %c0_6] : memref<32x32xbf16, #tpu.memory_space<vmem>>, vector<32x32xbf16>
    %cst = arith.constant dense<0.000000e+00> : vector<8x32xf32>
    %7 = tpu.matmul %4, %6, %cst {dimension_numbers = #tpu.dot_dimension_numbers<[1], [0], [0], [1], [0, 0, 1, 1], [], []>} : vector<8x32xbf16>, vector<32x32xbf16>, vector<8x32xf32> -> vector<8x32xf32>
    %c0_7 = arith.constant 0 : index
    %c0_8 = arith.constant 0 : index
    %8 = vector.load %arg8[%c0_7, %c0_8] : memref<1x32xf32, #tpu.memory_space<vmem>>, vector<1x32xf32>
    %9 = vector.broadcast %8 : vector<1x32xf32> to vector<8x32xf32>
    %10 = arith.addf %7, %9 : vector<8x32xf32>
    %c0_9 = arith.constant 0 : index
    %c0_10 = arith.constant 0 : index
    %11 = vector.load %arg5[%c0_9, %c0_10] : memref<32x32xbf16, #tpu.memory_space<vmem>>, vector<32x32xbf16>
    %cst_11 = arith.constant dense<0.000000e+00> : vector<8x32xf32>
    %12 = tpu.matmul %5, %11, %cst_11 {dimension_numbers = #tpu.dot_dimension_numbers<[1], [0], [0], [1], [0, 0, 1, 1], [], []>} : vector<8x32xbf16>, vector<32x32xbf16>, vector<8x32xf32> -> vector<8x32xf32>
    %c0_12 = arith.constant 0 : index
    %c0_13 = arith.constant 0 : index
    %13 = vector.load %arg9[%c0_12, %c0_13] : memref<1x32xf32, #tpu.memory_space<vmem>>, vector<1x32xf32>
    %14 = vector.broadcast %13 : vector<1x32xf32> to vector<8x32xf32>
    %15 = arith.addf %12, %14 : vector<8x32xf32>
    %c0_14 = arith.constant 0 : index
    %c0_15 = arith.constant 0 : index
    %16 = vector.load %arg6[%c0_14, %c0_15] : memref<32x32xbf16, #tpu.memory_space<vmem>>, vector<32x32xbf16>
    %cst_16 = arith.constant dense<0.000000e+00> : vector<8x32xf32>
    %17 = tpu.matmul %5, %16, %cst_16 {dimension_numbers = #tpu.dot_dimension_numbers<[1], [0], [0], [1], [0, 0, 1, 1], [], []>} : vector<8x32xbf16>, vector<32x32xbf16>, vector<8x32xf32> -> vector<8x32xf32>
    %c0_17 = arith.constant 0 : index
    %c0_18 = arith.constant 0 : index
    %18 = vector.load %arg10[%c0_17, %c0_18] : memref<1x32xf32, #tpu.memory_space<vmem>>, vector<1x32xf32>
    %19 = vector.broadcast %18 : vector<1x32xf32> to vector<8x32xf32>
    %20 = arith.addf %17, %19 : vector<8x32xf32>
    %c0_19 = arith.constant 0 : index
    %c0_20 = arith.constant 0 : index
    %c0_21 = arith.constant 0 : index
    %21 = vector.load %arg3[%c0_19, %c0_20, %c0_21] : memref<1x1x8xf32, #tpu.memory_space<vmem>>, vector<1x1x8xf32>
    %22 = vector.shape_cast %21 : vector<1x1x8xf32> to vector<1x8xf32>
    %cst_22 = arith.constant 0.000000e+00 : f32
    %23 = vector.broadcast %cst_22 : f32 to vector<1x8xf32>
    %24 = arith.cmpf ogt, %22, %23 : vector<1x8xf32>
    %25 = vector.shape_cast %24 : vector<1x8xi1> to vector<1x8xi1>
    %26 = vector.broadcast %25 : vector<1x8xi1> to vector<8x8xi1>
    %27 = tpu.iota {dimensions = array<i32: 0>} : vector<8x8xi32>
    %28 = tpu.iota {dimensions = array<i32: 1>} : vector<8x8xi32>
    %29 = arith.cmpi sgt, %28, %27 : vector<8x8xi32>
    %30 = arith.ori %26, %29 : vector<8x8xi1>
    %cst_23 = arith.constant -1.000000e+09 : f32
    %cst_24 = arith.constant 0.000000e+00 : f32
    %31 = vector.broadcast %cst_23 : f32 to vector<8x8xf32>
    %32 = vector.broadcast %cst_24 : f32 to vector<8x8xf32>
    %33 = arith.select %30, %31, %32 : vector<8x8xi1>, vector<8x8xf32>
    %34 = vector.extract_strided_slice %10 {offsets = [0, 0], sizes = [8, 8], strides = [1, 1]} : vector<8x32xf32> to vector<8x8xf32>
    %35 = arith.truncf %34 : vector<8x8xf32> to vector<8x8xbf16>
    %36 = vector.extract_strided_slice %15 {offsets = [0, 0], sizes = [8, 8], strides = [1, 1]} : vector<8x32xf32> to vector<8x8xf32>
    %37 = arith.truncf %36 : vector<8x8xf32> to vector<8x8xbf16>
    %38 = vector.extract_strided_slice %20 {offsets = [0, 0], sizes = [8, 8], strides = [1, 1]} : vector<8x32xf32> to vector<8x8xf32>
    %39 = arith.truncf %38 : vector<8x8xf32> to vector<8x8xbf16>
    %cst_25 = arith.constant dense<0.000000e+00> : vector<8x8xf32>
    %40 = tpu.matmul %35, %37, %cst_25 {dimension_numbers = #tpu.dot_dimension_numbers<[1], [1], [0], [0], [0, 0, 1, 0], [], []>} : vector<8x8xbf16>, vector<8x8xbf16>, vector<8x8xf32> -> vector<8x8xf32>
    %41 = arith.addf %40, %33 : vector<8x8xf32>
    %cst_26 = arith.constant dense<0xFF800000> : vector<8xf32>
    %42 = vector.multi_reduction <maximumf>, %41, %cst_26 [1] : vector<8x8xf32> to vector<8xf32>
    %43 = vector.shape_cast %42 : vector<8xf32> to vector<8x1xf32>
    %44 = vector.broadcast %43 : vector<8x1xf32> to vector<8x8xf32>
    %45 = arith.subf %41, %44 : vector<8x8xf32>
    %46 = math.exp %45 : vector<8x8xf32>
    %cst_27 = arith.constant dense<0.000000e+00> : vector<8xf32>
    %47 = vector.multi_reduction <add>, %46, %cst_27 [1] : vector<8x8xf32> to vector<8xf32>
    %48 = vector.shape_cast %47 : vector<8xf32> to vector<8x1xf32>
    %49 = tpu.reciprocal %48 {approx = true} : vector<8x1xf32> -> vector<8x1xf32>
    %50 = vector.broadcast %49 : vector<8x1xf32> to vector<8x8xf32>
    %51 = arith.mulf %46, %50 : vector<8x8xf32>
    %52 = arith.truncf %51 : vector<8x8xf32> to vector<8x8xbf16>
    %cst_28 = arith.constant dense<0.000000e+00> : vector<8x8xf32>
    %53 = tpu.matmul %52, %39, %cst_28 {dimension_numbers = #tpu.dot_dimension_numbers<[1], [0], [0], [1], [0, 0, 1, 1], [], []>} : vector<8x8xbf16>, vector<8x8xbf16>, vector<8x8xf32> -> vector<8x8xf32>
    %54 = vector.extract_strided_slice %10 {offsets = [0, 8], sizes = [8, 8], strides = [1, 1]} : vector<8x32xf32> to vector<8x8xf32>
    %55 = arith.truncf %54 : vector<8x8xf32> to vector<8x8xbf16>
    %56 = vector.extract_strided_slice %15 {offsets = [0, 8], sizes = [8, 8], strides = [1, 1]} : vector<8x32xf32> to vector<8x8xf32>
    %57 = arith.truncf %56 : vector<8x8xf32> to vector<8x8xbf16>
    %58 = vector.extract_strided_slice %20 {offsets = [0, 8], sizes = [8, 8], strides = [1, 1]} : vector<8x32xf32> to vector<8x8xf32>
    %59 = arith.truncf %58 : vector<8x8xf32> to vector<8x8xbf16>
    %cst_29 = arith.constant dense<0.000000e+00> : vector<8x8xf32>
    %60 = tpu.matmul %55, %57, %cst_29 {dimension_numbers = #tpu.dot_dimension_numbers<[1], [1], [0], [0], [0, 0, 1, 0], [], []>} : vector<8x8xbf16>, vector<8x8xbf16>, vector<8x8xf32> -> vector<8x8xf32>
    %61 = arith.addf %60, %33 : vector<8x8xf32>
    %cst_30 = arith.constant dense<0xFF800000> : vector<8xf32>
    %62 = vector.multi_reduction <maximumf>, %61, %cst_30 [1] : vector<8x8xf32> to vector<8xf32>
    %63 = vector.shape_cast %62 : vector<8xf32> to vector<8x1xf32>
    %64 = vector.broadcast %63 : vector<8x1xf32> to vector<8x8xf32>
    %65 = arith.subf %61, %64 : vector<8x8xf32>
    %66 = math.exp %65 : vector<8x8xf32>
    %cst_31 = arith.constant dense<0.000000e+00> : vector<8xf32>
    %67 = vector.multi_reduction <add>, %66, %cst_31 [1] : vector<8x8xf32> to vector<8xf32>
    %68 = vector.shape_cast %67 : vector<8xf32> to vector<8x1xf32>
    %69 = tpu.reciprocal %68 {approx = true} : vector<8x1xf32> -> vector<8x1xf32>
    %70 = vector.broadcast %69 : vector<8x1xf32> to vector<8x8xf32>
    %71 = arith.mulf %66, %70 : vector<8x8xf32>
    %72 = arith.truncf %71 : vector<8x8xf32> to vector<8x8xbf16>
    %cst_32 = arith.constant dense<0.000000e+00> : vector<8x8xf32>
    %73 = tpu.matmul %72, %59, %cst_32 {dimension_numbers = #tpu.dot_dimension_numbers<[1], [0], [0], [1], [0, 0, 1, 1], [], []>} : vector<8x8xbf16>, vector<8x8xbf16>, vector<8x8xf32> -> vector<8x8xf32>
    %74 = vector.extract_strided_slice %10 {offsets = [0, 16], sizes = [8, 8], strides = [1, 1]} : vector<8x32xf32> to vector<8x8xf32>
    %75 = arith.truncf %74 : vector<8x8xf32> to vector<8x8xbf16>
    %76 = vector.extract_strided_slice %15 {offsets = [0, 16], sizes = [8, 8], strides = [1, 1]} : vector<8x32xf32> to vector<8x8xf32>
    %77 = arith.truncf %76 : vector<8x8xf32> to vector<8x8xbf16>
    %78 = vector.extract_strided_slice %20 {offsets = [0, 16], sizes = [8, 8], strides = [1, 1]} : vector<8x32xf32> to vector<8x8xf32>
    %79 = arith.truncf %78 : vector<8x8xf32> to vector<8x8xbf16>
    %cst_33 = arith.constant dense<0.000000e+00> : vector<8x8xf32>
    %80 = tpu.matmul %75, %77, %cst_33 {dimension_numbers = #tpu.dot_dimension_numbers<[1], [1], [0], [0], [0, 0, 1, 0], [], []>} : vector<8x8xbf16>, vector<8x8xbf16>, vector<8x8xf32> -> vector<8x8xf32>
    %81 = arith.addf %80, %33 : vector<8x8xf32>
    %cst_34 = arith.constant dense<0xFF800000> : vector<8xf32>
    %82 = vector.multi_reduction <maximumf>, %81, %cst_34 [1] : vector<8x8xf32> to vector<8xf32>
    %83 = vector.shape_cast %82 : vector<8xf32> to vector<8x1xf32>
    %84 = vector.broadcast %83 : vector<8x1xf32> to vector<8x8xf32>
    %85 = arith.subf %81, %84 : vector<8x8xf32>
    %86 = math.exp %85 : vector<8x8xf32>
    %cst_35 = arith.constant dense<0.000000e+00> : vector<8xf32>
    %87 = vector.multi_reduction <add>, %86, %cst_35 [1] : vector<8x8xf32> to vector<8xf32>
    %88 = vector.shape_cast %87 : vector<8xf32> to vector<8x1xf32>
    %89 = tpu.reciprocal %88 {approx = true} : vector<8x1xf32> -> vector<8x1xf32>
    %90 = vector.broadcast %89 : vector<8x1xf32> to vector<8x8xf32>
    %91 = arith.mulf %86, %90 : vector<8x8xf32>
    %92 = arith.truncf %91 : vector<8x8xf32> to vector<8x8xbf16>
    %cst_36 = arith.constant dense<0.000000e+00> : vector<8x8xf32>
    %93 = tpu.matmul %92, %79, %cst_36 {dimension_numbers = #tpu.dot_dimension_numbers<[1], [0], [0], [1], [0, 0, 1, 1], [], []>} : vector<8x8xbf16>, vector<8x8xbf16>, vector<8x8xf32> -> vector<8x8xf32>
    %94 = vector.extract_strided_slice %10 {offsets = [0, 24], sizes = [8, 8], strides = [1, 1]} : vector<8x32xf32> to vector<8x8xf32>
    %95 = arith.truncf %94 : vector<8x8xf32> to vector<8x8xbf16>
    %96 = vector.extract_strided_slice %15 {offsets = [0, 24], sizes = [8, 8], strides = [1, 1]} : vector<8x32xf32> to vector<8x8xf32>
    %97 = arith.truncf %96 : vector<8x8xf32> to vector<8x8xbf16>
    %98 = vector.extract_strided_slice %20 {offsets = [0, 24], sizes = [8, 8], strides = [1, 1]} : vector<8x32xf32> to vector<8x8xf32>
    %99 = arith.truncf %98 : vector<8x8xf32> to vector<8x8xbf16>
    %cst_37 = arith.constant dense<0.000000e+00> : vector<8x8xf32>
    %100 = tpu.matmul %95, %97, %cst_37 {dimension_numbers = #tpu.dot_dimension_numbers<[1], [1], [0], [0], [0, 0, 1, 0], [], []>} : vector<8x8xbf16>, vector<8x8xbf16>, vector<8x8xf32> -> vector<8x8xf32>
    %101 = arith.addf %100, %33 : vector<8x8xf32>
    %cst_38 = arith.constant dense<0xFF800000> : vector<8xf32>
    %102 = vector.multi_reduction <maximumf>, %101, %cst_38 [1] : vector<8x8xf32> to vector<8xf32>
    %103 = vector.shape_cast %102 : vector<8xf32> to vector<8x1xf32>
    %104 = vector.broadcast %103 : vector<8x1xf32> to vector<8x8xf32>
    %105 = arith.subf %101, %104 : vector<8x8xf32>
    %106 = math.exp %105 : vector<8x8xf32>
    %cst_39 = arith.constant dense<0.000000e+00> : vector<8xf32>
    %107 = vector.multi_reduction <add>, %106, %cst_39 [1] : vector<8x8xf32> to vector<8xf32>
    %108 = vector.shape_cast %107 : vector<8xf32> to vector<8x1xf32>
    %109 = tpu.reciprocal %108 {approx = true} : vector<8x1xf32> -> vector<8x1xf32>
    %110 = vector.broadcast %109 : vector<8x1xf32> to vector<8x8xf32>
    %111 = arith.mulf %106, %110 : vector<8x8xf32>
    %112 = arith.truncf %111 : vector<8x8xf32> to vector<8x8xbf16>
    %cst_40 = arith.constant dense<0.000000e+00> : vector<8x8xf32>
    %113 = tpu.matmul %112, %99, %cst_40 {dimension_numbers = #tpu.dot_dimension_numbers<[1], [0], [0], [1], [0, 0, 1, 1], [], []>} : vector<8x8xbf16>, vector<8x8xbf16>, vector<8x8xf32> -> vector<8x8xf32>
    %114 = tpu.concatenate %53, %73, %93, %113 in 1 : vector<8x8xf32>, vector<8x8xf32>, vector<8x8xf32>, vector<8x8xf32> -> vector<8x32xf32>
    %115 = arith.truncf %114 : vector<8x32xf32> to vector<8x32xbf16>
    %c0_41 = arith.constant 0 : index
    %c0_42 = arith.constant 0 : index
    %116 = vector.load %arg7[%c0_41, %c0_42] : memref<32x32xbf16, #tpu.memory_space<vmem>>, vector<32x32xbf16>
    %cst_43 = arith.constant dense<0.000000e+00> : vector<8x32xf32>
    %117 = tpu.matmul %115, %116, %cst_43 {dimension_numbers = #tpu.dot_dimension_numbers<[1], [0], [0], [1], [0, 0, 1, 1], [], []>} : vector<8x32xbf16>, vector<32x32xbf16>, vector<8x32xf32> -> vector<8x32xf32>
    %c0_44 = arith.constant 0 : index
    %c0_45 = arith.constant 0 : index
    %118 = vector.load %arg11[%c0_44, %c0_45] : memref<1x32xf32, #tpu.memory_space<vmem>>, vector<1x32xf32>
    %119 = vector.broadcast %118 : vector<1x32xf32> to vector<8x32xf32>
    %120 = arith.addf %117, %119 : vector<8x32xf32>
    %121 = arith.addf %1, %120 : vector<8x32xf32>
    %cst_46 = arith.constant dense<0.000000e+00> : vector<8xf32>
    %122 = vector.multi_reduction <add>, %121, %cst_46 [1] : vector<8x32xf32> to vector<8xf32>
    %123 = vector.shape_cast %122 : vector<8xf32> to vector<8x1xf32>
    %cst_47 = arith.constant 3.200000e+01 : f32
    %124 = vector.broadcast %cst_47 : f32 to vector<8x1xf32>
    %125 = arith.divf %123, %124 : vector<8x1xf32>
    %126 = arith.mulf %121, %121 : vector<8x32xf32>
    %cst_48 = arith.constant dense<0.000000e+00> : vector<8xf32>
    %127 = vector.multi_reduction <add>, %126, %cst_48 [1] : vector<8x32xf32> to vector<8xf32>
    %128 = vector.shape_cast %127 : vector<8xf32> to vector<8x1xf32>
    %cst_49 = arith.constant 3.200000e+01 : f32
    %129 = vector.broadcast %cst_49 : f32 to vector<8x1xf32>
    %130 = arith.divf %128, %129 : vector<8x1xf32>
    %131 = arith.mulf %125, %125 : vector<8x1xf32>
    %132 = arith.subf %130, %131 : vector<8x1xf32>
    %133 = vector.broadcast %125 : vector<8x1xf32> to vector<8x32xf32>
    %134 = arith.subf %121, %133 : vector<8x32xf32>
    %cst_50 = arith.constant 9.99999974E-6 : f32
    %135 = vector.broadcast %cst_50 : f32 to vector<8x1xf32>
    %136 = arith.addf %132, %135 : vector<8x1xf32>
    %137 = math.rsqrt %136 : vector<8x1xf32>
    %138 = vector.broadcast %137 : vector<8x1xf32> to vector<8x32xf32>
    %139 = arith.mulf %134, %138 : vector<8x32xf32>
    %c0_51 = arith.constant 0 : index
    %c0_52 = arith.constant 0 : index
    %140 = vector.load %arg12[%c0_51, %c0_52] : memref<1x32xf32, #tpu.memory_space<vmem>>, vector<1x32xf32>
    %141 = vector.broadcast %140 : vector<1x32xf32> to vector<8x32xf32>
    %142 = arith.mulf %139, %141 : vector<8x32xf32>
    %c0_53 = arith.constant 0 : index
    %c0_54 = arith.constant 0 : index
    %143 = vector.load %arg13[%c0_53, %c0_54] : memref<1x32xf32, #tpu.memory_space<vmem>>, vector<1x32xf32>
    %144 = vector.broadcast %143 : vector<1x32xf32> to vector<8x32xf32>
    %145 = arith.addf %142, %144 : vector<8x32xf32>
    %c0_55 = arith.constant 0 : index
    %c0_56 = arith.constant 0 : index
    %c0_57 = arith.constant 0 : index
    %146 = vector.load %arg14[%c0_55, %c0_56, %c0_57] : memref<1x8x32xf32, #tpu.memory_space<vmem>>, vector<1x8x32xf32>
    %147 = vector.shape_cast %146 : vector<1x8x32xf32> to vector<8x32xf32>
    %148 = vector.shape_cast %145 : vector<8x32xf32> to vector<1x8x32xf32>
    tpu.vector_store %arg14[%c0_55, %c0_56, %c0_57], %148 {strides = array<i32>} : memref<1x8x32xf32, #tpu.memory_space<vmem>>, vector<1x8x32xf32>,
    return
  }
  func.func @transform_0(%arg0: i32) -> (i32, i32, i32) {
    %c0_i32 = arith.constant 0 : i32
    %c0_i32_0 = arith.constant 0 : i32
    %c0_i32_1 = arith.constant 0 : i32
    return %arg0, %c0_i32, %c0_i32_0 : i32, i32, i32
  }
  func.func @transform_1(%arg0: i32) -> (i32, i32, i32) {
    %c0_i32 = arith.constant 0 : i32
    %c0_i32_0 = arith.constant 0 : i32
    %c0_i32_1 = arith.constant 0 : i32
    return %arg0, %c0_i32, %c0_i32_0 : i32, i32, i32
  }
  func.func @transform_2(%arg0: i32) -> (i32, i32, i32) {
    %c0_i32 = arith.constant 0 : i32
    %c0_i32_0 = arith.constant 0 : i32
    %c0_i32_1 = arith.constant 0 : i32
    return %arg0, %c0_i32, %c0_i32_0 : i32, i32, i32
  }
  func.func @transform_3(%arg0: i32) -> (i32, i32) {
    %c0_i32 = arith.constant 0 : i32
    %c0_i32_0 = arith.constant 0 : i32
    %c0_i32_1 = arith.constant 0 : i32
    return %c0_i32, %c0_i32_0 : i32, i32
  }
  func.func @transform_4(%arg0: i32) -> (i32, i32) {
    %c0_i32 = arith.constant 0 : i32
    %c0_i32_0 = arith.constant 0 : i32
    %c0_i32_1 = arith.constant 0 : i32
    return %c0_i32, %c0_i32_0 : i32, i32
  }
  func.func @transform_5(%arg0: i32) -> (i32, i32) {
    %c0_i32 = arith.constant 0 : i32
    %c0_i32_0 = arith.constant 0 : i32
    %c0_i32_1 = arith.constant 0 : i32
    return %c0_i32, %c0_i32_0 : i32, i32
  }
  func.func @transform_6(%arg0: i32) -> (i32, i32) {
    %c0_i32 = arith.constant 0 : i32
    %c0_i32_0 = arith.constant 0 : i32
    %c0_i32_1 = arith.constant 0 : i32
    return %c0_i32, %c0_i32_0 : i32, i32
  }
  func.func @transform_7(%arg0: i32) -> (i32, i32) {
    %c0_i32 = arith.constant 0 : i32
    %c0_i32_0 = arith.constant 0 : i32
    %c0_i32_1 = arith.constant 0 : i32
    return %c0_i32, %c0_i32_0 : i32, i32
  }
  func.func @transform_8(%arg0: i32) -> (i32, i32) {
    %c0_i32 = arith.constant 0 : i32
    %c0_i32_0 = arith.constant 0 : i32
    %c0_i32_1 = arith.constant 0 : i32
    return %c0_i32, %c0_i32_0 : i32, i32
  }
  func.func @transform_9(%arg0: i32) -> (i32, i32) {
    %c0_i32 = arith.constant 0 : i32
    %c0_i32_0 = arith.constant 0 : i32
    %c0_i32_1 = arith.constant 0 : i32
    return %c0_i32, %c0_i32_0 : i32, i32
  }
  func.func @transform_10(%arg0: i32) -> (i32, i32) {
    %c0_i32 = arith.constant 0 : i32
    %c0_i32_0 = arith.constant 0 : i32
    %c0_i32_1 = arith.constant 0 : i32
    return %c0_i32, %c0_i32_0 : i32, i32
  }
  func.func @transform_11(%arg0: i32) -> (i32, i32) {
    %c0_i32 = arith.constant 0 : i32
    %c0_i32_0 = arith.constant 0 : i32
    %c0_i32_1 = arith.constant 0 : i32
    return %c0_i32, %c0_i32_0 : i32, i32
  }
  func.func @transform_12(%arg0: i32) -> (i32, i32) {
    %c0_i32 = arith.constant 0 : i32
    %c0_i32_0 = arith.constant 0 : i32
    %c0_i32_1 = arith.constant 0 : i32
    return %c0_i32, %c0_i32_0 : i32, i32
  }
  func.func @transform_13(%arg0: i32) -> (i32, i32, i32) {
    %c0_i32 = arith.constant 0 : i32
    %c0_i32_0 = arith.constant 0 : i32
    %c0_i32_1 = arith.constant 0 : i32
    return %arg0, %c0_i32, %c0_i32_0 : i32, i32, i32
  }
}

module attributes {stable_mosaic.version = 11 : i64} {
  func.func @_mha_ln_kernel(%arg0: i32, %arg1: memref<1x8x32xf32, #tpu.memory_space<vmem>>, %arg2: memref<1x8x32xf32, #tpu.memory_space<vmem>>, %arg3: memref<1x1x8xf32, #tpu.memory_space<vmem>>, %arg4: memref<32x32xbf16, #tpu.memory_space<vmem>>, %arg5: memref<32x32xbf16, #tpu.memory_space<vmem>>, %arg6: memref<32x32xbf16, #tpu.memory_space<vmem>>, %arg7: memref<32x32xbf16, #tpu.memory_space<vmem>>, %arg8: memref<1x32xf32, #tpu.memory_space<vmem>>, %arg9: memref<1x32xf32, #tpu.memory_space<vmem>>, %arg10: memref<1x32xf32, #tpu.memory_space<vmem>>, %arg11: memref<1x32xf32, #tpu.memory_space<vmem>>, %arg12: memref<1x32xf32, #tpu.memory_space<vmem>>, %arg13: memref<1x32xf32, #tpu.memory_space<vmem>>, %arg14: memref<1x8x32xf32, #tpu.memory_space<vmem>>) attributes {dimension_semantics = [#tpu.dimension_semantics<parallel>], iteration_bounds = array<i64: 2>, scalar_prefetch = 0 : i64, scratch_operands = 0 : i64, tpu.core_type = #tpu.core_type<tc>, window_params = [{transform_indices = @transform_0, window_bounds = array<i64: 1, 8, 32>}, {transform_indices = @transform_1, window_bounds = array<i64: 1, 8, 32>}, {transform_indices = @transform_2, window_bounds = array<i64: 1, 1, 8>}, {pipeline_mode = #tpu.pipeline_mode<synchronous>, transform_indices = @transform_3, window_bounds = array<i64: 32, 32>}, {pipeline_mode = #tpu.pipeline_mode<synchronous>, transform_indices = @transform_4, window_bounds = array<i64: 32, 32>}, {pipeline_mode = #tpu.pipeline_mode<synchronous>, transform_indices = @transform_5, window_bounds = array<i64: 32, 32>}, {pipeline_mode = #tpu.pipeline_mode<synchronous>, transform_indices = @transform_6, window_bounds = array<i64: 32, 32>}, {pipeline_mode = #tpu.pipeline_mode<synchronous>, transform_indices = @transform_7, window_bounds = array<i64: 1, 32>}, {pipeline_mode = #tpu.pipeline_mode<synchronous>, transform_indices = @transform_8, window_bounds = array<i64: 1, 32>}, {pipeline_mode = #tpu.pipeline_mode<synchronous>, transform_indices = @transform_9, window_bounds = array<i64: 1, 32>}, {pipeline_mode = #tpu.pipeline_mode<synchronous>, transform_indices = @transform_10, window_bounds = array<i64: 1, 32>}, {pipeline_mode = #tpu.pipeline_mode<synchronous>, transform_indices = @transform_11, window_bounds = array<i64: 1, 32>}, {pipeline_mode = #tpu.pipeline_mode<synchronous>, transform_indices = @transform_12, window_bounds = array<i64: 1, 32>}, {transform_indices = @transform_13, window_bounds = array<i64: 1, 8, 32>}]} {
    %c0 = arith.constant 0 : index
    %c0_0 = arith.constant 0 : index
    %c0_1 = arith.constant 0 : index
    %0 = vector.load %arg1[%c0, %c0_0, %c0_1] : memref<1x8x32xf32, #tpu.memory_space<vmem>>, vector<1x8x32xf32>
    %1 = vector.shape_cast %0 : vector<1x8x32xf32> to vector<8x32xf32>
    %c0_2 = arith.constant 0 : index
    %c0_3 = arith.constant 0 : index
    %c0_4 = arith.constant 0 : index
    %2 = vector.load %arg2[%c0_2, %c0_3, %c0_4] : memref<1x8x32xf32, #tpu.memory_space<vmem>>, vector<1x8x32xf32>
    %3 = vector.shape_cast %2 : vector<1x8x32xf32> to vector<8x32xf32>
    %4 = arith.truncf %1 : vector<8x32xf32> to vector<8x32xbf16>
    %5 = arith.truncf %3 : vector<8x32xf32> to vector<8x32xbf16>
    %c0_5 = arith.constant 0 : index
    %c0_6 = arith.constant 0 : index
    %6 = vector.load %arg4[%c0_5, %c0_6] : memref<32x32xbf16, #tpu.memory_space<vmem>>, vector<32x32xbf16>
    %cst = arith.constant dense<0.000000e+00> : vector<8x32xf32>
    %7 = tpu.matmul %4, %6, %cst {dimension_numbers = #tpu.dot_dimension_numbers<[1], [0], [0], [1], [0, 0, 1, 1], [], []>} : vector<8x32xbf16>, vector<32x32xbf16>, vector<8x32xf32> -> vector<8x32xf32>
    %c0_7 = arith.constant 0 : index
    %c0_8 = arith.constant 0 : index
    %8 = vector.load %arg8[%c0_7, %c0_8] : memref<1x32xf32, #tpu.memory_space<vmem>>, vector<1x32xf32>
    %9 = vector.broadcast %8 : vector<1x32xf32> to vector<8x32xf32>
    %10 = arith.addf %7, %9 : vector<8x32xf32>
    %c0_9 = arith.constant 0 : index
    %c0_10 = arith.constant 0 : index
    %11 = vector.load %arg5[%c0_9, %c0_10] : memref<32x32xbf16, #tpu.memory_space<vmem>>, vector<32x32xbf16>
    %cst_11 = arith.constant dense<0.000000e+00> : vector<8x32xf32>
    %12 = tpu.matmul %5, %11, %cst_11 {dimension_numbers = #tpu.dot_dimension_numbers<[1], [0], [0], [1], [0, 0, 1, 1], [], []>} : vector<8x32xbf16>, vector<32x32xbf16>, vector<8x32xf32> -> vector<8x32xf32>
    %c0_12 = arith.constant 0 : index
    %c0_13 = arith.constant 0 : index
    %13 = vector.load %arg9[%c0_12, %c0_13] : memref<1x32xf32, #tpu.memory_space<vmem>>, vector<1x32xf32>
    %14 = vector.broadcast %13 : vector<1x32xf32> to vector<8x32xf32>
    %15 = arith.addf %12, %14 : vector<8x32xf32>
    %c0_14 = arith.constant 0 : index
    %c0_15 = arith.constant 0 : index
    %16 = vector.load %arg6[%c0_14, %c0_15] : memref<32x32xbf16, #tpu.memory_space<vmem>>, vector<32x32xbf16>
    %cst_16 = arith.constant dense<0.000000e+00> : vector<8x32xf32>
    %17 = tpu.matmul %5, %16, %cst_16 {dimension_numbers = #tpu.dot_dimension_numbers<[1], [0], [0], [1], [0, 0, 1, 1], [], []>} : vector<8x32xbf16>, vector<32x32xbf16>, vector<8x32xf32> -> vector<8x32xf32>
    %c0_17 = arith.constant 0 : index
    %c0_18 = arith.constant 0 : index
    %18 = vector.load %arg10[%c0_17, %c0_18] : memref<1x32xf32, #tpu.memory_space<vmem>>, vector<1x32xf32>
    %19 = vector.broadcast %18 : vector<1x32xf32> to vector<8x32xf32>
    %20 = arith.addf %17, %19 : vector<8x32xf32>
    %c0_19 = arith.constant 0 : index
    %c0_20 = arith.constant 0 : index
    %c0_21 = arith.constant 0 : index
    %21 = vector.load %arg3[%c0_19, %c0_20, %c0_21] : memref<1x1x8xf32, #tpu.memory_space<vmem>>, vector<1x1x8xf32>
    %22 = vector.shape_cast %21 : vector<1x1x8xf32> to vector<1x8xf32>
    %cst_22 = arith.constant 0.000000e+00 : f32
    %23 = vector.broadcast %cst_22 : f32 to vector<1x8xf32>
    %24 = arith.cmpf ogt, %22, %23 : vector<1x8xf32>
    %25 = vector.shape_cast %24 : vector<1x8xi1> to vector<1x8xi1>
    %26 = vector.broadcast %25 : vector<1x8xi1> to vector<8x8xi1>
    %cst_23 = arith.constant -1.000000e+09 : f32
    %cst_24 = arith.constant 0.000000e+00 : f32
    %27 = vector.broadcast %cst_23 : f32 to vector<8x8xf32>
    %28 = vector.broadcast %cst_24 : f32 to vector<8x8xf32>
    %29 = arith.select %26, %27, %28 : vector<8x8xi1>, vector<8x8xf32>
    %30 = vector.extract_strided_slice %10 {offsets = [0, 0], sizes = [8, 8], strides = [1, 1]} : vector<8x32xf32> to vector<8x8xf32>
    %31 = arith.truncf %30 : vector<8x8xf32> to vector<8x8xbf16>
    %32 = vector.extract_strided_slice %15 {offsets = [0, 0], sizes = [8, 8], strides = [1, 1]} : vector<8x32xf32> to vector<8x8xf32>
    %33 = arith.truncf %32 : vector<8x8xf32> to vector<8x8xbf16>
    %34 = vector.extract_strided_slice %20 {offsets = [0, 0], sizes = [8, 8], strides = [1, 1]} : vector<8x32xf32> to vector<8x8xf32>
    %35 = arith.truncf %34 : vector<8x8xf32> to vector<8x8xbf16>
    %cst_25 = arith.constant dense<0.000000e+00> : vector<8x8xf32>
    %36 = tpu.matmul %31, %33, %cst_25 {dimension_numbers = #tpu.dot_dimension_numbers<[1], [1], [0], [0], [0, 0, 1, 0], [], []>} : vector<8x8xbf16>, vector<8x8xbf16>, vector<8x8xf32> -> vector<8x8xf32>
    %37 = arith.addf %36, %29 : vector<8x8xf32>
    %cst_26 = arith.constant dense<0xFF800000> : vector<8xf32>
    %38 = vector.multi_reduction <maximumf>, %37, %cst_26 [1] : vector<8x8xf32> to vector<8xf32>
    %39 = vector.shape_cast %38 : vector<8xf32> to vector<8x1xf32>
    %40 = vector.broadcast %39 : vector<8x1xf32> to vector<8x8xf32>
    %41 = arith.subf %37, %40 : vector<8x8xf32>
    %42 = math.exp %41 : vector<8x8xf32>
    %cst_27 = arith.constant dense<0.000000e+00> : vector<8xf32>
    %43 = vector.multi_reduction <add>, %42, %cst_27 [1] : vector<8x8xf32> to vector<8xf32>
    %44 = vector.shape_cast %43 : vector<8xf32> to vector<8x1xf32>
    %45 = tpu.reciprocal %44 {approx = true} : vector<8x1xf32> -> vector<8x1xf32>
    %46 = vector.broadcast %45 : vector<8x1xf32> to vector<8x8xf32>
    %47 = arith.mulf %42, %46 : vector<8x8xf32>
    %48 = arith.truncf %47 : vector<8x8xf32> to vector<8x8xbf16>
    %cst_28 = arith.constant dense<0.000000e+00> : vector<8x8xf32>
    %49 = tpu.matmul %48, %35, %cst_28 {dimension_numbers = #tpu.dot_dimension_numbers<[1], [0], [0], [1], [0, 0, 1, 1], [], []>} : vector<8x8xbf16>, vector<8x8xbf16>, vector<8x8xf32> -> vector<8x8xf32>
    %50 = vector.extract_strided_slice %10 {offsets = [0, 8], sizes = [8, 8], strides = [1, 1]} : vector<8x32xf32> to vector<8x8xf32>
    %51 = arith.truncf %50 : vector<8x8xf32> to vector<8x8xbf16>
    %52 = vector.extract_strided_slice %15 {offsets = [0, 8], sizes = [8, 8], strides = [1, 1]} : vector<8x32xf32> to vector<8x8xf32>
    %53 = arith.truncf %52 : vector<8x8xf32> to vector<8x8xbf16>
    %54 = vector.extract_strided_slice %20 {offsets = [0, 8], sizes = [8, 8], strides = [1, 1]} : vector<8x32xf32> to vector<8x8xf32>
    %55 = arith.truncf %54 : vector<8x8xf32> to vector<8x8xbf16>
    %cst_29 = arith.constant dense<0.000000e+00> : vector<8x8xf32>
    %56 = tpu.matmul %51, %53, %cst_29 {dimension_numbers = #tpu.dot_dimension_numbers<[1], [1], [0], [0], [0, 0, 1, 0], [], []>} : vector<8x8xbf16>, vector<8x8xbf16>, vector<8x8xf32> -> vector<8x8xf32>
    %57 = arith.addf %56, %29 : vector<8x8xf32>
    %cst_30 = arith.constant dense<0xFF800000> : vector<8xf32>
    %58 = vector.multi_reduction <maximumf>, %57, %cst_30 [1] : vector<8x8xf32> to vector<8xf32>
    %59 = vector.shape_cast %58 : vector<8xf32> to vector<8x1xf32>
    %60 = vector.broadcast %59 : vector<8x1xf32> to vector<8x8xf32>
    %61 = arith.subf %57, %60 : vector<8x8xf32>
    %62 = math.exp %61 : vector<8x8xf32>
    %cst_31 = arith.constant dense<0.000000e+00> : vector<8xf32>
    %63 = vector.multi_reduction <add>, %62, %cst_31 [1] : vector<8x8xf32> to vector<8xf32>
    %64 = vector.shape_cast %63 : vector<8xf32> to vector<8x1xf32>
    %65 = tpu.reciprocal %64 {approx = true} : vector<8x1xf32> -> vector<8x1xf32>
    %66 = vector.broadcast %65 : vector<8x1xf32> to vector<8x8xf32>
    %67 = arith.mulf %62, %66 : vector<8x8xf32>
    %68 = arith.truncf %67 : vector<8x8xf32> to vector<8x8xbf16>
    %cst_32 = arith.constant dense<0.000000e+00> : vector<8x8xf32>
    %69 = tpu.matmul %68, %55, %cst_32 {dimension_numbers = #tpu.dot_dimension_numbers<[1], [0], [0], [1], [0, 0, 1, 1], [], []>} : vector<8x8xbf16>, vector<8x8xbf16>, vector<8x8xf32> -> vector<8x8xf32>
    %70 = vector.extract_strided_slice %10 {offsets = [0, 16], sizes = [8, 8], strides = [1, 1]} : vector<8x32xf32> to vector<8x8xf32>
    %71 = arith.truncf %70 : vector<8x8xf32> to vector<8x8xbf16>
    %72 = vector.extract_strided_slice %15 {offsets = [0, 16], sizes = [8, 8], strides = [1, 1]} : vector<8x32xf32> to vector<8x8xf32>
    %73 = arith.truncf %72 : vector<8x8xf32> to vector<8x8xbf16>
    %74 = vector.extract_strided_slice %20 {offsets = [0, 16], sizes = [8, 8], strides = [1, 1]} : vector<8x32xf32> to vector<8x8xf32>
    %75 = arith.truncf %74 : vector<8x8xf32> to vector<8x8xbf16>
    %cst_33 = arith.constant dense<0.000000e+00> : vector<8x8xf32>
    %76 = tpu.matmul %71, %73, %cst_33 {dimension_numbers = #tpu.dot_dimension_numbers<[1], [1], [0], [0], [0, 0, 1, 0], [], []>} : vector<8x8xbf16>, vector<8x8xbf16>, vector<8x8xf32> -> vector<8x8xf32>
    %77 = arith.addf %76, %29 : vector<8x8xf32>
    %cst_34 = arith.constant dense<0xFF800000> : vector<8xf32>
    %78 = vector.multi_reduction <maximumf>, %77, %cst_34 [1] : vector<8x8xf32> to vector<8xf32>
    %79 = vector.shape_cast %78 : vector<8xf32> to vector<8x1xf32>
    %80 = vector.broadcast %79 : vector<8x1xf32> to vector<8x8xf32>
    %81 = arith.subf %77, %80 : vector<8x8xf32>
    %82 = math.exp %81 : vector<8x8xf32>
    %cst_35 = arith.constant dense<0.000000e+00> : vector<8xf32>
    %83 = vector.multi_reduction <add>, %82, %cst_35 [1] : vector<8x8xf32> to vector<8xf32>
    %84 = vector.shape_cast %83 : vector<8xf32> to vector<8x1xf32>
    %85 = tpu.reciprocal %84 {approx = true} : vector<8x1xf32> -> vector<8x1xf32>
    %86 = vector.broadcast %85 : vector<8x1xf32> to vector<8x8xf32>
    %87 = arith.mulf %82, %86 : vector<8x8xf32>
    %88 = arith.truncf %87 : vector<8x8xf32> to vector<8x8xbf16>
    %cst_36 = arith.constant dense<0.000000e+00> : vector<8x8xf32>
    %89 = tpu.matmul %88, %75, %cst_36 {dimension_numbers = #tpu.dot_dimension_numbers<[1], [0], [0], [1], [0, 0, 1, 1], [], []>} : vector<8x8xbf16>, vector<8x8xbf16>, vector<8x8xf32> -> vector<8x8xf32>
    %90 = vector.extract_strided_slice %10 {offsets = [0, 24], sizes = [8, 8], strides = [1, 1]} : vector<8x32xf32> to vector<8x8xf32>
    %91 = arith.truncf %90 : vector<8x8xf32> to vector<8x8xbf16>
    %92 = vector.extract_strided_slice %15 {offsets = [0, 24], sizes = [8, 8], strides = [1, 1]} : vector<8x32xf32> to vector<8x8xf32>
    %93 = arith.truncf %92 : vector<8x8xf32> to vector<8x8xbf16>
    %94 = vector.extract_strided_slice %20 {offsets = [0, 24], sizes = [8, 8], strides = [1, 1]} : vector<8x32xf32> to vector<8x8xf32>
    %95 = arith.truncf %94 : vector<8x8xf32> to vector<8x8xbf16>
    %cst_37 = arith.constant dense<0.000000e+00> : vector<8x8xf32>
    %96 = tpu.matmul %91, %93, %cst_37 {dimension_numbers = #tpu.dot_dimension_numbers<[1], [1], [0], [0], [0, 0, 1, 0], [], []>} : vector<8x8xbf16>, vector<8x8xbf16>, vector<8x8xf32> -> vector<8x8xf32>
    %97 = arith.addf %96, %29 : vector<8x8xf32>
    %cst_38 = arith.constant dense<0xFF800000> : vector<8xf32>
    %98 = vector.multi_reduction <maximumf>, %97, %cst_38 [1] : vector<8x8xf32> to vector<8xf32>
    %99 = vector.shape_cast %98 : vector<8xf32> to vector<8x1xf32>
    %100 = vector.broadcast %99 : vector<8x1xf32> to vector<8x8xf32>
    %101 = arith.subf %97, %100 : vector<8x8xf32>
    %102 = math.exp %101 : vector<8x8xf32>
    %cst_39 = arith.constant dense<0.000000e+00> : vector<8xf32>
    %103 = vector.multi_reduction <add>, %102, %cst_39 [1] : vector<8x8xf32> to vector<8xf32>
    %104 = vector.shape_cast %103 : vector<8xf32> to vector<8x1xf32>
    %105 = tpu.reciprocal %104 {approx = true} : vector<8x1xf32> -> vector<8x1xf32>
    %106 = vector.broadcast %105 : vector<8x1xf32> to vector<8x8xf32>
    %107 = arith.mulf %102, %106 : vector<8x8xf32>
    %108 = arith.truncf %107 : vector<8x8xf32> to vector<8x8xbf16>
    %cst_40 = arith.constant dense<0.000000e+00> : vector<8x8xf32>
    %109 = tpu.matmul %108, %95, %cst_40 {dimension_numbers = #tpu.dot_dimension_numbers<[1], [0], [0], [1], [0, 0, 1, 1], [], []>} : vector<8x8xbf16>, vector<8x8xbf16>, vector<8x8xf32> -> vector<8x8xf32>
    %110 = tpu.concatenate %49, %69, %89, %109 in 1 : vector<8x8xf32>, vector<8x8xf32>, vector<8x8xf32>, vector<8x8xf32> -> vector<8x32xf32>
    %111 = arith.truncf %110 : vector<8x32xf32> to vector<8x32xbf16>
    %c0_41 = arith.constant 0 : index
    %c0_42 = arith.constant 0 : index
    %112 = vector.load %arg7[%c0_41, %c0_42] : memref<32x32xbf16, #tpu.memory_space<vmem>>, vector<32x32xbf16>
    %cst_43 = arith.constant dense<0.000000e+00> : vector<8x32xf32>
    %113 = tpu.matmul %111, %112, %cst_43 {dimension_numbers = #tpu.dot_dimension_numbers<[1], [0], [0], [1], [0, 0, 1, 1], [], []>} : vector<8x32xbf16>, vector<32x32xbf16>, vector<8x32xf32> -> vector<8x32xf32>
    %c0_44 = arith.constant 0 : index
    %c0_45 = arith.constant 0 : index
    %114 = vector.load %arg11[%c0_44, %c0_45] : memref<1x32xf32, #tpu.memory_space<vmem>>, vector<1x32xf32>
    %115 = vector.broadcast %114 : vector<1x32xf32> to vector<8x32xf32>
    %116 = arith.addf %113, %115 : vector<8x32xf32>
    %117 = arith.addf %1, %116 : vector<8x32xf32>
    %cst_46 = arith.constant dense<0.000000e+00> : vector<8xf32>
    %118 = vector.multi_reduction <add>, %117, %cst_46 [1] : vector<8x32xf32> to vector<8xf32>
    %119 = vector.shape_cast %118 : vector<8xf32> to vector<8x1xf32>
    %cst_47 = arith.constant 3.200000e+01 : f32
    %120 = vector.broadcast %cst_47 : f32 to vector<8x1xf32>
    %121 = arith.divf %119, %120 : vector<8x1xf32>
    %122 = arith.mulf %117, %117 : vector<8x32xf32>
    %cst_48 = arith.constant dense<0.000000e+00> : vector<8xf32>
    %123 = vector.multi_reduction <add>, %122, %cst_48 [1] : vector<8x32xf32> to vector<8xf32>
    %124 = vector.shape_cast %123 : vector<8xf32> to vector<8x1xf32>
    %cst_49 = arith.constant 3.200000e+01 : f32
    %125 = vector.broadcast %cst_49 : f32 to vector<8x1xf32>
    %126 = arith.divf %124, %125 : vector<8x1xf32>
    %127 = arith.mulf %121, %121 : vector<8x1xf32>
    %128 = arith.subf %126, %127 : vector<8x1xf32>
    %129 = vector.broadcast %121 : vector<8x1xf32> to vector<8x32xf32>
    %130 = arith.subf %117, %129 : vector<8x32xf32>
    %cst_50 = arith.constant 9.99999974E-6 : f32
    %131 = vector.broadcast %cst_50 : f32 to vector<8x1xf32>
    %132 = arith.addf %128, %131 : vector<8x1xf32>
    %133 = math.rsqrt %132 : vector<8x1xf32>
    %134 = vector.broadcast %133 : vector<8x1xf32> to vector<8x32xf32>
    %135 = arith.mulf %130, %134 : vector<8x32xf32>
    %c0_51 = arith.constant 0 : index
    %c0_52 = arith.constant 0 : index
    %136 = vector.load %arg12[%c0_51, %c0_52] : memref<1x32xf32, #tpu.memory_space<vmem>>, vector<1x32xf32>
    %137 = vector.broadcast %136 : vector<1x32xf32> to vector<8x32xf32>
    %138 = arith.mulf %135, %137 : vector<8x32xf32>
    %c0_53 = arith.constant 0 : index
    %c0_54 = arith.constant 0 : index
    %139 = vector.load %arg13[%c0_53, %c0_54] : memref<1x32xf32, #tpu.memory_space<vmem>>, vector<1x32xf32>
    %140 = vector.broadcast %139 : vector<1x32xf32> to vector<8x32xf32>
    %141 = arith.addf %138, %140 : vector<8x32xf32>
    %c0_55 = arith.constant 0 : index
    %c0_56 = arith.constant 0 : index
    %c0_57 = arith.constant 0 : index
    %142 = vector.load %arg14[%c0_55, %c0_56, %c0_57] : memref<1x8x32xf32, #tpu.memory_space<vmem>>, vector<1x8x32xf32>
    %143 = vector.shape_cast %142 : vector<1x8x32xf32> to vector<8x32xf32>
    %144 = vector.shape_cast %141 : vector<8x32xf32> to vector<1x8x32xf32>
    tpu.vector_store %arg14[%c0_55, %c0_56, %c0_57], %144 {strides = array<i32>} : memref<1x8x32xf32, #tpu.memory_space<vmem>>, vector<1x8x32xf32>,
    return
  }
  func.func @transform_0(%arg0: i32) -> (i32, i32, i32) {
    %c0_i32 = arith.constant 0 : i32
    %c0_i32_0 = arith.constant 0 : i32
    %c0_i32_1 = arith.constant 0 : i32
    return %arg0, %c0_i32, %c0_i32_0 : i32, i32, i32
  }
  func.func @transform_1(%arg0: i32) -> (i32, i32, i32) {
    %c0_i32 = arith.constant 0 : i32
    %c0_i32_0 = arith.constant 0 : i32
    %c0_i32_1 = arith.constant 0 : i32
    return %arg0, %c0_i32, %c0_i32_0 : i32, i32, i32
  }
  func.func @transform_2(%arg0: i32) -> (i32, i32, i32) {
    %c0_i32 = arith.constant 0 : i32
    %c0_i32_0 = arith.constant 0 : i32
    %c0_i32_1 = arith.constant 0 : i32
    return %arg0, %c0_i32, %c0_i32_0 : i32, i32, i32
  }
  func.func @transform_3(%arg0: i32) -> (i32, i32) {
    %c0_i32 = arith.constant 0 : i32
    %c0_i32_0 = arith.constant 0 : i32
    %c0_i32_1 = arith.constant 0 : i32
    return %c0_i32, %c0_i32_0 : i32, i32
  }
  func.func @transform_4(%arg0: i32) -> (i32, i32) {
    %c0_i32 = arith.constant 0 : i32
    %c0_i32_0 = arith.constant 0 : i32
    %c0_i32_1 = arith.constant 0 : i32
    return %c0_i32, %c0_i32_0 : i32, i32
  }
  func.func @transform_5(%arg0: i32) -> (i32, i32) {
    %c0_i32 = arith.constant 0 : i32
    %c0_i32_0 = arith.constant 0 : i32
    %c0_i32_1 = arith.constant 0 : i32
    return %c0_i32, %c0_i32_0 : i32, i32
  }
  func.func @transform_6(%arg0: i32) -> (i32, i32) {
    %c0_i32 = arith.constant 0 : i32
    %c0_i32_0 = arith.constant 0 : i32
    %c0_i32_1 = arith.constant 0 : i32
    return %c0_i32, %c0_i32_0 : i32, i32
  }
  func.func @transform_7(%arg0: i32) -> (i32, i32) {
    %c0_i32 = arith.constant 0 : i32
    %c0_i32_0 = arith.constant 0 : i32
    %c0_i32_1 = arith.constant 0 : i32
    return %c0_i32, %c0_i32_0 : i32, i32
  }
  func.func @transform_8(%arg0: i32) -> (i32, i32) {
    %c0_i32 = arith.constant 0 : i32
    %c0_i32_0 = arith.constant 0 : i32
    %c0_i32_1 = arith.constant 0 : i32
    return %c0_i32, %c0_i32_0 : i32, i32
  }
  func.func @transform_9(%arg0: i32) -> (i32, i32) {
    %c0_i32 = arith.constant 0 : i32
    %c0_i32_0 = arith.constant 0 : i32
    %c0_i32_1 = arith.constant 0 : i32
    return %c0_i32, %c0_i32_0 : i32, i32
  }
  func.func @transform_10(%arg0: i32) -> (i32, i32) {
    %c0_i32 = arith.constant 0 : i32
    %c0_i32_0 = arith.constant 0 : i32
    %c0_i32_1 = arith.constant 0 : i32
    return %c0_i32, %c0_i32_0 : i32, i32
  }
  func.func @transform_11(%arg0: i32) -> (i32, i32) {
    %c0_i32 = arith.constant 0 : i32
    %c0_i32_0 = arith.constant 0 : i32
    %c0_i32_1 = arith.constant 0 : i32
    return %c0_i32, %c0_i32_0 : i32, i32
  }
  func.func @transform_12(%arg0: i32) -> (i32, i32) {
    %c0_i32 = arith.constant 0 : i32
    %c0_i32_0 = arith.constant 0 : i32
    %c0_i32_1 = arith.constant 0 : i32
    return %c0_i32, %c0_i32_0 : i32, i32
  }
  func.func @transform_13(%arg0: i32) -> (i32, i32, i32) {
    %c0_i32 = arith.constant 0 : i32
    %c0_i32_0 = arith.constant 0 : i32
    %c0_i32_1 = arith.constant 0 : i32
    return %arg0, %c0_i32, %c0_i32_0 : i32, i32, i32
  }
}

module attributes {stable_mosaic.version = 11 : i64} {
  func.func @_mha_ln_kernel(%arg0: i32, %arg1: memref<1x8x32xf32, #tpu.memory_space<vmem>>, %arg2: memref<1x8x32xf32, #tpu.memory_space<vmem>>, %arg3: memref<1x1x8xf32, #tpu.memory_space<vmem>>, %arg4: memref<32x32xbf16, #tpu.memory_space<vmem>>, %arg5: memref<32x32xbf16, #tpu.memory_space<vmem>>, %arg6: memref<32x32xbf16, #tpu.memory_space<vmem>>, %arg7: memref<32x32xbf16, #tpu.memory_space<vmem>>, %arg8: memref<1x32xf32, #tpu.memory_space<vmem>>, %arg9: memref<1x32xf32, #tpu.memory_space<vmem>>, %arg10: memref<1x32xf32, #tpu.memory_space<vmem>>, %arg11: memref<1x32xf32, #tpu.memory_space<vmem>>, %arg12: memref<1x32xf32, #tpu.memory_space<vmem>>, %arg13: memref<1x32xf32, #tpu.memory_space<vmem>>, %arg14: memref<1x8x32xf32, #tpu.memory_space<vmem>>) attributes {dimension_semantics = [#tpu.dimension_semantics<parallel>], iteration_bounds = array<i64: 2>, scalar_prefetch = 0 : i64, scratch_operands = 0 : i64, tpu.core_type = #tpu.core_type<tc>, window_params = [{transform_indices = @transform_0, window_bounds = array<i64: 1, 8, 32>}, {transform_indices = @transform_1, window_bounds = array<i64: 1, 8, 32>}, {transform_indices = @transform_2, window_bounds = array<i64: 1, 1, 8>}, {pipeline_mode = #tpu.pipeline_mode<synchronous>, transform_indices = @transform_3, window_bounds = array<i64: 32, 32>}, {pipeline_mode = #tpu.pipeline_mode<synchronous>, transform_indices = @transform_4, window_bounds = array<i64: 32, 32>}, {pipeline_mode = #tpu.pipeline_mode<synchronous>, transform_indices = @transform_5, window_bounds = array<i64: 32, 32>}, {pipeline_mode = #tpu.pipeline_mode<synchronous>, transform_indices = @transform_6, window_bounds = array<i64: 32, 32>}, {pipeline_mode = #tpu.pipeline_mode<synchronous>, transform_indices = @transform_7, window_bounds = array<i64: 1, 32>}, {pipeline_mode = #tpu.pipeline_mode<synchronous>, transform_indices = @transform_8, window_bounds = array<i64: 1, 32>}, {pipeline_mode = #tpu.pipeline_mode<synchronous>, transform_indices = @transform_9, window_bounds = array<i64: 1, 32>}, {pipeline_mode = #tpu.pipeline_mode<synchronous>, transform_indices = @transform_10, window_bounds = array<i64: 1, 32>}, {pipeline_mode = #tpu.pipeline_mode<synchronous>, transform_indices = @transform_11, window_bounds = array<i64: 1, 32>}, {pipeline_mode = #tpu.pipeline_mode<synchronous>, transform_indices = @transform_12, window_bounds = array<i64: 1, 32>}, {transform_indices = @transform_13, window_bounds = array<i64: 1, 8, 32>}]} {
    %c0 = arith.constant 0 : index
    %c0_0 = arith.constant 0 : index
    %c0_1 = arith.constant 0 : index
    %0 = vector.load %arg1[%c0, %c0_0, %c0_1] : memref<1x8x32xf32, #tpu.memory_space<vmem>>, vector<1x8x32xf32>
    %1 = vector.shape_cast %0 : vector<1x8x32xf32> to vector<8x32xf32>
    %c0_2 = arith.constant 0 : index
    %c0_3 = arith.constant 0 : index
    %c0_4 = arith.constant 0 : index
    %2 = vector.load %arg2[%c0_2, %c0_3, %c0_4] : memref<1x8x32xf32, #tpu.memory_space<vmem>>, vector<1x8x32xf32>
    %3 = vector.shape_cast %2 : vector<1x8x32xf32> to vector<8x32xf32>
    %4 = arith.truncf %1 : vector<8x32xf32> to vector<8x32xbf16>
    %5 = arith.truncf %3 : vector<8x32xf32> to vector<8x32xbf16>
    %c0_5 = arith.constant 0 : index
    %c0_6 = arith.constant 0 : index
    %6 = vector.load %arg4[%c0_5, %c0_6] : memref<32x32xbf16, #tpu.memory_space<vmem>>, vector<32x32xbf16>
    %cst = arith.constant dense<0.000000e+00> : vector<8x32xf32>
    %7 = tpu.matmul %4, %6, %cst {dimension_numbers = #tpu.dot_dimension_numbers<[1], [0], [0], [1], [0, 0, 1, 1], [], []>} : vector<8x32xbf16>, vector<32x32xbf16>, vector<8x32xf32> -> vector<8x32xf32>
    %c0_7 = arith.constant 0 : index
    %c0_8 = arith.constant 0 : index
    %8 = vector.load %arg8[%c0_7, %c0_8] : memref<1x32xf32, #tpu.memory_space<vmem>>, vector<1x32xf32>
    %9 = vector.broadcast %8 : vector<1x32xf32> to vector<8x32xf32>
    %10 = arith.addf %7, %9 : vector<8x32xf32>
    %c0_9 = arith.constant 0 : index
    %c0_10 = arith.constant 0 : index
    %11 = vector.load %arg5[%c0_9, %c0_10] : memref<32x32xbf16, #tpu.memory_space<vmem>>, vector<32x32xbf16>
    %cst_11 = arith.constant dense<0.000000e+00> : vector<8x32xf32>
    %12 = tpu.matmul %5, %11, %cst_11 {dimension_numbers = #tpu.dot_dimension_numbers<[1], [0], [0], [1], [0, 0, 1, 1], [], []>} : vector<8x32xbf16>, vector<32x32xbf16>, vector<8x32xf32> -> vector<8x32xf32>
    %c0_12 = arith.constant 0 : index
    %c0_13 = arith.constant 0 : index
    %13 = vector.load %arg9[%c0_12, %c0_13] : memref<1x32xf32, #tpu.memory_space<vmem>>, vector<1x32xf32>
    %14 = vector.broadcast %13 : vector<1x32xf32> to vector<8x32xf32>
    %15 = arith.addf %12, %14 : vector<8x32xf32>
    %c0_14 = arith.constant 0 : index
    %c0_15 = arith.constant 0 : index
    %16 = vector.load %arg6[%c0_14, %c0_15] : memref<32x32xbf16, #tpu.memory_space<vmem>>, vector<32x32xbf16>
    %cst_16 = arith.constant dense<0.000000e+00> : vector<8x32xf32>
    %17 = tpu.matmul %5, %16, %cst_16 {dimension_numbers = #tpu.dot_dimension_numbers<[1], [0], [0], [1], [0, 0, 1, 1], [], []>} : vector<8x32xbf16>, vector<32x32xbf16>, vector<8x32xf32> -> vector<8x32xf32>
    %c0_17 = arith.constant 0 : index
    %c0_18 = arith.constant 0 : index
    %18 = vector.load %arg10[%c0_17, %c0_18] : memref<1x32xf32, #tpu.memory_space<vmem>>, vector<1x32xf32>
    %19 = vector.broadcast %18 : vector<1x32xf32> to vector<8x32xf32>
    %20 = arith.addf %17, %19 : vector<8x32xf32>
    %c0_19 = arith.constant 0 : index
    %c0_20 = arith.constant 0 : index
    %c0_21 = arith.constant 0 : index
    %21 = vector.load %arg3[%c0_19, %c0_20, %c0_21] : memref<1x1x8xf32, #tpu.memory_space<vmem>>, vector<1x1x8xf32>
    %22 = vector.shape_cast %21 : vector<1x1x8xf32> to vector<1x8xf32>
    %cst_22 = arith.constant 0.000000e+00 : f32
    %23 = vector.broadcast %cst_22 : f32 to vector<1x8xf32>
    %24 = arith.cmpf ogt, %22, %23 : vector<1x8xf32>
    %25 = vector.shape_cast %24 : vector<1x8xi1> to vector<1x8xi1>
    %26 = vector.broadcast %25 : vector<1x8xi1> to vector<8x8xi1>
    %27 = tpu.iota {dimensions = array<i32: 0>} : vector<8x8xi32>
    %28 = tpu.iota {dimensions = array<i32: 1>} : vector<8x8xi32>
    %29 = arith.cmpi sgt, %28, %27 : vector<8x8xi32>
    %30 = arith.ori %26, %29 : vector<8x8xi1>
    %cst_23 = arith.constant -1.000000e+09 : f32
    %cst_24 = arith.constant 0.000000e+00 : f32
    %31 = vector.broadcast %cst_23 : f32 to vector<8x8xf32>
    %32 = vector.broadcast %cst_24 : f32 to vector<8x8xf32>
    %33 = arith.select %30, %31, %32 : vector<8x8xi1>, vector<8x8xf32>
    %34 = vector.extract_strided_slice %10 {offsets = [0, 0], sizes = [8, 8], strides = [1, 1]} : vector<8x32xf32> to vector<8x8xf32>
    %35 = arith.truncf %34 : vector<8x8xf32> to vector<8x8xbf16>
    %36 = vector.extract_strided_slice %15 {offsets = [0, 0], sizes = [8, 8], strides = [1, 1]} : vector<8x32xf32> to vector<8x8xf32>
    %37 = arith.truncf %36 : vector<8x8xf32> to vector<8x8xbf16>
    %38 = vector.extract_strided_slice %20 {offsets = [0, 0], sizes = [8, 8], strides = [1, 1]} : vector<8x32xf32> to vector<8x8xf32>
    %39 = arith.truncf %38 : vector<8x8xf32> to vector<8x8xbf16>
    %cst_25 = arith.constant dense<0.000000e+00> : vector<8x8xf32>
    %40 = tpu.matmul %35, %37, %cst_25 {dimension_numbers = #tpu.dot_dimension_numbers<[1], [1], [0], [0], [0, 0, 1, 0], [], []>} : vector<8x8xbf16>, vector<8x8xbf16>, vector<8x8xf32> -> vector<8x8xf32>
    %41 = arith.addf %40, %33 : vector<8x8xf32>
    %cst_26 = arith.constant dense<0xFF800000> : vector<8xf32>
    %42 = vector.multi_reduction <maximumf>, %41, %cst_26 [1] : vector<8x8xf32> to vector<8xf32>
    %43 = vector.shape_cast %42 : vector<8xf32> to vector<8x1xf32>
    %44 = vector.broadcast %43 : vector<8x1xf32> to vector<8x8xf32>
    %45 = arith.subf %41, %44 : vector<8x8xf32>
    %46 = math.exp %45 : vector<8x8xf32>
    %cst_27 = arith.constant dense<0.000000e+00> : vector<8xf32>
    %47 = vector.multi_reduction <add>, %46, %cst_27 [1] : vector<8x8xf32> to vector<8xf32>
    %48 = vector.shape_cast %47 : vector<8xf32> to vector<8x1xf32>
    %49 = tpu.reciprocal %48 {approx = true} : vector<8x1xf32> -> vector<8x1xf32>
    %50 = vector.broadcast %49 : vector<8x1xf32> to vector<8x8xf32>
    %51 = arith.mulf %46, %50 : vector<8x8xf32>
    %52 = arith.truncf %51 : vector<8x8xf32> to vector<8x8xbf16>
    %cst_28 = arith.constant dense<0.000000e+00> : vector<8x8xf32>
    %53 = tpu.matmul %52, %39, %cst_28 {dimension_numbers = #tpu.dot_dimension_numbers<[1], [0], [0], [1], [0, 0, 1, 1], [], []>} : vector<8x8xbf16>, vector<8x8xbf16>, vector<8x8xf32> -> vector<8x8xf32>
    %54 = vector.extract_strided_slice %10 {offsets = [0, 8], sizes = [8, 8], strides = [1, 1]} : vector<8x32xf32> to vector<8x8xf32>
    %55 = arith.truncf %54 : vector<8x8xf32> to vector<8x8xbf16>
    %56 = vector.extract_strided_slice %15 {offsets = [0, 8], sizes = [8, 8], strides = [1, 1]} : vector<8x32xf32> to vector<8x8xf32>
    %57 = arith.truncf %56 : vector<8x8xf32> to vector<8x8xbf16>
    %58 = vector.extract_strided_slice %20 {offsets = [0, 8], sizes = [8, 8], strides = [1, 1]} : vector<8x32xf32> to vector<8x8xf32>
    %59 = arith.truncf %58 : vector<8x8xf32> to vector<8x8xbf16>
    %cst_29 = arith.constant dense<0.000000e+00> : vector<8x8xf32>
    %60 = tpu.matmul %55, %57, %cst_29 {dimension_numbers = #tpu.dot_dimension_numbers<[1], [1], [0], [0], [0, 0, 1, 0], [], []>} : vector<8x8xbf16>, vector<8x8xbf16>, vector<8x8xf32> -> vector<8x8xf32>
    %61 = arith.addf %60, %33 : vector<8x8xf32>
    %cst_30 = arith.constant dense<0xFF800000> : vector<8xf32>
    %62 = vector.multi_reduction <maximumf>, %61, %cst_30 [1] : vector<8x8xf32> to vector<8xf32>
    %63 = vector.shape_cast %62 : vector<8xf32> to vector<8x1xf32>
    %64 = vector.broadcast %63 : vector<8x1xf32> to vector<8x8xf32>
    %65 = arith.subf %61, %64 : vector<8x8xf32>
    %66 = math.exp %65 : vector<8x8xf32>
    %cst_31 = arith.constant dense<0.000000e+00> : vector<8xf32>
    %67 = vector.multi_reduction <add>, %66, %cst_31 [1] : vector<8x8xf32> to vector<8xf32>
    %68 = vector.shape_cast %67 : vector<8xf32> to vector<8x1xf32>
    %69 = tpu.reciprocal %68 {approx = true} : vector<8x1xf32> -> vector<8x1xf32>
    %70 = vector.broadcast %69 : vector<8x1xf32> to vector<8x8xf32>
    %71 = arith.mulf %66, %70 : vector<8x8xf32>
    %72 = arith.truncf %71 : vector<8x8xf32> to vector<8x8xbf16>
    %cst_32 = arith.constant dense<0.000000e+00> : vector<8x8xf32>
    %73 = tpu.matmul %72, %59, %cst_32 {dimension_numbers = #tpu.dot_dimension_numbers<[1], [0], [0], [1], [0, 0, 1, 1], [], []>} : vector<8x8xbf16>, vector<8x8xbf16>, vector<8x8xf32> -> vector<8x8xf32>
    %74 = vector.extract_strided_slice %10 {offsets = [0, 16], sizes = [8, 8], strides = [1, 1]} : vector<8x32xf32> to vector<8x8xf32>
    %75 = arith.truncf %74 : vector<8x8xf32> to vector<8x8xbf16>
    %76 = vector.extract_strided_slice %15 {offsets = [0, 16], sizes = [8, 8], strides = [1, 1]} : vector<8x32xf32> to vector<8x8xf32>
    %77 = arith.truncf %76 : vector<8x8xf32> to vector<8x8xbf16>
    %78 = vector.extract_strided_slice %20 {offsets = [0, 16], sizes = [8, 8], strides = [1, 1]} : vector<8x32xf32> to vector<8x8xf32>
    %79 = arith.truncf %78 : vector<8x8xf32> to vector<8x8xbf16>
    %cst_33 = arith.constant dense<0.000000e+00> : vector<8x8xf32>
    %80 = tpu.matmul %75, %77, %cst_33 {dimension_numbers = #tpu.dot_dimension_numbers<[1], [1], [0], [0], [0, 0, 1, 0], [], []>} : vector<8x8xbf16>, vector<8x8xbf16>, vector<8x8xf32> -> vector<8x8xf32>
    %81 = arith.addf %80, %33 : vector<8x8xf32>
    %cst_34 = arith.constant dense<0xFF800000> : vector<8xf32>
    %82 = vector.multi_reduction <maximumf>, %81, %cst_34 [1] : vector<8x8xf32> to vector<8xf32>
    %83 = vector.shape_cast %82 : vector<8xf32> to vector<8x1xf32>
    %84 = vector.broadcast %83 : vector<8x1xf32> to vector<8x8xf32>
    %85 = arith.subf %81, %84 : vector<8x8xf32>
    %86 = math.exp %85 : vector<8x8xf32>
    %cst_35 = arith.constant dense<0.000000e+00> : vector<8xf32>
    %87 = vector.multi_reduction <add>, %86, %cst_35 [1] : vector<8x8xf32> to vector<8xf32>
    %88 = vector.shape_cast %87 : vector<8xf32> to vector<8x1xf32>
    %89 = tpu.reciprocal %88 {approx = true} : vector<8x1xf32> -> vector<8x1xf32>
    %90 = vector.broadcast %89 : vector<8x1xf32> to vector<8x8xf32>
    %91 = arith.mulf %86, %90 : vector<8x8xf32>
    %92 = arith.truncf %91 : vector<8x8xf32> to vector<8x8xbf16>
    %cst_36 = arith.constant dense<0.000000e+00> : vector<8x8xf32>
    %93 = tpu.matmul %92, %79, %cst_36 {dimension_numbers = #tpu.dot_dimension_numbers<[1], [0], [0], [1], [0, 0, 1, 1], [], []>} : vector<8x8xbf16>, vector<8x8xbf16>, vector<8x8xf32> -> vector<8x8xf32>
    %94 = vector.extract_strided_slice %10 {offsets = [0, 24], sizes = [8, 8], strides = [1, 1]} : vector<8x32xf32> to vector<8x8xf32>
    %95 = arith.truncf %94 : vector<8x8xf32> to vector<8x8xbf16>
    %96 = vector.extract_strided_slice %15 {offsets = [0, 24], sizes = [8, 8], strides = [1, 1]} : vector<8x32xf32> to vector<8x8xf32>
    %97 = arith.truncf %96 : vector<8x8xf32> to vector<8x8xbf16>
    %98 = vector.extract_strided_slice %20 {offsets = [0, 24], sizes = [8, 8], strides = [1, 1]} : vector<8x32xf32> to vector<8x8xf32>
    %99 = arith.truncf %98 : vector<8x8xf32> to vector<8x8xbf16>
    %cst_37 = arith.constant dense<0.000000e+00> : vector<8x8xf32>
    %100 = tpu.matmul %95, %97, %cst_37 {dimension_numbers = #tpu.dot_dimension_numbers<[1], [1], [0], [0], [0, 0, 1, 0], [], []>} : vector<8x8xbf16>, vector<8x8xbf16>, vector<8x8xf32> -> vector<8x8xf32>
    %101 = arith.addf %100, %33 : vector<8x8xf32>
    %cst_38 = arith.constant dense<0xFF800000> : vector<8xf32>
    %102 = vector.multi_reduction <maximumf>, %101, %cst_38 [1] : vector<8x8xf32> to vector<8xf32>
    %103 = vector.shape_cast %102 : vector<8xf32> to vector<8x1xf32>
    %104 = vector.broadcast %103 : vector<8x1xf32> to vector<8x8xf32>
    %105 = arith.subf %101, %104 : vector<8x8xf32>
    %106 = math.exp %105 : vector<8x8xf32>
    %cst_39 = arith.constant dense<0.000000e+00> : vector<8xf32>
    %107 = vector.multi_reduction <add>, %106, %cst_39 [1] : vector<8x8xf32> to vector<8xf32>
    %108 = vector.shape_cast %107 : vector<8xf32> to vector<8x1xf32>
    %109 = tpu.reciprocal %108 {approx = true} : vector<8x1xf32> -> vector<8x1xf32>
    %110 = vector.broadcast %109 : vector<8x1xf32> to vector<8x8xf32>
    %111 = arith.mulf %106, %110 : vector<8x8xf32>
    %112 = arith.truncf %111 : vector<8x8xf32> to vector<8x8xbf16>
    %cst_40 = arith.constant dense<0.000000e+00> : vector<8x8xf32>
    %113 = tpu.matmul %112, %99, %cst_40 {dimension_numbers = #tpu.dot_dimension_numbers<[1], [0], [0], [1], [0, 0, 1, 1], [], []>} : vector<8x8xbf16>, vector<8x8xbf16>, vector<8x8xf32> -> vector<8x8xf32>
    %114 = tpu.concatenate %53, %73, %93, %113 in 1 : vector<8x8xf32>, vector<8x8xf32>, vector<8x8xf32>, vector<8x8xf32> -> vector<8x32xf32>
    %115 = arith.truncf %114 : vector<8x32xf32> to vector<8x32xbf16>
    %c0_41 = arith.constant 0 : index
    %c0_42 = arith.constant 0 : index
    %116 = vector.load %arg7[%c0_41, %c0_42] : memref<32x32xbf16, #tpu.memory_space<vmem>>, vector<32x32xbf16>
    %cst_43 = arith.constant dense<0.000000e+00> : vector<8x32xf32>
    %117 = tpu.matmul %115, %116, %cst_43 {dimension_numbers = #tpu.dot_dimension_numbers<[1], [0], [0], [1], [0, 0, 1, 1], [], []>} : vector<8x32xbf16>, vector<32x32xbf16>, vector<8x32xf32> -> vector<8x32xf32>
    %c0_44 = arith.constant 0 : index
    %c0_45 = arith.constant 0 : index
    %118 = vector.load %arg11[%c0_44, %c0_45] : memref<1x32xf32, #tpu.memory_space<vmem>>, vector<1x32xf32>
    %119 = vector.broadcast %118 : vector<1x32xf32> to vector<8x32xf32>
    %120 = arith.addf %117, %119 : vector<8x32xf32>
    %121 = arith.addf %1, %120 : vector<8x32xf32>
    %cst_46 = arith.constant dense<0.000000e+00> : vector<8xf32>
    %122 = vector.multi_reduction <add>, %121, %cst_46 [1] : vector<8x32xf32> to vector<8xf32>
    %123 = vector.shape_cast %122 : vector<8xf32> to vector<8x1xf32>
    %cst_47 = arith.constant 3.200000e+01 : f32
    %124 = vector.broadcast %cst_47 : f32 to vector<8x1xf32>
    %125 = arith.divf %123, %124 : vector<8x1xf32>
    %126 = arith.mulf %121, %121 : vector<8x32xf32>
    %cst_48 = arith.constant dense<0.000000e+00> : vector<8xf32>
    %127 = vector.multi_reduction <add>, %126, %cst_48 [1] : vector<8x32xf32> to vector<8xf32>
    %128 = vector.shape_cast %127 : vector<8xf32> to vector<8x1xf32>
    %cst_49 = arith.constant 3.200000e+01 : f32
    %129 = vector.broadcast %cst_49 : f32 to vector<8x1xf32>
    %130 = arith.divf %128, %129 : vector<8x1xf32>
    %131 = arith.mulf %125, %125 : vector<8x1xf32>
    %132 = arith.subf %130, %131 : vector<8x1xf32>
    %133 = vector.broadcast %125 : vector<8x1xf32> to vector<8x32xf32>
    %134 = arith.subf %121, %133 : vector<8x32xf32>
    %cst_50 = arith.constant 9.99999974E-6 : f32
    %135 = vector.broadcast %cst_50 : f32 to vector<8x1xf32>
    %136 = arith.addf %132, %135 : vector<8x1xf32>
    %137 = math.rsqrt %136 : vector<8x1xf32>
    %138 = vector.broadcast %137 : vector<8x1xf32> to vector<8x32xf32>
    %139 = arith.mulf %134, %138 : vector<8x32xf32>
    %c0_51 = arith.constant 0 : index
    %c0_52 = arith.constant 0 : index
    %140 = vector.load %arg12[%c0_51, %c0_52] : memref<1x32xf32, #tpu.memory_space<vmem>>, vector<1x32xf32>
    %141 = vector.broadcast %140 : vector<1x32xf32> to vector<8x32xf32>
    %142 = arith.mulf %139, %141 : vector<8x32xf32>
    %c0_53 = arith.constant 0 : index
    %c0_54 = arith.constant 0 : index
    %143 = vector.load %arg13[%c0_53, %c0_54] : memref<1x32xf32, #tpu.memory_space<vmem>>, vector<1x32xf32>
    %144 = vector.broadcast %143 : vector<1x32xf32> to vector<8x32xf32>
    %145 = arith.addf %142, %144 : vector<8x32xf32>
    %c0_55 = arith.constant 0 : index
    %c0_56 = arith.constant 0 : index
    %c0_57 = arith.constant 0 : index
    %146 = vector.load %arg14[%c0_55, %c0_56, %c0_57] : memref<1x8x32xf32, #tpu.memory_space<vmem>>, vector<1x8x32xf32>
    %147 = vector.shape_cast %146 : vector<1x8x32xf32> to vector<8x32xf32>
    %148 = vector.shape_cast %145 : vector<8x32xf32> to vector<1x8x32xf32>
    tpu.vector_store %arg14[%c0_55, %c0_56, %c0_57], %148 {strides = array<i32>} : memref<1x8x32xf32, #tpu.memory_space<vmem>>, vector<1x8x32xf32>,
    return
  }
  func.func @transform_0(%arg0: i32) -> (i32, i32, i32) {
    %c0_i32 = arith.constant 0 : i32
    %c0_i32_0 = arith.constant 0 : i32
    %c0_i32_1 = arith.constant 0 : i32
    return %arg0, %c0_i32, %c0_i32_0 : i32, i32, i32
  }
  func.func @transform_1(%arg0: i32) -> (i32, i32, i32) {
    %c0_i32 = arith.constant 0 : i32
    %c0_i32_0 = arith.constant 0 : i32
    %c0_i32_1 = arith.constant 0 : i32
    return %arg0, %c0_i32, %c0_i32_0 : i32, i32, i32
  }
  func.func @transform_2(%arg0: i32) -> (i32, i32, i32) {
    %c0_i32 = arith.constant 0 : i32
    %c0_i32_0 = arith.constant 0 : i32
    %c0_i32_1 = arith.constant 0 : i32
    return %arg0, %c0_i32, %c0_i32_0 : i32, i32, i32
  }
  func.func @transform_3(%arg0: i32) -> (i32, i32) {
    %c0_i32 = arith.constant 0 : i32
    %c0_i32_0 = arith.constant 0 : i32
    %c0_i32_1 = arith.constant 0 : i32
    return %c0_i32, %c0_i32_0 : i32, i32
  }
  func.func @transform_4(%arg0: i32) -> (i32, i32) {
    %c0_i32 = arith.constant 0 : i32
    %c0_i32_0 = arith.constant 0 : i32
    %c0_i32_1 = arith.constant 0 : i32
    return %c0_i32, %c0_i32_0 : i32, i32
  }
  func.func @transform_5(%arg0: i32) -> (i32, i32) {
    %c0_i32 = arith.constant 0 : i32
    %c0_i32_0 = arith.constant 0 : i32
    %c0_i32_1 = arith.constant 0 : i32
    return %c0_i32, %c0_i32_0 : i32, i32
  }
  func.func @transform_6(%arg0: i32) -> (i32, i32) {
    %c0_i32 = arith.constant 0 : i32
    %c0_i32_0 = arith.constant 0 : i32
    %c0_i32_1 = arith.constant 0 : i32
    return %c0_i32, %c0_i32_0 : i32, i32
  }
  func.func @transform_7(%arg0: i32) -> (i32, i32) {
    %c0_i32 = arith.constant 0 : i32
    %c0_i32_0 = arith.constant 0 : i32
    %c0_i32_1 = arith.constant 0 : i32
    return %c0_i32, %c0_i32_0 : i32, i32
  }
  func.func @transform_8(%arg0: i32) -> (i32, i32) {
    %c0_i32 = arith.constant 0 : i32
    %c0_i32_0 = arith.constant 0 : i32
    %c0_i32_1 = arith.constant 0 : i32
    return %c0_i32, %c0_i32_0 : i32, i32
  }
  func.func @transform_9(%arg0: i32) -> (i32, i32) {
    %c0_i32 = arith.constant 0 : i32
    %c0_i32_0 = arith.constant 0 : i32
    %c0_i32_1 = arith.constant 0 : i32
    return %c0_i32, %c0_i32_0 : i32, i32
  }
  func.func @transform_10(%arg0: i32) -> (i32, i32) {
    %c0_i32 = arith.constant 0 : i32
    %c0_i32_0 = arith.constant 0 : i32
    %c0_i32_1 = arith.constant 0 : i32
    return %c0_i32, %c0_i32_0 : i32, i32
  }
  func.func @transform_11(%arg0: i32) -> (i32, i32) {
    %c0_i32 = arith.constant 0 : i32
    %c0_i32_0 = arith.constant 0 : i32
    %c0_i32_1 = arith.constant 0 : i32
    return %c0_i32, %c0_i32_0 : i32, i32
  }
  func.func @transform_12(%arg0: i32) -> (i32, i32) {
    %c0_i32 = arith.constant 0 : i32
    %c0_i32_0 = arith.constant 0 : i32
    %c0_i32_1 = arith.constant 0 : i32
    return %c0_i32, %c0_i32_0 : i32, i32
  }
  func.func @transform_13(%arg0: i32) -> (i32, i32, i32) {
    %c0_i32 = arith.constant 0 : i32
    %c0_i32_0 = arith.constant 0 : i32
    %c0_i32_1 = arith.constant 0 : i32
    return %arg0, %c0_i32, %c0_i32_0 : i32, i32, i32
  }
}

module attributes {stable_mosaic.version = 11 : i64} {
  func.func @_ffn_ln_kernel(%arg0: i32, %arg1: memref<16x32xf32, #tpu.memory_space<vmem>>, %arg2: memref<32x64xbf16, #tpu.memory_space<vmem>>, %arg3: memref<1x64xf32, #tpu.memory_space<vmem>>, %arg4: memref<64x32xbf16, #tpu.memory_space<vmem>>, %arg5: memref<1x32xf32, #tpu.memory_space<vmem>>, %arg6: memref<1x32xf32, #tpu.memory_space<vmem>>, %arg7: memref<1x32xf32, #tpu.memory_space<vmem>>, %arg8: memref<16x32xf32, #tpu.memory_space<vmem>>) attributes {dimension_semantics = [#tpu.dimension_semantics<parallel>], iteration_bounds = array<i64: 1>, scalar_prefetch = 0 : i64, scratch_operands = 0 : i64, tpu.core_type = #tpu.core_type<tc>, window_params = [{transform_indices = @transform_0, window_bounds = array<i64: 16, 32>}, {pipeline_mode = #tpu.pipeline_mode<synchronous>, transform_indices = @transform_1, window_bounds = array<i64: 32, 64>}, {pipeline_mode = #tpu.pipeline_mode<synchronous>, transform_indices = @transform_2, window_bounds = array<i64: 1, 64>}, {pipeline_mode = #tpu.pipeline_mode<synchronous>, transform_indices = @transform_3, window_bounds = array<i64: 64, 32>}, {pipeline_mode = #tpu.pipeline_mode<synchronous>, transform_indices = @transform_4, window_bounds = array<i64: 1, 32>}, {pipeline_mode = #tpu.pipeline_mode<synchronous>, transform_indices = @transform_5, window_bounds = array<i64: 1, 32>}, {pipeline_mode = #tpu.pipeline_mode<synchronous>, transform_indices = @transform_6, window_bounds = array<i64: 1, 32>}, {transform_indices = @transform_7, window_bounds = array<i64: 16, 32>}]} {
    %c0 = arith.constant 0 : index
    %c0_0 = arith.constant 0 : index
    %0 = vector.load %arg1[%c0, %c0_0] : memref<16x32xf32, #tpu.memory_space<vmem>>, vector<16x32xf32>
    %1 = arith.truncf %0 : vector<16x32xf32> to vector<16x32xbf16>
    %c0_1 = arith.constant 0 : index
    %c0_2 = arith.constant 0 : index
    %2 = vector.load %arg2[%c0_1, %c0_2] : memref<32x64xbf16, #tpu.memory_space<vmem>>, vector<32x64xbf16>
    %cst = arith.constant dense<0.000000e+00> : vector<16x64xf32>
    %3 = tpu.matmul %1, %2, %cst {dimension_numbers = #tpu.dot_dimension_numbers<[1], [0], [0], [1], [0, 0, 1, 1], [], []>} : vector<16x32xbf16>, vector<32x64xbf16>, vector<16x64xf32> -> vector<16x64xf32>
    %c0_3 = arith.constant 0 : index
    %c0_4 = arith.constant 0 : index
    %4 = vector.load %arg3[%c0_3, %c0_4] : memref<1x64xf32, #tpu.memory_space<vmem>>, vector<1x64xf32>
    %5 = vector.broadcast %4 : vector<1x64xf32> to vector<16x64xf32>
    %6 = arith.addf %3, %5 : vector<16x64xf32>
    %cst_5 = arith.constant 0.000000e+00 : f32
    %7 = vector.broadcast %cst_5 : f32 to vector<16x64xf32>
    %8 = arith.maximumf %6, %7 : vector<16x64xf32>
    %9 = arith.truncf %8 : vector<16x64xf32> to vector<16x64xbf16>
    %c0_6 = arith.constant 0 : index
    %c0_7 = arith.constant 0 : index
    %10 = vector.load %arg4[%c0_6, %c0_7] : memref<64x32xbf16, #tpu.memory_space<vmem>>, vector<64x32xbf16>
    %cst_8 = arith.constant dense<0.000000e+00> : vector<16x32xf32>
    %11 = tpu.matmul %9, %10, %cst_8 {dimension_numbers = #tpu.dot_dimension_numbers<[1], [0], [0], [1], [0, 0, 1, 1], [], []>} : vector<16x64xbf16>, vector<64x32xbf16>, vector<16x32xf32> -> vector<16x32xf32>
    %c0_9 = arith.constant 0 : index
    %c0_10 = arith.constant 0 : index
    %12 = vector.load %arg5[%c0_9, %c0_10] : memref<1x32xf32, #tpu.memory_space<vmem>>, vector<1x32xf32>
    %13 = vector.broadcast %12 : vector<1x32xf32> to vector<16x32xf32>
    %14 = arith.addf %11, %13 : vector<16x32xf32>
    %15 = arith.addf %0, %14 : vector<16x32xf32>
    %cst_11 = arith.constant dense<0.000000e+00> : vector<16xf32>
    %16 = vector.multi_reduction <add>, %15, %cst_11 [1] : vector<16x32xf32> to vector<16xf32>
    %17 = vector.shape_cast %16 : vector<16xf32> to vector<16x1xf32>
    %cst_12 = arith.constant 3.200000e+01 : f32
    %18 = vector.broadcast %cst_12 : f32 to vector<16x1xf32>
    %19 = arith.divf %17, %18 : vector<16x1xf32>
    %20 = arith.mulf %15, %15 : vector<16x32xf32>
    %cst_13 = arith.constant dense<0.000000e+00> : vector<16xf32>
    %21 = vector.multi_reduction <add>, %20, %cst_13 [1] : vector<16x32xf32> to vector<16xf32>
    %22 = vector.shape_cast %21 : vector<16xf32> to vector<16x1xf32>
    %cst_14 = arith.constant 3.200000e+01 : f32
    %23 = vector.broadcast %cst_14 : f32 to vector<16x1xf32>
    %24 = arith.divf %22, %23 : vector<16x1xf32>
    %25 = arith.mulf %19, %19 : vector<16x1xf32>
    %26 = arith.subf %24, %25 : vector<16x1xf32>
    %27 = vector.broadcast %19 : vector<16x1xf32> to vector<16x32xf32>
    %28 = arith.subf %15, %27 : vector<16x32xf32>
    %cst_15 = arith.constant 9.99999974E-6 : f32
    %29 = vector.broadcast %cst_15 : f32 to vector<16x1xf32>
    %30 = arith.addf %26, %29 : vector<16x1xf32>
    %31 = math.rsqrt %30 : vector<16x1xf32>
    %32 = vector.broadcast %31 : vector<16x1xf32> to vector<16x32xf32>
    %33 = arith.mulf %28, %32 : vector<16x32xf32>
    %c0_16 = arith.constant 0 : index
    %c0_17 = arith.constant 0 : index
    %34 = vector.load %arg6[%c0_16, %c0_17] : memref<1x32xf32, #tpu.memory_space<vmem>>, vector<1x32xf32>
    %35 = vector.broadcast %34 : vector<1x32xf32> to vector<16x32xf32>
    %36 = arith.mulf %33, %35 : vector<16x32xf32>
    %c0_18 = arith.constant 0 : index
    %c0_19 = arith.constant 0 : index
    %37 = vector.load %arg7[%c0_18, %c0_19] : memref<1x32xf32, #tpu.memory_space<vmem>>, vector<1x32xf32>
    %38 = vector.broadcast %37 : vector<1x32xf32> to vector<16x32xf32>
    %39 = arith.addf %36, %38 : vector<16x32xf32>
    %c0_20 = arith.constant 0 : index
    %c0_21 = arith.constant 0 : index
    %40 = vector.load %arg8[%c0_20, %c0_21] : memref<16x32xf32, #tpu.memory_space<vmem>>, vector<16x32xf32>
    tpu.vector_store %arg8[%c0_20, %c0_21], %39 {strides = array<i32>} : memref<16x32xf32, #tpu.memory_space<vmem>>, vector<16x32xf32>,
    return
  }
  func.func @transform_0(%arg0: i32) -> (i32, i32) {
    %c0_i32 = arith.constant 0 : i32
    %c0_i32_0 = arith.constant 0 : i32
    return %arg0, %c0_i32 : i32, i32
  }
  func.func @transform_1(%arg0: i32) -> (i32, i32) {
    %c0_i32 = arith.constant 0 : i32
    %c0_i32_0 = arith.constant 0 : i32
    %c0_i32_1 = arith.constant 0 : i32
    return %c0_i32, %c0_i32_0 : i32, i32
  }
  func.func @transform_2(%arg0: i32) -> (i32, i32) {
    %c0_i32 = arith.constant 0 : i32
    %c0_i32_0 = arith.constant 0 : i32
    %c0_i32_1 = arith.constant 0 : i32
    return %c0_i32, %c0_i32_0 : i32, i32
  }
  func.func @transform_3(%arg0: i32) -> (i32, i32) {
    %c0_i32 = arith.constant 0 : i32
    %c0_i32_0 = arith.constant 0 : i32
    %c0_i32_1 = arith.constant 0 : i32
    return %c0_i32, %c0_i32_0 : i32, i32
  }
  func.func @transform_4(%arg0: i32) -> (i32, i32) {
    %c0_i32 = arith.constant 0 : i32
    %c0_i32_0 = arith.constant 0 : i32
    %c0_i32_1 = arith.constant 0 : i32
    return %c0_i32, %c0_i32_0 : i32, i32
  }
  func.func @transform_5(%arg0: i32) -> (i32, i32) {
    %c0_i32 = arith.constant 0 : i32
    %c0_i32_0 = arith.constant 0 : i32
    %c0_i32_1 = arith.constant 0 : i32
    return %c0_i32, %c0_i32_0 : i32, i32
  }
  func.func @transform_6(%arg0: i32) -> (i32, i32) {
    %c0_i32 = arith.constant 0 : i32
    %c0_i32_0 = arith.constant 0 : i32
    %c0_i32_1 = arith.constant 0 : i32
    return %c0_i32, %c0_i32_0 : i32, i32
  }
  func.func @transform_7(%arg0: i32) -> (i32, i32) {
    %c0_i32 = arith.constant 0 : i32
    %c0_i32_0 = arith.constant 0 : i32
    return %arg0, %c0_i32 : i32, i32
  }
}

module attributes {stable_mosaic.version = 11 : i64} {
  func.func @_linear_kernel(%arg0: i32, %arg1: i32, %arg2: memref<16x32xf32, #tpu.memory_space<vmem>>, %arg3: memref<32x128xbf16, #tpu.memory_space<vmem>>, %arg4: memref<1x128xf32, #tpu.memory_space<vmem>>, %arg5: memref<16x128xf32, #tpu.memory_space<vmem>>) attributes {dimension_semantics = [#tpu.dimension_semantics<parallel>, #tpu.dimension_semantics<parallel>], iteration_bounds = array<i64: 1, 1>, scalar_prefetch = 0 : i64, scratch_operands = 0 : i64, tpu.core_type = #tpu.core_type<tc>, window_params = [{transform_indices = @transform_0, window_bounds = array<i64: 16, 32>}, {transform_indices = @transform_1, window_bounds = array<i64: 32, 128>}, {transform_indices = @transform_2, window_bounds = array<i64: 1, 128>}, {transform_indices = @transform_3, window_bounds = array<i64: 16, 128>}]} {
    %c0 = arith.constant 0 : index
    %c0_0 = arith.constant 0 : index
    %0 = vector.load %arg2[%c0, %c0_0] : memref<16x32xf32, #tpu.memory_space<vmem>>, vector<16x32xf32>
    %1 = arith.truncf %0 : vector<16x32xf32> to vector<16x32xbf16>
    %c0_1 = arith.constant 0 : index
    %c0_2 = arith.constant 0 : index
    %2 = vector.load %arg3[%c0_1, %c0_2] : memref<32x128xbf16, #tpu.memory_space<vmem>>, vector<32x128xbf16>
    %cst = arith.constant dense<0.000000e+00> : vector<16x128xf32>
    %3 = tpu.matmul %1, %2, %cst {dimension_numbers = #tpu.dot_dimension_numbers<[1], [0], [0], [1], [0, 0, 1, 1], [], []>} : vector<16x32xbf16>, vector<32x128xbf16>, vector<16x128xf32> -> vector<16x128xf32>
    %c0_3 = arith.constant 0 : index
    %c0_4 = arith.constant 0 : index
    %4 = vector.load %arg4[%c0_3, %c0_4] : memref<1x128xf32, #tpu.memory_space<vmem>>, vector<1x128xf32>
    %5 = vector.broadcast %4 : vector<1x128xf32> to vector<16x128xf32>
    %6 = arith.addf %3, %5 : vector<16x128xf32>
    %c0_5 = arith.constant 0 : index
    %c0_6 = arith.constant 0 : index
    %7 = vector.load %arg5[%c0_5, %c0_6] : memref<16x128xf32, #tpu.memory_space<vmem>>, vector<16x128xf32>
    tpu.vector_store %arg5[%c0_5, %c0_6], %6 {strides = array<i32>} : memref<16x128xf32, #tpu.memory_space<vmem>>, vector<16x128xf32>,
    return
  }
  func.func @transform_0(%arg0: i32, %arg1: i32) -> (i32, i32) {
    %c0_i32 = arith.constant 0 : i32
    %c0_i32_0 = arith.constant 0 : i32
    return %arg0, %c0_i32 : i32, i32
  }
  func.func @transform_1(%arg0: i32, %arg1: i32) -> (i32, i32) {
    %c0_i32 = arith.constant 0 : i32
    %c0_i32_0 = arith.constant 0 : i32
    return %c0_i32, %arg1 : i32, i32
  }
  func.func @transform_2(%arg0: i32, %arg1: i32) -> (i32, i32) {
    %c0_i32 = arith.constant 0 : i32
    %c0_i32_0 = arith.constant 0 : i32
    return %c0_i32, %arg1 : i32, i32
  }
  func.func @transform_3(%arg0: i32, %arg1: i32) -> (i32, i32) {
    %c0_i32 = arith.constant 0 : i32
    return %arg0, %arg1 : i32, i32
  }
}

</mosaic_0001>

<bundles_post_ra>
// kernel: transformer_forward.12
= control target key start
LH: loop header
LB: loop body
LE: loop exit
PB: predicated region body
PF: predicated region fallthrough
CT: control target
= control target key end

     0   :  { %vm50_vm0 = vcmask 261120   ;;  %vm107_vm1 = vcmask 523264   ;;  %v243_v30 = vmov 32.0   ;;  %s333_s1 = inlined_call_operand.vmem [shape: bf16[32,64], index: 1, kind: input, shape index: {}]   ;;  %s334_s0 = inlined_call_operand.vmem [shape: f32[16,32], index: 0, kind: input, shape index: {}]   ;;  %s335_s2 = inlined_call_operand.vmem [shape: f32[1,64], index: 2, kind: input, shape index: {}]   ;;  %s336_s4 = inlined_call_operand.vmem [shape: f32[1,32], index: 4, kind: input, shape index: {}]   ;;  %s337_s3 = inlined_call_operand.vmem [shape: bf16[64,32], index: 3, kind: input, shape index: {}]   ;;  %s338_s5 = inlined_call_operand.vmem [shape: f32[1,32], index: 5, kind: input, shape index: {}]   ;;  %s339_s6 = inlined_call_operand.vmem [shape: f32[1,32], index: 6, kind: input, shape index: {}]   ;;  %s340_s7 = inlined_call_operand.vmem [shape: f32[16,32], index: 7, kind: output, shape index: {}]  }
   0x1   :  { %v227_v0 = vld [vmem:[%s333_s1 + $0x8] sm:$0xff]  ;;  %v226_v1 = vld [vmem:[%s333_s1] sm:$0xff]  ;;  %v231_v5 = vld [vmem:[%s337_s3 + $0x18] sm:$0xff]  ;;  %237 = vrcp.f32 %v243_v30 }
   0x2   :  { %60 = vmatpush.bf16.msra.mxu0 %v227_v0  ;;  %v27_v2 = vld [vmem:[%s334_s0] sm:$0xff]  ;;  %v28_v3 = vld [vmem:[%s334_s0 + $0x8] sm:$0xff]  ;;  %115 = vmatpush.bf16.msra.mxu1 %v231_v5  ;;  %v230_v6 = vld [vmem:[%s337_s3 + $0x10] sm:$0xff] }
   0x3   :  { %v29_v4 = vpack.c.bf16 %v28_v3, %v27_v2  ;;  %v229_v7 = vld [vmem:[%s337_s3 + $0x8] sm:$0xff]  ;;  %v228_v8 = vld [vmem:[%s337_s3] sm:$0xff] }
   0x4   :  { %v233_v10 = vld [vmem:[%s335_s2] ss:$0 sm:$0xff] }
   0x5   :  { %v234_v17 = vld [vmem:[%s336_s4] ss:$0 sm:$0xff] }
   0x6   :  { %61 = vmatpush.bf16.msra.mxu0 %v226_v1  ;;  %116 = vmatpush.bf16.msra.mxu1 %v230_v6  ;;  %v235_v60 = vld [vmem:[%s338_s5] ss:$0 sm:$0xff] }
   0x7   :  { %v238_v31 = vpop.eup %237  ;;  %v236_v63 = vld [vmem:[%s339_s6] ss:$0 sm:$0xff] }
   0x8   :  { %v134_v32 = vmul.f32 32.0, %v238_v31  ;;  %vm138_vm2 = vweird.f32 %v238_v31 }
   0x9   :  { %208 = vmatmul.msk.bf16.vlgmr.msra.gmra.mxu0 %vm50_vm0, %v29_v4 }
   0xa   :  { %117 = vmatpush.bf16.msra.mxu1 %v229_v7  ;;  %v135_v33 = vsub.f32 1.0, %v134_v32 }
   0xc   :  { %v136_v34 = vmul.f32 %v238_v31, %v135_v33 }
   0xe   :  { %118 = vmatpush.bf16.msra.mxu1 %v228_v8  ;;  %v137_v35 = vadd.f32 %v238_v31, %v136_v34 }
  0x10   :  { %v139_v36 = vsel %vm138_vm2, %v238_v31, %v137_v35 }
  0x86   :  { %v63_v9 = vpop.f32.mrf.mxu0 }
  0x87   :  { %v64_v11 = vadd.f32 %v233_v10, %v63_v9 }
  0x89   :  { %v68_v14 = vmax.f32 %v64_v11, 0.0 }
  0x8e   :  { %v65_v12 = vpop.f32.mrf.mxu0 }
  0x8f   :  { %v66_v13 = vadd.f32 %v233_v10, %v65_v12 }
  0x91   :  { %v69_v15 = vmax.f32 %v66_v13, 0.0 }
  0x93   :  { %v70_v16 = vpack.c.bf16 %v69_v15, %v68_v14 }
  0x95   :  { %225 = vmatmul.msk.bf16.vlgmr.msra.gmra.mxu1 %vm107_vm1, %v70_v16 }
 0x112   :  { %v120_v18 = vpop.f32.mrf.mxu1 }
 0x113   :  { %v121_v19 = vadd.f32 %v234_v17, %v120_v18 }
 0x115   :  { %v125_v20 = vadd.f32 %v121_v19, %v27_v2 }
 0x117   :  { %v127_v21 = vsel %vm50_vm0, %v125_v20, 0.0  ;;  %v142_v22 = vmul.f32 %v125_v20, %v125_v20 }
 0x118   :  { %128 = vadd.xlane.f32.xlu0 %v127_v21 }
 0x119   :  { %v144_v23 = vsel %vm50_vm0, %v142_v22, 0.0 }
 0x11a   :  { %v122_v24 = vpop.f32.mrf.mxu1  ;;  %145 = vadd.xlane.f32.xlu1 %v144_v23 }
 0x11b   :  { %v123_v25 = vadd.f32 %v234_v17, %v122_v24 }
 0x11d   :  { %v126_v26 = vadd.f32 %v123_v25, %v28_v3 }
 0x11f   :  { %v130_v27 = vsel %vm50_vm0, %v126_v26, 0.0  ;;  %v143_v28 = vmul.f32 %v126_v26, %v126_v26 }
 0x120   :  { %131 = vadd.xlane.f32.xlu0 %v130_v27 }
 0x121   :  { %v147_v29 = vsel %vm50_vm0, %v143_v28, 0.0 }
 0x122   :  { %148 = vadd.xlane.f32.xlu1 %v147_v29 }
 0x18b   :  { %v129_v37 = vpop.xlane.xlu0 %128 }
 0x18c   :  { %v140_v38 = vmul.f32 %v139_v36, %v129_v37 }
 0x18d   :  { %v146_v39 = vpop.xlane.xlu1 %145 }
 0x18e   :  { %v152_v40 = vmul.f32 %v140_v38, %v140_v38  ;;  %v150_v41 = vmul.f32 %v146_v39, %v139_v36  ;;  %v156_v59 = vsub.f32 %v125_v20, %v140_v38 }
 0x190   :  { %v154_v42 = vsub.f32 %v150_v41, %v152_v40 }
 0x192   :  { %v158_v43 = vadd.f32 1e-05, %v154_v42 }
 0x193   :  { %v132_v44 = vpop.xlane.xlu0 %131 }
 0x194   :  { %239 = vrsqrt.f32 %v158_v43  ;;  %v141_v45 = vmul.f32 %v139_v36, %v132_v44  ;;  %vm166_vm4 = vweird.f32 %v158_v43 }
 0x195   :  { %v149_v46 = vpop.xlane.xlu1 %148 }
 0x196   :  { %v153_v47 = vmul.f32 %v141_v45, %v141_v45  ;;  %v151_v48 = vmul.f32 %v149_v46, %v139_v36  ;;  %v157_v6 = vsub.f32 %v126_v26, %v141_v45 }
 0x198   :  { %v155_v49 = vsub.f32 %v151_v48, %v153_v47 }
 0x19a   :  { %v240_v50 = vpop.eup %239  ;;  %v159_v51 = vadd.f32 1e-05, %v155_v49 }
 0x19b   :  { %v161_v52 = vmul.f32 %v240_v50, %v158_v43  ;;  %vm167_vm3 = vweird.f32 %v240_v50 }
 0x19c   :  { %241 = vrsqrt.f32 %v159_v51  ;;  %vm168_vm5 = vmor %vm166_vm4, %vm167_vm3  ;;  %vm176_vm7 = vweird.f32 %v159_v51 }
 0x19d   :  { %v162_v53 = vmul.f32 %v240_v50, %v161_v52 }
 0x19f   :  { %v163_v54 = vmul.f32 0.5, %v162_v53 }
 0x1a1   :  { %v164_v55 = vsub.f32 1.5, %v163_v54 }
 0x1a2   :  { %v242_v56 = vpop.eup %241 }
 0x1a3   :  { %v165_v57 = vmul.f32 %v240_v50, %v164_v55  ;;  %v171_v58 = vmul.f32 %v242_v56, %v159_v51  ;;  %vm177_vm6 = vweird.f32 %v242_v56 }
 0x1a4   :  { %vm178_vm8 = vmor %vm176_vm7, %vm177_vm6 }
 0x1a5   :  { %v169_v61 = vsel %vm168_vm5, %v240_v50, %v165_v57  ;;  %v172_v62 = vmul.f32 %v242_v56, %v171_v58 }
 0x1a6   :  { %v180_v0 = vmul.f32 %v169_v61, %v156_v59 }
 0x1a7   :  { %v173_v1 = vmul.f32 0.5, %v172_v62 }
 0x1a8   :  { %v186_v2 = vmul.f32 %v235_v60, %v180_v0 }
 0x1a9   :  { %v174_v3 = vsub.f32 1.5, %v173_v1 }
 0x1aa   :  { %v192_v4 = vadd.f32 %v236_v63, %v186_v2 }
 0x1ab   :  { %v175_v5 = vmul.f32 %v242_v56, %v174_v3 }
 0x1ac   :  { %194 = vst.msk [vmem:[%s340_s7] sm:$0xff] %vm50_vm0, %v192_v4 }
 0x1ad   :  { %v179_v7 = vsel %vm178_vm8, %v242_v56, %v175_v5 }
 0x1ae   :  { %v181_v8 = vmul.f32 %v179_v7, %v157_v6 }
 0x1b0   :  { %v187_v9 = vmul.f32 %v235_v60, %v181_v8 }
 0x1b2   :  { %v193_v10 = vadd.f32 %v236_v63, %v187_v9 }
 0x1b4   :  { %195 = vst.msk [vmem:[%s340_s7 + $0x8] sm:$0xff] %vm50_vm0, %v193_v10 }

// kernel: transformer_forward.13
= control target key start
LH: loop header
LB: loop body
LE: loop exit
PB: predicated region body
PF: predicated region fallthrough
CT: control target
= control target key end

     0   :  { %18 = vsyncpa [#allocation3], 0  ;;  %s1453_s0 = inlined_call_operand.vmem [shape: f32[2,8,32], index: 0, kind: input, shape index: {}, may-alias: {0,1}]   ;;  %s1454_s1 = inlined_call_operand.vmem [shape: f32[2,8,32], index: 1, kind: input, shape index: {}, may-alias: {0,1}]   ;;  %s1455_s2 = inlined_call_operand.vmem [shape: f32[2,1,8], index: 2, kind: input, shape index: {}]   ;;  %s1456_s3 = inlined_call_operand.vmem [shape: bf16[32,32], index: 3, kind: input, shape index: {}]   ;;  %s1457_s4 = inlined_call_operand.vmem [shape: bf16[32,32], index: 4, kind: input, shape index: {}]   ;;  %s1458_s5 = inlined_call_operand.vmem [shape: bf16[32,32], index: 5, kind: input, shape index: {}]   ;;  %s1459_s6 = inlined_call_operand.vmem [shape: bf16[32,32], index: 6, kind: input, shape index: {}]   ;;  %s1460_s7 = inlined_call_operand.vmem [shape: f32[1,32], index: 7, kind: input, shape index: {}]   ;;  %s1461_s8 = inlined_call_operand.vmem [shape: f32[1,32], index: 8, kind: input, shape index: {}]   ;;  %s1462_s9 = inlined_call_operand.vmem [shape: f32[1,32], index: 9, kind: input, shape index: {}]   ;;  %s1463_s10 = inlined_call_operand.vmem [shape: f32[1,32], index: 10, kind: input, shape index: {}]   ;;  %s1464_s11 = inlined_call_operand.hbm [shape: f32[1,32], index: 11, kind: input, shape index: {}]   ;;  %s1465_s12 = inlined_call_operand.hbm [shape: f32[1,32], index: 12, kind: input, shape index: {}]   ;;  %s1466_s13 = inlined_call_operand.vmem [shape: f32[2,8,32], index: 13, kind: output, shape index: {}]  }
   0x1   :  { %19 = vsyncpa [#allocation5], 0  ;;  %s1320_s25 = smov 0  }
   0x2 LB: > { %s380_s28 = sshll.u32 %s1464_s11, 4  ;;  %s1033_s29 = sadd.s32 4294967295, %s1237_s25   ;;  %s1237_s25 = sphi %s1320_s25, %s25_s25   ;;  %s381_s28 = int_to_ptr.hbm [resolvable:$true] %s380_s28 }
   0x3   : > { %p1035_p0 = scmp.ge.s32.totalorder %s1237_s25, 1  ;;  %p344_p1 = scmp.lt.s32.totalorder %s1237_s25, 3 }
   0x4   : > { %p1114_p2 = scmp.eq.s32.totalorder %s1033_s29, 0  ;;  %s1239_s14 = smov [#allocation2]  }
   0x5   : > { %p1331_p3 = pnand %p1035_p0, %p344_p1  ;;  %s382_s15 = sshll.u32 %s1239_s14, 4  ;;  %s383_s15 = int_to_ptr.vmem [resolvable:$true] %s382_s15 }
   0x6   : > { %s392_s18 = sshll.u32 %s1465_s12, 4  ;;  %s1240_s19 = smov [#allocation4]   ;;  %s393_s18 = int_to_ptr.hbm [resolvable:$true] %s392_s18 }
   0x7   : > { %p1107_p4 = pneg %p1331_p3  ;;  %s394_s20 = sshll.u32 %s1240_s19, 4  ;;  %s395_s20 = int_to_ptr.vmem [resolvable:$true] %s394_s20 }
   0x8   : > { %427 = sbr.rel (%p1331_p3) target bundleno = 1234 (0x4d2), region = 72 }
   0x9   : > { %p1108_p5 = pnand %p1114_p2, %p1107_p4 }
   0xb   : > { %1110 = dma.hbm_to_vmem [thread:$0]  (!%p1108_p5), %s381_s28, 16, %s383_s15, [#allocation3]  }
   0xc   : > { %1113 = dma.hbm_to_vmem [thread:$0]  (!%p1108_p5), %s393_s18, 16, %s395_s20, [#allocation5]  }
   0xd   : > { %1228 = dma.done.wait (%p1114_p2), [#allocation3], 16  }
   0xe   : > { %1230 = vsyncadd (%p1114_p2), [#allocation3], 4294967280 }
   0xf   : > { %1232 = dma.done.wait (%p1114_p2), [#allocation5], 16  }
  0x10   : > { %1234 = vsyncadd (%p1114_p2), [#allocation5], 4294967280  ;;  %p482_p6 = scmp.lt.s32.totalorder %s1033_s29, 1  ;;  %v1092_v0 = vld [vmem:[%s1456_s3 + $0x8] sm:$0xff]  ;;  %v1091_v2 = vld [vmem:[%s1456_s3] sm:$0xff]  ;;  %vm522_vm0 = vcmask 261120  }
  0x11   : > { %v1094_v1 = vld [vmem:[%s1457_s4 + $0x8] sm:$0xff]  ;;  %v1093_v3 = vld [vmem:[%s1457_s4] sm:$0xff]  ;;  %532 = vmatpush.bf16.msra.mxu0 %v1092_v0  ;;  %vm617_vm1 = vcmask 64512   ;;  %s1241_s27 = smov 112   ;;  %s1243_s30 = smov 104   ;;  %v1244_v28 = vmov 0  }
  0x12   : > { %s1469_s29 = smov (!%p482_p6, %s1033_s29), 1  ;;  %568 = vmatpush.bf16.msra.mxu1 %v1094_v1  ;;  %v1137_v8 = vld [vmem:[%s1460_s7] ss:$0 sm:$0xff]  ;;  %v1245_v32 = vmov 0.0   ;;  %v1096_v38 = vld [vmem:[%s1458_s5 + $0x8] sm:$0xff]  ;;  %vm652_vm4 = vcmask 1043456  }
  0x13   : > { %s1350_s21 = sshll.u32 %s1469_s29, 3  ;;  %v1138_v9 = vld [vmem:[%s1461_s8] ss:$0 sm:$0xff]  ;;  %s492_s16 = scalar_lea.vmem %s1455_s2, %s1469_s29  ;;  %601 = vmatpush.bf16.msra.mxu2 %v1096_v38  ;;  %vm853_vm5 = vcmask 130048   ;;  %vm855_vm6 = vcmask 195584  }
  0x14   : > { %s485_s24 = scalar_lea.vmem %s1453_s0, %s1350_s21  ;;  %s489_s28 = scalar_lea.vmem %s1454_s1, %s1350_s21  ;;  %v608_v26 = vld [vmem:[%s492_s16] sm:$0x1] }
  0x15   : > { %v1372_v4 = vld [vmem:[%s485_s24] sm:$0xff]  ;;  %533 = vmatpush.bf16.msra.mxu0 %v1091_v2  ;;  %vm609_vm2 = vcmp.gt.f32.partialorder %v608_v26, 0.0  ;;  %s1246_s23 = smov 8   ;;  %s1247_s24 = smov 24  }
  0x16   : > { %v499_v5 = vld [vmem:[%s489_s28] sm:$0xff]  ;;  %v500_v6 = vpack.c.bf16 %v1372_v4, %v1372_v4  ;;  %569 = vmatpush.bf16.msra.mxu1 %v1093_v3  ;;  %s1242_s28 = smov 120   ;;  %v610_v29 = vsel %vm609_vm2, 1, %v1244_v28  ;;  %s1248_s26 = smov 16  }
  0x17   : > { %v501_v7 = vpack.c.bf16 %v499_v5, %v499_v5  ;;  %v611_v30 = vperm.slane %v610_v29, 0  ;;  %v1095_v39 = vld [vmem:[%s1458_s5] sm:$0xff]  ;;  %s496_s18 = scalar_lea.vmem %s1466_s13, %s1350_s21 }
  0x18   : > { %1053 = vmatmul.msk.bf16.vlgmr.msra.gmra.mxu0 %vm522_vm0, %v500_v6  ;;  %602 = vmatpush.bf16.msra.mxu2 %v1095_v39  ;;  %v1139_v57 = vld [vmem:[%s1462_s9] ss:$0 sm:$0xff] }
  0x19   : > { %1062 = vmatmul.msk.bf16.vlgmr.msra.gmra.mxu1 %vm522_vm0, %v501_v7  ;;  %vm612_vm3 = vcmp.eq.s32.totalorder %v611_v30, 1 }
  0x1a   : > { %v613_v33 = vsel %vm612_vm3, -1e+09, %v1245_v32 }
  0x1b   : > { %1071 = vmatmul.msk.bf16.vlgmr.msra.gmra.mxu2 %vm522_vm0, %v501_v7 }
  0x95   : > { %v535_v10 = vpop.f32.mrf.mxu0 }
  0x96   : > { %v571_v11 = vpop.f32.mrf.mxu1  ;;  %v536_v12 = vadd.f32 %v1137_v8, %v535_v10 }
  0x97   : > { %v572_v13 = vadd.f32 %v1138_v9, %v571_v11 }
  0x98   : > { %v614_v14 = vpack.c.bf16 %v536_v12, %v536_v12 }
  0x99   : > { %v615_v15 = vpack.c.bf16 %v572_v13, %v572_v13 }
  0x9a   : > { %728 = vrot.lane.b32.xlu2 %v614_v14, %s1241_s27 }
  0x9b   : > { %730 = vrot.lane.b32.xlu1 %v615_v15, %s1241_s27  ;;  %673 = vrot.lane.b32.xlu0 %v615_v15, %s1242_s28  ;;  %v622_v16 = vsel %vm617_vm1, %v615_v15, 0 }
  0x9c   : > { %631 = vmatpush.bf16.xpose.msra.mxu3 %v622_v16 }
  0x9d   : > { %v537_v17 = vpop.f32.mrf.mxu0 }
  0x9e   : > { %v573_v18 = vpop.f32.mrf.mxu1  ;;  %v604_v58 = vpop.f32.mrf.mxu2 }
  0x9f   : > { %v605_v59 = vadd.f32 %v1139_v57, %v604_v58 }
  0xa1   : > { %v616_v60 = vpack.c.bf16 %v605_v59, %v605_v59 }
  0xa2   : > { %784 = vrot.lane.b32.xlu2 %v614_v14, %s1243_s30 }
  0xa3   : > { %786 = vrot.lane.b32.xlu1 %v615_v15, %s1243_s30  ;;  %670 = vrot.lane.b32.xlu0 %v614_v14, %s1242_s28  ;;  %v654_v61 = vsel %vm652_vm4, %v616_v60, 0 }
  0xa4   : > { %1072 = vmatmul.msk.bf16.vlgmr.msra.gmra.mxu3 %vm617_vm1, %v614_v14  ;;  %663 = vmatpush.bf16.msrb.mxu0 %v654_v61 }
  0xa6   : > { %v606_v63 = vpop.f32.mrf.mxu2 }
  0xf4   : > { %v729_v23 = vpop.permute.xlu2 %728 }
  0xfc   : > { %v785_v31 = vpop.permute.xlu2 %784 }
 0x10d   : > { %v731_v19 = vpop.permute.xlu1 %730  ;;  %v674_v20 = vpop.permute.xlu0 %673 }
 0x10e   : > { %v679_v21 = vsel %vm617_vm1, %v674_v20, 0  ;;  %v736_v22 = vsel %vm617_vm1, %v731_v19, 0 }
 0x10f   : > { %688 = vmatpush.bf16.xpose.msrb.mxu1 %v679_v21  ;;  %745 = vmatpush.bf16.xpose.msrb.mxu3 %v736_v22 }
 0x115   : > { %v787_v24 = vpop.permute.xlu1 %786  ;;  %v671_v25 = vpop.permute.xlu0 %670 }
 0x116   : > { %v792_v27 = vsel %vm617_vm1, %v787_v24, 0  ;;  %1074 = vmatmul.msk.bf16.vlgmr.msrb.gmra.mxu1 %vm617_vm1, %v671_v25  ;;  %1076 = vmatmul.msk.bf16.vlgmr.msrb.gmra.mxu3 %vm617_vm1, %v729_v23 }
 0x117   : > { %801 = vmatpush.bf16.xpose.msra.mxu1 %v792_v27 }
 0x126   : > { %1078 = vmatmul.msk.bf16.vlgmr.msra.gmra.mxu1 %vm617_vm1, %v785_v31 }
 0x127   : > { %v633_v34 = vpop.f32.mrf.mxu3 }
 0x128   : > { %v634_v35 = vadd.f32 %v633_v34, %v613_v33 }
 0x12a   : > { %v637_v36 = vsel %vm617_vm1, %v634_v35, -inf }
 0x12b   : > { %638 = vmax.xlane.f32.xlu1 %v637_v36 }
 0x12f   : > { %v635_v37 = vpop.f32.mrf.mxu3 }
 0x193   : > { %v690_v40 = vpop.f32.mrf.mxu1 }
 0x194   : > { %v691_v41 = vadd.f32 %v690_v40, %v613_v33 }
 0x196   : > { %v694_v42 = vsel %vm617_vm1, %v691_v41, -inf }
 0x197   : > { %695 = vmax.xlane.f32.xlu0 %v694_v42 }
 0x199   : > { %v747_v43 = vpop.f32.mrf.mxu3 }
 0x19a   : > { %v748_v53 = vadd.f32 %v747_v43, %v613_v33 }
 0x19b   : > { %v692_v44 = vpop.f32.mrf.mxu1 }
 0x19c   : > { %v751_v56 = vsel %vm617_vm1, %v748_v53, -inf }
 0x19e   : > { %v639_v45 = vpop.xlane.xlu1 %638 }
 0x19f   : > { %v640_v46 = vsub.f32 %v634_v35, %v639_v45  ;;  %v1098_v45 = vld [vmem:[%s1459_s6 + $0x8] sm:$0xff] }
 0x1a0   : > { %887 = vmatpush.bf16.msra.mxu3 %v1098_v45 }
 0x1a1   : > { %v641_v47 = vmul.f32 1.442695, %v640_v46  ;;  %v749_v48 = vpop.f32.mrf.mxu3  ;;  %v1097_v46 = vld [vmem:[%s1459_s6] sm:$0xff] }
 0x1a3   : > { %1143 = vpow2.f32 %v641_v47  ;;  %v803_v49 = vpop.f32.mrf.mxu1 }
 0x1a4   : > { %v804_v50 = vadd.f32 %v803_v49, %v613_v33  ;;  %888 = vmatpush.bf16.msra.mxu3 %v1097_v46 }
 0x1a6   : > { %v807_v51 = vsel %vm617_vm1, %v804_v50, -inf }
 0x1a7   : > { %808 = vmax.xlane.f32.xlu2 %v807_v51 }
 0x1a9   : > { %v1144_v52 = vpop.eup %1143 }
 0x1aa   : > { %v643_v54 = vsel %vm617_vm1, %v1144_v52, 0.0 }
 0x1ab   : > { %644 = vadd.xlane.f32.xlu1 %v643_v54  ;;  %v805_v55 = vpop.f32.mrf.mxu1  ;;  %v1140_v54 = vld [vmem:[%s1463_s10] ss:$0 sm:$0xff] }
 0x1af   : > { %752 = vmax.xlane.f32.xlu2 %v751_v56 }
 0x1c7   : > { %707 = vrot.lane.b32.xlu2 %v616_v60, %s1242_s28 }
 0x20a   : > { %v696_v62 = vpop.xlane.xlu0 %695 }
 0x20b   : > { %v697_v0 = vsub.f32 %v691_v41, %v696_v62  ;;  %v1249_v62 = vmov 32.0  }
 0x20d   : > { %v698_v1 = vmul.f32 1.442695, %v697_v0 }
 0x20f   : > { %1145 = vpow2.f32 %v698_v1 }
 0x215   : > { %v1146_v2 = vpop.eup %1145 }
 0x216   : > { %v700_v3 = vsel %vm617_vm1, %v1146_v2, 0.0 }
 0x217   : > { %701 = vadd.xlane.f32.xlu0 %v700_v3 }
 0x21a   : > { %v809_v5 = vpop.xlane.xlu2 %808 }
 0x21b   : > { %v810_v6 = vsub.f32 %v804_v50, %v809_v5 }
 0x21d   : > { %v811_v7 = vmul.f32 1.442695, %v810_v6 }
 0x21e   : > { %v645_v8 = vpop.xlane.xlu1 %644 }
 0x21f   : > { %1147 = vpow2.f32 %v811_v7 }
 0x220   : > { %1149 = vrcp.f32 %v645_v8 }
 0x222   : > { %v753_v9 = vpop.xlane.xlu2 %752 }
 0x223   : > { %v754_v10 = vsub.f32 %v748_v53, %v753_v9 }
 0x225   : > { %v1148_v11 = vpop.eup %1147  ;;  %v755_v12 = vmul.f32 1.442695, %v754_v10 }
 0x226   : > { %v1150_v13 = vpop.eup %1149  ;;  %v813_v14 = vsel %vm617_vm1, %v1148_v11, 0.0 }
 0x227   : > { %v647_v15 = vmul.f32 %v1150_v13, %v1144_v52  ;;  %1151 = vpow2.f32 %v755_v12  ;;  %814 = vadd.xlane.f32.xlu0 %v813_v14 }
 0x229   : > { %v648_v16 = vpack.c.bf16 %v647_v15, %v647_v15 }
 0x22a   : > { %v708_v19 = vpop.permute.xlu2 %707 }
 0x22b   : > { %1073 = vmatmul.msk.bf16.vlgmr.msrb.gmra.mxu0 %vm617_vm1, %v648_v16  ;;  %v713_v20 = vsel %vm652_vm4, %v708_v19, 0  ;;  %v1141_v19 = vld [vmem:[#allocation2] ss:$0 sm:$0xff] }
 0x22c   : > { %722 = vmatpush.bf16.msrb.mxu2 %v713_v20 }
 0x22d   : > { %v1152_v17 = vpop.eup %1151 }
 0x22e   : > { %v757_v18 = vsel %vm617_vm1, %v1152_v17, 0.0 }
 0x22f   : > { %758 = vadd.xlane.f32.xlu1 %v757_v18 }
 0x23b   : > { %819 = vrot.lane.b32.xlu0 %v616_v60, %s1243_s30 }
 0x248   : > { %763 = vrot.lane.b32.xlu1 %v616_v60, %s1241_s27 }
 0x28a   : > { %v702_v21 = vpop.xlane.xlu0 %701 }
 0x28b   : > { %1153 = vrcp.f32 %v702_v21  ;;  %v1142_v21 = vld [vmem:[#allocation4] ss:$0 sm:$0xff] }
 0x291   : > { %v1154_v22 = vpop.eup %1153 }
 0x292   : > { %v704_v23 = vmul.f32 %v1154_v22, %v1146_v2 }
 0x294   : > { %v705_v24 = vpack.c.bf16 %v704_v23, %v704_v23 }
 0x296   : > { %1075 = vmatmul.msk.bf16.vlgmr.msrb.gmra.mxu2 %vm617_vm1, %v705_v24 }
 0x29a   : > { %v815_v25 = vpop.xlane.xlu0 %814 }
 0x29b   : > { %1155 = vrcp.f32 %v815_v25 }
 0x2a1   : > { %v1156_v27 = vpop.eup %1155 }
 0x2a2   : > { %v817_v28 = vmul.f32 %v1156_v27, %v1148_v11  ;;  %v759_v29 = vpop.xlane.xlu1 %758 }
 0x2a3   : > { %1157 = vrcp.f32 %v759_v29 }
 0x2a4   : > { %v818_v32 = vpack.c.bf16 %v817_v28, %v817_v28  ;;  %1159 = vrcp.f32 %v1249_v62 }
 0x2a8   : > { %v665_v26 = vpop.f32.mrf.mxu0 }
 0x2a9   : > { %v1158_v34 = vpop.eup %1157 }
 0x2aa   : > { %v761_v35 = vmul.f32 %v1158_v34, %v1152_v17  ;;  %v1160_v63 = vpop.eup %1159 }
 0x2ab   : > { %v899_v0 = vmul.f32 32.0, %v1160_v63  ;;  %vm903_vm7 = vweird.f32 %v1160_v63 }
 0x2ac   : > { %v762_v38 = vpack.c.bf16 %v761_v35, %v761_v35 }
 0x2ad   : > { %v820_v30 = vpop.permute.xlu0 %819  ;;  %v900_v1 = vsub.f32 1.0, %v899_v0 }
 0x2ae   : > { %v825_v31 = vsel %vm652_vm4, %v820_v30, 0 }
 0x2af   : > { %834 = vmatpush.bf16.msra.mxu2 %v825_v31  ;;  %v901_v2 = vmul.f32 %v1160_v63, %v900_v1 }
 0x2b0   : > { %v667_v33 = vpop.f32.mrf.mxu0 }
 0x2b1   : > { %v902_v3 = vadd.f32 %v1160_v63, %v901_v2 }
 0x2b2   : > { %1079 = vmatmul.msk.bf16.vlgmr.msra.gmra.mxu2 %vm617_vm1, %v818_v32 }
 0x2b3   : > { %v904_v5 = vsel %vm903_vm7, %v1160_v63, %v902_v3 }
 0x2ba   : > { %v764_v36 = vpop.permute.xlu1 %763 }
 0x2bb   : > { %v769_v37 = vsel %vm652_vm4, %v764_v36, 0 }
 0x2bc   : > { %778 = vmatpush.bf16.msra.mxu0 %v769_v37 }
 0x2bf   : > { %1077 = vmatmul.msk.bf16.vlgmr.msra.gmra.mxu0 %vm617_vm1, %v762_v38 }
 0x319   : > { %v724_v39 = vpop.f32.mrf.mxu2 }
 0x31a   : > { %841 = vrot.lane.b32.xlu2 %v724_v39, %s1246_s23 }
 0x321   : > { %v726_v40 = vpop.f32.mrf.mxu2 }
 0x335   : > { %v836_v41 = vpop.f32.mrf.mxu2 }
 0x336   : > { %849 = vrot.lane.b32.xlu2 %v836_v41, %s1247_s24 }
 0x33c   : > { %v780_v42 = vpop.f32.mrf.mxu0 }
 0x33d   : > { %v838_v43 = vpop.f32.mrf.mxu2  ;;  %845 = vrot.lane.b32.xlu0 %v780_v42, %s1248_s26 }
 0x344   : > { %v782_v44 = vpop.f32.mrf.mxu0 }
 0x374   : > { %v842_v47 = vpop.permute.xlu2 %841 }
 0x375   : > { %v852_v48 = vsel %vm617_vm1, %v665_v26, %v842_v47 }
 0x390   : > { %v850_v50 = vpop.permute.xlu2 %849 }
 0x3af   : > { %v846_v49 = vpop.permute.xlu0 %845 }
 0x3b0   : > { %v854_v51 = vsel %vm853_vm5, %v852_v48, %v846_v49 }
 0x3b1   : > { %v856_v52 = vsel %vm855_vm6, %v854_v51, %v850_v50 }
 0x3b2   : > { %v857_v53 = vpack.c.bf16 %v856_v52, %v856_v52 }
 0x3b4   : > { %1088 = vmatmul.msk.bf16.vlgmr.msra.gmra.mxu3 %vm522_vm0, %v857_v53 }
 0x437   : > { %v890_v55 = vpop.f32.mrf.mxu3 }
 0x438   : > { %v891_v56 = vadd.f32 %v1140_v54, %v890_v55 }
 0x43a   : > { %v894_v57 = vadd.f32 %v891_v56, %v1372_v4 }
 0x43c   : > { %v895_v58 = vsel %vm522_vm0, %v894_v57, 0.0  ;;  %v906_v59 = vmul.f32 %v894_v57, %v894_v57 }
 0x43d   : > { %896 = vadd.xlane.f32.xlu1 %v895_v58 }
 0x43e   : > { %v907_v60 = vsel %vm522_vm0, %v906_v59, 0.0 }
 0x43f   : > { %v892_v61 = vpop.f32.mrf.mxu3  ;;  %908 = vadd.xlane.f32.xlu0 %v907_v60 }
 0x4b0   : > { %v897_v6 = vpop.xlane.xlu1 %896 }
 0x4b1   : > { %v905_v7 = vmul.f32 %v904_v5, %v897_v6 }
 0x4b2   : > { %v909_v4 = vpop.xlane.xlu0 %908 }
 0x4b3   : > { %v911_v8 = vmul.f32 %v905_v7, %v905_v7  ;;  %v910_v9 = vmul.f32 %v909_v4, %v904_v5  ;;  %v913_v18 = vsub.f32 %v894_v57, %v905_v7 }
 0x4b5   : > { %v912_v10 = vsub.f32 %v910_v9, %v911_v8 }
 0x4b7   : > { %v914_v11 = vadd.f32 1e-05, %v912_v10 }
 0x4b9   : > { %1161 = vrsqrt.f32 %v914_v11  ;;  %vm921_vm9 = vweird.f32 %v914_v11 }
 0x4bf   : > { %v1162_v12 = vpop.eup %1161 }
 0x4c0   : > { %v916_v13 = vmul.f32 %v1162_v12, %v914_v11  ;;  %vm922_vm8 = vweird.f32 %v1162_v12 }
 0x4c1   : > { %vm923_vm10 = vmor %vm921_vm9, %vm922_vm8 }
 0x4c2   : > { %v917_v14 = vmul.f32 %v1162_v12, %v916_v13 }
 0x4c4   : > { %v918_v15 = vmul.f32 0.5, %v917_v14 }
 0x4c6   : > { %v919_v16 = vsub.f32 1.5, %v918_v15 }
 0x4c8   : > { %v920_v17 = vmul.f32 %v1162_v12, %v919_v16 }
 0x4ca   : > { %v924_v20 = vsel %vm923_vm10, %v1162_v12, %v920_v17 }
 0x4cb   : > { %v925_v22 = vmul.f32 %v924_v20, %v913_v18 }
 0x4cd   : > { %v930_v23 = vmul.f32 %v1141_v19, %v925_v22 }
 0x4cf   : > { %v935_v24 = vadd.f32 %v1142_v21, %v930_v23 }
 0x4d1   : > { %936 = vst.msk [vmem:[%s496_s18] sm:$0xff] %vm522_vm0, %v935_v24 }
 0x4d2 PF: > { %s25_s25 = sadd.s32 1, %s1237_s25  }
 0x4d3   : > { %p22_p7 = scmp.ge.s32.totalorder %s25_s25, 4  }
 0x4d5   :  { %24 = sbr.rel (!%p22_p7) target bundleno = 2 (0x2), region = 117 }
 0x4da   :  { %956 = vsyncpa [#allocation3], 1 }
 0x4db   :  { %958 = vsyncpa [#allocation3 + $0x1], 1 }
 0x4dc   :  { %959 = vsyncpa [#allocation5], 1 }

// kernel: transformer_forward.11
= control target key start
LH: loop header
LB: loop body
LE: loop exit
PB: predicated region body
PF: predicated region fallthrough
CT: control target
= control target key end

     0   :  { %s1173_s25 = smov 0   ;;  %s1293_s0 = inlined_call_operand.vmem [shape: f32[2,8,32], index: 0, kind: input, shape index: {}, may-alias: {0,1}]   ;;  %s1294_s1 = inlined_call_operand.vmem [shape: f32[2,8,32], index: 1, kind: input, shape index: {}, may-alias: {0,1}]   ;;  %s1295_s2 = inlined_call_operand.vmem [shape: f32[2,1,8], index: 2, kind: input, shape index: {}]   ;;  %s1296_s3 = inlined_call_operand.vmem [shape: bf16[32,32], index: 3, kind: input, shape index: {}]   ;;  %s1297_s4 = inlined_call_operand.vmem [shape: bf16[32,32], index: 4, kind: input, shape index: {}]   ;;  %s1298_s5 = inlined_call_operand.vmem [shape: bf16[32,32], index: 5, kind: input, shape index: {}]   ;;  %s1299_s6 = inlined_call_operand.vmem [shape: bf16[32,32], index: 6, kind: input, shape index: {}]   ;;  %s1300_s7 = inlined_call_operand.vmem [shape: f32[1,32], index: 7, kind: input, shape index: {}]   ;;  %s1301_s8 = inlined_call_operand.vmem [shape: f32[1,32], index: 8, kind: input, shape index: {}]   ;;  %s1302_s9 = inlined_call_operand.vmem [shape: f32[1,32], index: 9, kind: input, shape index: {}]   ;;  %s1303_s10 = inlined_call_operand.vmem [shape: f32[1,32], index: 10, kind: input, shape index: {}]   ;;  %s1304_s11 = inlined_call_operand.vmem [shape: f32[1,32], index: 11, kind: input, shape index: {}]   ;;  %s1305_s12 = inlined_call_operand.vmem [shape: f32[1,32], index: 12, kind: input, shape index: {}]   ;;  %s1306_s13 = inlined_call_operand.vmem [shape: f32[2,8,32], index: 13, kind: output, shape index: {}]  }
   0x1 LB: > { %s981_s26 = sadd.s32 4294967295, %s1092_s25   ;;  %p985_p0 = scmp.ge.s32.totalorder %s1092_s25, 1  ;;  %s1092_s25 = sphi %s1173_s25, %s23_s25  }
   0x2   : > { %p403_p1 = scmp.lt.s32.totalorder %s1092_s25, 3 }
   0x4   : > { %p404_p2 = pnand %p985_p0, %p403_p1 }
   0x5   : > { %p452_p3 = scmp.lt.s32.totalorder (!%p404_p2), %s981_s26, 1  ;;  %s1094_s14 = smov (!%p404_p2), 112  }
   0x6   : > { %407 = sbr.rel (%p404_p2) target bundleno = 1229 (0x4cd), region = 72  ;;  %s1095_s15 = smov (!%p404_p2), 120  }
   0x7   : > { %s1096_s16 = smov (!%p404_p2), 104   ;;  %s1099_s28 = smov (!%p404_p2), 8  }
   0x8   : > { %s1100_s29 = smov (!%p404_p2), 24   ;;  %s1101_s30 = smov (!%p404_p2), 16  }
   0xb   : > { %v1036_v0 = vld [vmem:[%s1296_s3 + $0x8] sm:$0xff]  ;;  %v1035_v2 = vld [vmem:[%s1296_s3] sm:$0xff]  ;;  %s1308_s26 = smov (!%p452_p3, %s981_s26), 1  ;;  %vm492_vm0 = vcmask 261120   ;;  %vm587_vm1 = vcmask 64512   ;;  %v1097_v28 = vmov 0  }
   0xc   : > { %v1038_v1 = vld [vmem:[%s1297_s4 + $0x8] sm:$0xff]  ;;  %502 = vmatpush.bf16.msra.mxu0 %v1036_v0  ;;  %v1037_v3 = vld [vmem:[%s1297_s4] sm:$0xff]  ;;  %s1196_s18 = sshll.u32 %s1308_s26, 3  ;;  %s462_s20 = scalar_lea.vmem %s1295_s2, %s1308_s26  ;;  %v1098_v32 = vmov 0.0   ;;  %vm622_vm4 = vcmask 1043456   ;;  %vm823_vm5 = vcmask 130048  }
   0xd   : > { %538 = vmatpush.bf16.msra.mxu1 %v1038_v1  ;;  %s455_s21 = scalar_lea.vmem %s1293_s0, %s1196_s18  ;;  %s459_s24 = scalar_lea.vmem %s1294_s1, %s1196_s18  ;;  %v1060_v8 = vld [vmem:[%s1300_s7] ss:$0 sm:$0xff]  ;;  %v1040_v38 = vld [vmem:[%s1298_s5 + $0x8] sm:$0xff]  ;;  %vm825_vm6 = vcmask 195584  }
   0xe   : > { %v1202_v4 = vld [vmem:[%s455_s21] sm:$0xff]  ;;  %571 = vmatpush.bf16.msra.mxu2 %v1040_v38 }
   0xf   : > { %v470_v5 = vpack.c.bf16 %v1202_v4, %v1202_v4  ;;  %v469_v6 = vld [vmem:[%s459_s24] sm:$0xff] }
  0x10   : > { %503 = vmatpush.bf16.msra.mxu0 %v1035_v2  ;;  %v471_v7 = vpack.c.bf16 %v469_v6, %v469_v6  ;;  %v1061_v9 = vld [vmem:[%s1301_s8] ss:$0 sm:$0xff] }
  0x11   : > { %539 = vmatpush.bf16.msra.mxu1 %v1037_v3  ;;  %v578_v26 = vld [vmem:[%s462_s20] sm:$0x1] }
  0x12   : > { %vm579_vm2 = vcmp.gt.f32.partialorder %v578_v26, 0.0  ;;  %v1039_v39 = vld [vmem:[%s1298_s5] sm:$0xff] }
  0x13   : > { %997 = vmatmul.msk.bf16.vlgmr.msra.gmra.mxu0 %vm492_vm0, %v470_v5  ;;  %v580_v29 = vsel %vm579_vm2, 1, %v1097_v28  ;;  %572 = vmatpush.bf16.msra.mxu2 %v1039_v39  ;;  %v1062_v57 = vld [vmem:[%s1302_s9] ss:$0 sm:$0xff] }
  0x14   : > { %1006 = vmatmul.msk.bf16.vlgmr.msra.gmra.mxu1 %vm492_vm0, %v471_v7  ;;  %v581_v30 = vperm.slane %v580_v29, 0 }
  0x16   : > { %vm582_vm3 = vcmp.eq.s32.totalorder %v581_v30, 1  ;;  %1015 = vmatmul.msk.bf16.vlgmr.msra.gmra.mxu2 %vm492_vm0, %v471_v7 }
  0x17   : > { %v583_v33 = vsel %vm582_vm3, -1e+09, %v1098_v32 }
  0x90   : > { %v505_v10 = vpop.f32.mrf.mxu0 }
  0x91   : > { %v506_v11 = vadd.f32 %v1060_v8, %v505_v10  ;;  %v541_v12 = vpop.f32.mrf.mxu1 }
  0x92   : > { %v542_v13 = vadd.f32 %v1061_v9, %v541_v12 }
  0x93   : > { %v584_v14 = vpack.c.bf16 %v506_v11, %v506_v11 }
  0x94   : > { %v585_v15 = vpack.c.bf16 %v542_v13, %v542_v13 }
  0x95   : > { %698 = vrot.lane.b32.xlu2 %v584_v14, %s1094_s14 }
  0x96   : > { %700 = vrot.lane.b32.xlu1 %v585_v15, %s1094_s14  ;;  %643 = vrot.lane.b32.xlu0 %v585_v15, %s1095_s15  ;;  %v592_v16 = vsel %vm587_vm1, %v585_v15, 0 }
  0x97   : > { %601 = vmatpush.bf16.xpose.msra.mxu3 %v592_v16 }
  0x98   : > { %v507_v17 = vpop.f32.mrf.mxu0 }
  0x99   : > { %v543_v18 = vpop.f32.mrf.mxu1  ;;  %v574_v58 = vpop.f32.mrf.mxu2 }
  0x9a   : > { %v575_v59 = vadd.f32 %v1062_v57, %v574_v58 }
  0x9c   : > { %v586_v60 = vpack.c.bf16 %v575_v59, %v575_v59 }
  0x9d   : > { %754 = vrot.lane.b32.xlu2 %v584_v14, %s1096_s16 }
  0x9e   : > { %756 = vrot.lane.b32.xlu1 %v585_v15, %s1096_s16  ;;  %640 = vrot.lane.b32.xlu0 %v584_v14, %s1095_s15  ;;  %v624_v61 = vsel %vm622_vm4, %v586_v60, 0 }
  0x9f   : > { %1016 = vmatmul.msk.bf16.vlgmr.msra.gmra.mxu3 %vm587_vm1, %v584_v14  ;;  %633 = vmatpush.bf16.msrb.mxu0 %v624_v61 }
  0xa1   : > { %v576_v63 = vpop.f32.mrf.mxu2 }
  0xef   : > { %v699_v23 = vpop.permute.xlu2 %698 }
  0xf7   : > { %v755_v31 = vpop.permute.xlu2 %754 }
 0x108   : > { %v701_v19 = vpop.permute.xlu1 %700  ;;  %v644_v20 = vpop.permute.xlu0 %643 }
 0x109   : > { %v649_v21 = vsel %vm587_vm1, %v644_v20, 0  ;;  %v706_v22 = vsel %vm587_vm1, %v701_v19, 0 }
 0x10a   : > { %658 = vmatpush.bf16.xpose.msrb.mxu1 %v649_v21  ;;  %715 = vmatpush.bf16.xpose.msrb.mxu3 %v706_v22 }
 0x110   : > { %v757_v24 = vpop.permute.xlu1 %756  ;;  %v641_v25 = vpop.permute.xlu0 %640 }
 0x111   : > { %v762_v27 = vsel %vm587_vm1, %v757_v24, 0  ;;  %1018 = vmatmul.msk.bf16.vlgmr.msrb.gmra.mxu1 %vm587_vm1, %v641_v25  ;;  %1020 = vmatmul.msk.bf16.vlgmr.msrb.gmra.mxu3 %vm587_vm1, %v699_v23 }
 0x112   : > { %771 = vmatpush.bf16.xpose.msra.mxu1 %v762_v27 }
 0x121   : > { %1022 = vmatmul.msk.bf16.vlgmr.msra.gmra.mxu1 %vm587_vm1, %v755_v31 }
 0x122   : > { %v603_v34 = vpop.f32.mrf.mxu3 }
 0x123   : > { %v604_v35 = vadd.f32 %v603_v34, %v583_v33 }
 0x125   : > { %v607_v36 = vsel %vm587_vm1, %v604_v35, -inf }
 0x126   : > { %608 = vmax.xlane.f32.xlu1 %v607_v36 }
 0x12a   : > { %v605_v37 = vpop.f32.mrf.mxu3 }
 0x18e   : > { %v660_v40 = vpop.f32.mrf.mxu1 }
 0x18f   : > { %v661_v41 = vadd.f32 %v660_v40, %v583_v33 }
 0x191   : > { %v664_v42 = vsel %vm587_vm1, %v661_v41, -inf }
 0x192   : > { %665 = vmax.xlane.f32.xlu0 %v664_v42 }
 0x194   : > { %v717_v43 = vpop.f32.mrf.mxu3 }
 0x195   : > { %v718_v53 = vadd.f32 %v717_v43, %v583_v33 }
 0x196   : > { %v662_v44 = vpop.f32.mrf.mxu1 }
 0x197   : > { %v721_v56 = vsel %vm587_vm1, %v718_v53, -inf }
 0x199   : > { %v609_v45 = vpop.xlane.xlu1 %608 }
 0x19a   : > { %v610_v46 = vsub.f32 %v604_v35, %v609_v45  ;;  %v1042_v45 = vld [vmem:[%s1299_s6 + $0x8] sm:$0xff] }
 0x19b   : > { %857 = vmatpush.bf16.msra.mxu3 %v1042_v45 }
 0x19c   : > { %v611_v47 = vmul.f32 1.442695, %v610_v46  ;;  %v719_v48 = vpop.f32.mrf.mxu3  ;;  %v1041_v46 = vld [vmem:[%s1299_s6] sm:$0xff] }
 0x19e   : > { %1066 = vpow2.f32 %v611_v47  ;;  %v773_v49 = vpop.f32.mrf.mxu1 }
 0x19f   : > { %v774_v50 = vadd.f32 %v773_v49, %v583_v33  ;;  %858 = vmatpush.bf16.msra.mxu3 %v1041_v46 }
 0x1a1   : > { %v777_v51 = vsel %vm587_vm1, %v774_v50, -inf }
 0x1a2   : > { %778 = vmax.xlane.f32.xlu2 %v777_v51 }
 0x1a4   : > { %v1067_v52 = vpop.eup %1066 }
 0x1a5   : > { %v613_v54 = vsel %vm587_vm1, %v1067_v52, 0.0 }
 0x1a6   : > { %614 = vadd.xlane.f32.xlu1 %v613_v54  ;;  %v775_v55 = vpop.f32.mrf.mxu1  ;;  %v1063_v54 = vld [vmem:[%s1303_s10] ss:$0 sm:$0xff] }
 0x1aa   : > { %722 = vmax.xlane.f32.xlu2 %v721_v56 }
 0x1c2   : > { %677 = vrot.lane.b32.xlu2 %v586_v60, %s1095_s15 }
 0x205   : > { %v666_v62 = vpop.xlane.xlu0 %665 }
 0x206   : > { %v667_v0 = vsub.f32 %v661_v41, %v666_v62  ;;  %v1102_v62 = vmov 32.0  }
 0x208   : > { %v668_v1 = vmul.f32 1.442695, %v667_v0 }
 0x20a   : > { %1068 = vpow2.f32 %v668_v1 }
 0x210   : > { %v1069_v2 = vpop.eup %1068 }
 0x211   : > { %v670_v3 = vsel %vm587_vm1, %v1069_v2, 0.0 }
 0x212   : > { %671 = vadd.xlane.f32.xlu0 %v670_v3 }
 0x215   : > { %v779_v5 = vpop.xlane.xlu2 %778 }
 0x216   : > { %v780_v6 = vsub.f32 %v774_v50, %v779_v5 }
 0x218   : > { %v781_v7 = vmul.f32 1.442695, %v780_v6 }
 0x219   : > { %v615_v8 = vpop.xlane.xlu1 %614 }
 0x21a   : > { %1070 = vpow2.f32 %v781_v7 }
 0x21b   : > { %1072 = vrcp.f32 %v615_v8 }
 0x21d   : > { %v723_v9 = vpop.xlane.xlu2 %722 }
 0x21e   : > { %v724_v10 = vsub.f32 %v718_v53, %v723_v9 }
 0x220   : > { %v1071_v11 = vpop.eup %1070  ;;  %v725_v12 = vmul.f32 1.442695, %v724_v10 }
 0x221   : > { %v1073_v13 = vpop.eup %1072  ;;  %v783_v14 = vsel %vm587_vm1, %v1071_v11, 0.0 }
 0x222   : > { %v617_v15 = vmul.f32 %v1073_v13, %v1067_v52  ;;  %1074 = vpow2.f32 %v725_v12  ;;  %784 = vadd.xlane.f32.xlu0 %v783_v14 }
 0x224   : > { %v618_v16 = vpack.c.bf16 %v617_v15, %v617_v15 }
 0x225   : > { %v678_v19 = vpop.permute.xlu2 %677 }
 0x226   : > { %1017 = vmatmul.msk.bf16.vlgmr.msrb.gmra.mxu0 %vm587_vm1, %v618_v16  ;;  %v683_v20 = vsel %vm622_vm4, %v678_v19, 0  ;;  %v1064_v19 = vld [vmem:[%s1304_s11] ss:$0 sm:$0xff] }
 0x227   : > { %692 = vmatpush.bf16.msrb.mxu2 %v683_v20 }
 0x228   : > { %v1075_v17 = vpop.eup %1074 }
 0x229   : > { %v727_v18 = vsel %vm587_vm1, %v1075_v17, 0.0 }
 0x22a   : > { %728 = vadd.xlane.f32.xlu1 %v727_v18 }
 0x236   : > { %789 = vrot.lane.b32.xlu0 %v586_v60, %s1096_s16 }
 0x243   : > { %733 = vrot.lane.b32.xlu1 %v586_v60, %s1094_s14 }
 0x285   : > { %v672_v21 = vpop.xlane.xlu0 %671 }
 0x286   : > { %1076 = vrcp.f32 %v672_v21  ;;  %v1065_v21 = vld [vmem:[%s1305_s12] ss:$0 sm:$0xff] }
 0x28c   : > { %v1077_v22 = vpop.eup %1076 }
 0x28d   : > { %v674_v23 = vmul.f32 %v1077_v22, %v1069_v2 }
 0x28f   : > { %v675_v24 = vpack.c.bf16 %v674_v23, %v674_v23 }
 0x291   : > { %1019 = vmatmul.msk.bf16.vlgmr.msrb.gmra.mxu2 %vm587_vm1, %v675_v24 }
 0x295   : > { %v785_v25 = vpop.xlane.xlu0 %784 }
 0x296   : > { %1078 = vrcp.f32 %v785_v25 }
 0x29c   : > { %v1079_v27 = vpop.eup %1078 }
 0x29d   : > { %v787_v28 = vmul.f32 %v1079_v27, %v1071_v11  ;;  %v729_v29 = vpop.xlane.xlu1 %728 }
 0x29e   : > { %1080 = vrcp.f32 %v729_v29 }
 0x29f   : > { %v788_v32 = vpack.c.bf16 %v787_v28, %v787_v28  ;;  %1082 = vrcp.f32 %v1102_v62 }
 0x2a3   : > { %v635_v26 = vpop.f32.mrf.mxu0 }
 0x2a4   : > { %v1081_v34 = vpop.eup %1080 }
 0x2a5   : > { %v731_v35 = vmul.f32 %v1081_v34, %v1075_v17  ;;  %v1083_v63 = vpop.eup %1082 }
 0x2a6   : > { %v869_v0 = vmul.f32 32.0, %v1083_v63  ;;  %vm873_vm7 = vweird.f32 %v1083_v63 }
 0x2a7   : > { %v732_v38 = vpack.c.bf16 %v731_v35, %v731_v35 }
 0x2a8   : > { %v790_v30 = vpop.permute.xlu0 %789  ;;  %v870_v1 = vsub.f32 1.0, %v869_v0 }
 0x2a9   : > { %v795_v31 = vsel %vm622_vm4, %v790_v30, 0 }
 0x2aa   : > { %804 = vmatpush.bf16.msra.mxu2 %v795_v31  ;;  %v871_v2 = vmul.f32 %v1083_v63, %v870_v1 }
 0x2ab   : > { %v637_v33 = vpop.f32.mrf.mxu0 }
 0x2ac   : > { %v872_v3 = vadd.f32 %v1083_v63, %v871_v2 }
 0x2ad   : > { %1023 = vmatmul.msk.bf16.vlgmr.msra.gmra.mxu2 %vm587_vm1, %v788_v32 }
 0x2ae   : > { %v874_v5 = vsel %vm873_vm7, %v1083_v63, %v872_v3 }
 0x2b5   : > { %v734_v36 = vpop.permute.xlu1 %733 }
 0x2b6   : > { %v739_v37 = vsel %vm622_vm4, %v734_v36, 0 }
 0x2b7   : > { %748 = vmatpush.bf16.msra.mxu0 %v739_v37 }
 0x2ba   : > { %1021 = vmatmul.msk.bf16.vlgmr.msra.gmra.mxu0 %vm587_vm1, %v732_v38 }
 0x314   : > { %v694_v39 = vpop.f32.mrf.mxu2 }
 0x315   : > { %811 = vrot.lane.b32.xlu2 %v694_v39, %s1099_s28  ;;  %s466_s28 = scalar_lea.vmem %s1306_s13, %s1196_s18 }
 0x31c   : > { %v696_v40 = vpop.f32.mrf.mxu2 }
 0x330   : > { %v806_v41 = vpop.f32.mrf.mxu2 }
 0x331   : > { %819 = vrot.lane.b32.xlu2 %v806_v41, %s1100_s29 }
 0x337   : > { %v750_v42 = vpop.f32.mrf.mxu0 }
 0x338   : > { %v808_v43 = vpop.f32.mrf.mxu2  ;;  %815 = vrot.lane.b32.xlu0 %v750_v42, %s1101_s30 }
 0x33f   : > { %v752_v44 = vpop.f32.mrf.mxu0 }
 0x36f   : > { %v812_v47 = vpop.permute.xlu2 %811 }
 0x370   : > { %v822_v48 = vsel %vm587_vm1, %v635_v26, %v812_v47 }
 0x38b   : > { %v820_v50 = vpop.permute.xlu2 %819 }
 0x3aa   : > { %v816_v49 = vpop.permute.xlu0 %815 }
 0x3ab   : > { %v824_v51 = vsel %vm823_vm5, %v822_v48, %v816_v49 }
 0x3ac   : > { %v826_v52 = vsel %vm825_vm6, %v824_v51, %v820_v50 }
 0x3ad   : > { %v827_v53 = vpack.c.bf16 %v826_v52, %v826_v52 }
 0x3af   : > { %1032 = vmatmul.msk.bf16.vlgmr.msra.gmra.mxu3 %vm492_vm0, %v827_v53 }
 0x432   : > { %v860_v55 = vpop.f32.mrf.mxu3 }
 0x433   : > { %v861_v56 = vadd.f32 %v1063_v54, %v860_v55 }
 0x435   : > { %v864_v57 = vadd.f32 %v861_v56, %v1202_v4 }
 0x437   : > { %v865_v58 = vsel %vm492_vm0, %v864_v57, 0.0  ;;  %v876_v59 = vmul.f32 %v864_v57, %v864_v57 }
 0x438   : > { %866 = vadd.xlane.f32.xlu1 %v865_v58 }
 0x439   : > { %v877_v60 = vsel %vm492_vm0, %v876_v59, 0.0 }
 0x43a   : > { %v862_v61 = vpop.f32.mrf.mxu3  ;;  %878 = vadd.xlane.f32.xlu0 %v877_v60 }
 0x4ab   : > { %v867_v6 = vpop.xlane.xlu1 %866 }
 0x4ac   : > { %v875_v7 = vmul.f32 %v874_v5, %v867_v6 }
 0x4ad   : > { %v879_v4 = vpop.xlane.xlu0 %878 }
 0x4ae   : > { %v881_v8 = vmul.f32 %v875_v7, %v875_v7  ;;  %v880_v9 = vmul.f32 %v879_v4, %v874_v5  ;;  %v883_v18 = vsub.f32 %v864_v57, %v875_v7 }
 0x4b0   : > { %v882_v10 = vsub.f32 %v880_v9, %v881_v8 }
 0x4b2   : > { %v884_v11 = vadd.f32 1e-05, %v882_v10 }
 0x4b4   : > { %1084 = vrsqrt.f32 %v884_v11  ;;  %vm891_vm9 = vweird.f32 %v884_v11 }
 0x4ba   : > { %v1085_v12 = vpop.eup %1084 }
 0x4bb   : > { %v886_v13 = vmul.f32 %v1085_v12, %v884_v11  ;;  %vm892_vm8 = vweird.f32 %v1085_v12 }
 0x4bc   : > { %vm893_vm10 = vmor %vm891_vm9, %vm892_vm8 }
 0x4bd   : > { %v887_v14 = vmul.f32 %v1085_v12, %v886_v13 }
 0x4bf   : > { %v888_v15 = vmul.f32 0.5, %v887_v14 }
 0x4c1   : > { %v889_v16 = vsub.f32 1.5, %v888_v15 }
 0x4c3   : > { %v890_v17 = vmul.f32 %v1085_v12, %v889_v16 }
 0x4c5   : > { %v894_v20 = vsel %vm893_vm10, %v1085_v12, %v890_v17 }
 0x4c6   : > { %v895_v22 = vmul.f32 %v894_v20, %v883_v18 }
 0x4c8   : > { %v900_v23 = vmul.f32 %v1064_v19, %v895_v22 }
 0x4ca   : > { %v905_v24 = vadd.f32 %v1065_v21, %v900_v23 }
 0x4cc   : > { %906 = vst.msk [vmem:[%s466_s28] sm:$0xff] %vm492_vm0, %v905_v24 }
 0x4cd PF: > { %s23_s25 = sadd.s32 1, %s1092_s25  }
 0x4ce   : > { %p20_p4 = scmp.ge.s32.totalorder %s23_s25, 4  }
 0x4d0   :  { %22 = sbr.rel (!%p20_p4) target bundleno = 1 (0x1), region = 108 }

// kernel: transformer_forward.15
= control target key start
LH: loop header
LB: loop body
LE: loop exit
PB: predicated region body
PF: predicated region fallthrough
CT: control target
= control target key end

     0   :  { %18 = vsyncpa [#allocation3], 0  ;;  %s1529_s0 = inlined_call_operand.vmem [shape: f32[2,8,32], index: 0, kind: input, shape index: {}, may-alias: {0,1}]   ;;  %s1530_s1 = inlined_call_operand.vmem [shape: f32[2,8,32], index: 1, kind: input, shape index: {}, may-alias: {0,1}]   ;;  %s1531_s2 = inlined_call_operand.vmem [shape: f32[2,1,8], index: 2, kind: input, shape index: {}]   ;;  %s1532_s3 = inlined_call_operand.vmem [shape: bf16[32,32], index: 3, kind: input, shape index: {}]   ;;  %s1533_s4 = inlined_call_operand.vmem [shape: bf16[32,32], index: 4, kind: input, shape index: {}]   ;;  %s1534_s5 = inlined_call_operand.vmem [shape: bf16[32,32], index: 5, kind: input, shape index: {}]   ;;  %s1535_s6 = inlined_call_operand.vmem [shape: bf16[32,32], index: 6, kind: input, shape index: {}]   ;;  %s1536_s7 = inlined_call_operand.vmem [shape: f32[1,32], index: 7, kind: input, shape index: {}]   ;;  %s1537_s8 = inlined_call_operand.vmem [shape: f32[1,32], index: 8, kind: input, shape index: {}]   ;;  %s1538_s9 = inlined_call_operand.vmem [shape: f32[1,32], index: 9, kind: input, shape index: {}]   ;;  %s1539_s10 = inlined_call_operand.hbm [shape: f32[1,32], index: 10, kind: input, shape index: {}]   ;;  %s1540_s11 = inlined_call_operand.hbm [shape: f32[1,32], index: 11, kind: input, shape index: {}]   ;;  %s1541_s12 = inlined_call_operand.hbm [shape: f32[1,32], index: 12, kind: input, shape index: {}]   ;;  %s1542_s13 = inlined_call_operand.vmem [shape: f32[2,8,32], index: 13, kind: output, shape index: {}]  }
   0x1   :  { %19 = vsyncpa [#allocation5], 0  ;;  %s1392_s25 = smov 0  }
   0x2 LB: > { %s389_s28 = sshll.u32 %s1540_s11, 4  ;;  %s1062_s29 = sadd.s32 4294967295, %s1308_s25   ;;  %s1308_s25 = sphi %s1392_s25, %s25_s25   ;;  %s390_s28 = int_to_ptr.hbm [resolvable:$true] %s389_s28 }
   0x3   : > { %p1064_p0 = scmp.ge.s32.totalorder %s1308_s25, 1  ;;  %p344_p1 = scmp.lt.s32.totalorder %s1308_s25, 3 }
   0x4   : > { %p1152_p2 = scmp.eq.s32.totalorder %s1062_s29, 0  ;;  %s1310_s14 = smov [#allocation4]  }
   0x5   : > { %p1403_p3 = pnand %p1064_p0, %p344_p1  ;;  %s391_s15 = sshll.u32 %s1310_s14, 4  ;;  %s392_s15 = int_to_ptr.vmem [resolvable:$true] %s391_s15 }
   0x6   : > { %s377_s18 = sshll.u32 %s1539_s10, 4  ;;  %s401_s21 = sshll.u32 %s1541_s12, 4  ;;  %s378_s18 = int_to_ptr.hbm [resolvable:$true] %s377_s18  ;;  %s402_s21 = int_to_ptr.hbm [resolvable:$true] %s401_s21 }
   0x7   : > { %p1142_p4 = pneg %p1403_p3  ;;  %s1311_s22 = smov [#allocation2]  }
   0x8   : > { %s379_s23 = sshll.u32 %s1311_s22, 4  ;;  %s1312_s24 = smov [#allocation6]   ;;  %s380_s23 = int_to_ptr.vmem [resolvable:$true] %s379_s23 }
   0x9   : > { %p1143_p5 = pnand %p1152_p2, %p1142_p4  ;;  %s403_s26 = sshll.u32 %s1312_s24, 4  ;;  %s404_s26 = int_to_ptr.vmem [resolvable:$true] %s403_s26 }
   0xa   : > { %436 = sbr.rel (%p1403_p3) target bundleno = 1236 (0x4d4), region = 72 }
   0xb   : > { %1148 = dma.hbm_to_vmem [thread:$0]  (!%p1143_p5), %s390_s28, 16, %s392_s15, [#allocation5]  }
   0xc   : > { %1145 = dma.hbm_to_vmem [thread:$0]  (!%p1143_p5), %s378_s18, 16, %s380_s23, [#allocation3]  }
   0xd   : > { %1151 = dma.hbm_to_vmem [thread:$0]  (!%p1143_p5), %s402_s21, 16, %s404_s26, [#allocation5]  }
   0xf   : > { %1299 = dma.done.wait (%p1152_p2), [#allocation3], 16  }
  0x10   : > { %1301 = vsyncadd (%p1152_p2), [#allocation3], 4294967280 }
  0x11   : > { %1303 = dma.done.wait (%p1152_p2), [#allocation5], 32  }
  0x12   : > { %1305 = vsyncadd (%p1152_p2), [#allocation5], 4294967264  ;;  %p496_p6 = scmp.lt.s32.totalorder %s1062_s29, 1  ;;  %v1123_v0 = vld [vmem:[%s1532_s3 + $0x8] sm:$0xff]  ;;  %v1122_v2 = vld [vmem:[%s1532_s3] sm:$0xff]  ;;  %vm536_vm0 = vcmask 261120   ;;  %v627_v28 = vlaneseq }
  0x13   : > { %v1125_v1 = vld [vmem:[%s1533_s4 + $0x8] sm:$0xff]  ;;  %v1124_v3 = vld [vmem:[%s1533_s4] sm:$0xff]  ;;  %546 = vmatpush.bf16.msra.mxu0 %v1123_v0  ;;  %vm637_vm1 = vcmask 64512   ;;  %s1313_s16 = smov 112   ;;  %s1315_s18 = smov 104   ;;  %v1316_v29 = vmov 0  }
  0x14   : > { %s1545_s29 = smov (!%p496_p6, %s1062_s29), 1  ;;  %582 = vmatpush.bf16.msra.mxu1 %v1125_v1  ;;  %v1178_v8 = vld [vmem:[%s1536_s7] ss:$0 sm:$0xff]  ;;  %v628_v32 = vshrl.u32 %v627_v28, 7  ;;  %v630_v33 = vand.u32 127, %v627_v28  ;;  %v1317_v35 = vmov 0.0  }
  0x15   : > { %s1425_s27 = sshll.u32 %s1545_s29, 3  ;;  %v1179_v9 = vld [vmem:[%s1537_s8] ss:$0 sm:$0xff]  ;;  %s506_s21 = scalar_lea.vmem %s1531_s2, %s1545_s29  ;;  %v1127_v41 = vld [vmem:[%s1534_s5 + $0x8] sm:$0xff]  ;;  %vm672_vm6 = vcmask 1043456   ;;  %vm873_vm7 = vcmask 130048  }
  0x16   : > { %s499_s30 = scalar_lea.vmem %s1529_s0, %s1425_s27  ;;  %s503_s17 = scalar_lea.vmem %s1530_s1, %s1425_s27  ;;  %v622_v23 = vld [vmem:[%s506_s21] sm:$0x1]  ;;  %vm631_vm4 = vcmp.gt.s32.totalorder %v630_v33, %v628_v32  ;;  %615 = vmatpush.bf16.msra.mxu2 %v1127_v41  ;;  %vm875_vm8 = vcmask 195584  }
  0x17   : > { %v1447_v4 = vld [vmem:[%s499_s30] sm:$0xff]  ;;  %547 = vmatpush.bf16.msra.mxu0 %v1122_v2  ;;  %vm623_vm2 = vcmp.gt.f32.partialorder %v622_v23, 0.0  ;;  %s1318_s14 = smov 8   ;;  %s1319_s30 = smov 24  }
  0x18   : > { %v513_v5 = vld [vmem:[%s503_s17] sm:$0xff]  ;;  %v514_v6 = vpack.c.bf16 %v1447_v4, %v1447_v4  ;;  %583 = vmatpush.bf16.msra.mxu1 %v1124_v3  ;;  %s1314_s17 = smov 120   ;;  %v624_v30 = vsel %vm623_vm2, 1, %v1316_v29  ;;  %s1320_s15 = smov 16  }
  0x19   : > { %v1451_v7 = vpack.c.bf16 %v513_v5, %v513_v5  ;;  %v625_v31 = vperm.slane %v624_v30, 0  ;;  %v1126_v42 = vld [vmem:[%s1534_s5] sm:$0xff]  ;;  %s510_s29 = scalar_lea.vmem %s1542_s13, %s1425_s27 }
  0x1a   : > { %1084 = vmatmul.msk.bf16.vlgmr.msra.gmra.mxu0 %vm536_vm0, %v514_v6  ;;  %616 = vmatpush.bf16.msra.mxu2 %v1126_v42  ;;  %v1180_v60 = vld [vmem:[%s1538_s9] ss:$0 sm:$0xff] }
  0x1b   : > { %1093 = vmatmul.msk.bf16.vlgmr.msra.gmra.mxu1 %vm536_vm0, %v1451_v7  ;;  %vm626_vm3 = vcmp.eq.s32.totalorder %v625_v31, 1 }
  0x1c   : > { %vm632_vm5 = vmor %vm626_vm3, %vm631_vm4 }
  0x1d   : > { %v633_v36 = vsel %vm632_vm5, -1e+09, %v1317_v35  ;;  %1102 = vmatmul.msk.bf16.vlgmr.msra.gmra.mxu2 %vm536_vm0, %v1451_v7 }
  0x97   : > { %v549_v10 = vpop.f32.mrf.mxu0 }
  0x98   : > { %v585_v11 = vpop.f32.mrf.mxu1  ;;  %v550_v12 = vadd.f32 %v1178_v8, %v549_v10 }
  0x99   : > { %v586_v13 = vadd.f32 %v1179_v9, %v585_v11 }
  0x9a   : > { %v634_v14 = vpack.c.bf16 %v550_v12, %v550_v12 }
  0x9b   : > { %v635_v15 = vpack.c.bf16 %v586_v13, %v586_v13 }
  0x9c   : > { %748 = vrot.lane.b32.xlu2 %v634_v14, %s1313_s16 }
  0x9d   : > { %750 = vrot.lane.b32.xlu1 %v635_v15, %s1313_s16  ;;  %693 = vrot.lane.b32.xlu0 %v635_v15, %s1314_s17  ;;  %v642_v16 = vsel %vm637_vm1, %v635_v15, 0 }
  0x9e   : > { %651 = vmatpush.bf16.xpose.msra.mxu3 %v642_v16 }
  0x9f   : > { %v551_v17 = vpop.f32.mrf.mxu0 }
  0xa0   : > { %v587_v18 = vpop.f32.mrf.mxu1  ;;  %v618_v61 = vpop.f32.mrf.mxu2 }
  0xa1   : > { %v619_v62 = vadd.f32 %v1180_v60, %v618_v61 }
  0xa3   : > { %v636_v63 = vpack.c.bf16 %v619_v62, %v619_v62 }
  0xa4   : > { %804 = vrot.lane.b32.xlu2 %v634_v14, %s1315_s18 }
  0xa5   : > { %806 = vrot.lane.b32.xlu1 %v635_v15, %s1315_s18  ;;  %690 = vrot.lane.b32.xlu0 %v634_v14, %s1314_s17  ;;  %v674_v0 = vsel %vm672_vm6, %v636_v63, 0 }
  0xa6   : > { %1103 = vmatmul.msk.bf16.vlgmr.msra.gmra.mxu3 %vm637_vm1, %v634_v14  ;;  %683 = vmatpush.bf16.msrb.mxu0 %v674_v0 }
  0xa8   : > { %v620_v2 = vpop.f32.mrf.mxu2 }
  0xf6   : > { %v749_v24 = vpop.permute.xlu2 %748 }
  0xfe   : > { %v805_v34 = vpop.permute.xlu2 %804 }
 0x10f   : > { %v751_v19 = vpop.permute.xlu1 %750  ;;  %v694_v20 = vpop.permute.xlu0 %693 }
 0x110   : > { %v699_v21 = vsel %vm637_vm1, %v694_v20, 0  ;;  %v756_v22 = vsel %vm637_vm1, %v751_v19, 0 }
 0x111   : > { %708 = vmatpush.bf16.xpose.msrb.mxu1 %v699_v21  ;;  %765 = vmatpush.bf16.xpose.msrb.mxu3 %v756_v22 }
 0x117   : > { %v807_v25 = vpop.permute.xlu1 %806  ;;  %v691_v26 = vpop.permute.xlu0 %690 }
 0x118   : > { %v812_v27 = vsel %vm637_vm1, %v807_v25, 0  ;;  %1105 = vmatmul.msk.bf16.vlgmr.msrb.gmra.mxu1 %vm637_vm1, %v691_v26  ;;  %1107 = vmatmul.msk.bf16.vlgmr.msrb.gmra.mxu3 %vm637_vm1, %v749_v24 }
 0x119   : > { %821 = vmatpush.bf16.xpose.msra.mxu1 %v812_v27 }
 0x128   : > { %1109 = vmatmul.msk.bf16.vlgmr.msra.gmra.mxu1 %vm637_vm1, %v805_v34 }
 0x129   : > { %v653_v37 = vpop.f32.mrf.mxu3 }
 0x12a   : > { %v654_v38 = vadd.f32 %v653_v37, %v633_v36 }
 0x12c   : > { %v657_v39 = vsel %vm637_vm1, %v654_v38, -inf }
 0x12d   : > { %658 = vmax.xlane.f32.xlu1 %v657_v39 }
 0x131   : > { %v655_v40 = vpop.f32.mrf.mxu3 }
 0x195   : > { %v710_v43 = vpop.f32.mrf.mxu1 }
 0x196   : > { %v711_v44 = vadd.f32 %v710_v43, %v633_v36 }
 0x198   : > { %v714_v45 = vsel %vm637_vm1, %v711_v44, -inf }
 0x199   : > { %715 = vmax.xlane.f32.xlu0 %v714_v45 }
 0x19b   : > { %v767_v46 = vpop.f32.mrf.mxu3 }
 0x19c   : > { %v768_v56 = vadd.f32 %v767_v46, %v633_v36 }
 0x19d   : > { %v712_v47 = vpop.f32.mrf.mxu1 }
 0x19e   : > { %v771_v59 = vsel %vm637_vm1, %v768_v56, -inf }
 0x1a0   : > { %v659_v48 = vpop.xlane.xlu1 %658 }
 0x1a1   : > { %v660_v49 = vsub.f32 %v654_v38, %v659_v48  ;;  %v1129_v48 = vld [vmem:[%s1535_s6 + $0x8] sm:$0xff] }
 0x1a2   : > { %907 = vmatpush.bf16.msra.mxu3 %v1129_v48 }
 0x1a3   : > { %v661_v50 = vmul.f32 1.442695, %v660_v49  ;;  %v769_v51 = vpop.f32.mrf.mxu3  ;;  %v1128_v49 = vld [vmem:[%s1535_s6] sm:$0xff] }
 0x1a5   : > { %1184 = vpow2.f32 %v661_v50  ;;  %v823_v52 = vpop.f32.mrf.mxu1 }
 0x1a6   : > { %v824_v53 = vadd.f32 %v823_v52, %v633_v36  ;;  %908 = vmatpush.bf16.msra.mxu3 %v1128_v49 }
 0x1a8   : > { %v827_v54 = vsel %vm637_vm1, %v824_v53, -inf }
 0x1a9   : > { %828 = vmax.xlane.f32.xlu2 %v827_v54 }
 0x1ab   : > { %v1185_v55 = vpop.eup %1184 }
 0x1ac   : > { %v663_v57 = vsel %vm637_vm1, %v1185_v55, 0.0 }
 0x1ad   : > { %664 = vadd.xlane.f32.xlu1 %v663_v57  ;;  %v825_v58 = vpop.f32.mrf.mxu1  ;;  %v1181_v57 = vld [vmem:[#allocation2] ss:$0 sm:$0xff] }
 0x1b1   : > { %772 = vmax.xlane.f32.xlu2 %v771_v59 }
 0x1c9   : > { %727 = vrot.lane.b32.xlu2 %v636_v63, %s1314_s17 }
 0x20c   : > { %v716_v1 = vpop.xlane.xlu0 %715 }
 0x20d   : > { %v717_v3 = vsub.f32 %v711_v44, %v716_v1  ;;  %v1321_v1 = vmov 32.0  }
 0x20f   : > { %v718_v5 = vmul.f32 1.442695, %v717_v3 }
 0x211   : > { %1186 = vpow2.f32 %v718_v5 }
 0x217   : > { %v1187_v6 = vpop.eup %1186 }
 0x218   : > { %v720_v7 = vsel %vm637_vm1, %v1187_v6, 0.0 }
 0x219   : > { %721 = vadd.xlane.f32.xlu0 %v720_v7 }
 0x21c   : > { %v829_v8 = vpop.xlane.xlu2 %828 }
 0x21d   : > { %v830_v9 = vsub.f32 %v824_v53, %v829_v8 }
 0x21f   : > { %v831_v10 = vmul.f32 1.442695, %v830_v9 }
 0x220   : > { %v665_v11 = vpop.xlane.xlu1 %664 }
 0x221   : > { %1188 = vpow2.f32 %v831_v10 }
 0x222   : > { %1190 = vrcp.f32 %v665_v11 }
 0x224   : > { %v773_v12 = vpop.xlane.xlu2 %772 }
 0x225   : > { %v774_v13 = vsub.f32 %v768_v56, %v773_v12 }
 0x227   : > { %v1189_v14 = vpop.eup %1188  ;;  %v775_v15 = vmul.f32 1.442695, %v774_v13 }
 0x228   : > { %v1191_v16 = vpop.eup %1190  ;;  %v833_v17 = vsel %vm637_vm1, %v1189_v14, 0.0 }
 0x229   : > { %v667_v18 = vmul.f32 %v1191_v16, %v1185_v55  ;;  %1192 = vpow2.f32 %v775_v15  ;;  %834 = vadd.xlane.f32.xlu0 %v833_v17 }
 0x22b   : > { %v668_v19 = vpack.c.bf16 %v667_v18, %v667_v18 }
 0x22c   : > { %v728_v22 = vpop.permute.xlu2 %727 }
 0x22d   : > { %1104 = vmatmul.msk.bf16.vlgmr.msrb.gmra.mxu0 %vm637_vm1, %v668_v19  ;;  %v733_v23 = vsel %vm672_vm6, %v728_v22, 0  ;;  %v1182_v22 = vld [vmem:[#allocation4] ss:$0 sm:$0xff] }
 0x22e   : > { %742 = vmatpush.bf16.msrb.mxu2 %v733_v23 }
 0x22f   : > { %v1193_v20 = vpop.eup %1192 }
 0x230   : > { %v777_v21 = vsel %vm637_vm1, %v1193_v20, 0.0 }
 0x231   : > { %778 = vadd.xlane.f32.xlu1 %v777_v21 }
 0x23d   : > { %839 = vrot.lane.b32.xlu0 %v636_v63, %s1315_s18 }
 0x24a   : > { %783 = vrot.lane.b32.xlu1 %v636_v63, %s1313_s16 }
 0x28c   : > { %v722_v24 = vpop.xlane.xlu0 %721 }
 0x28d   : > { %1194 = vrcp.f32 %v722_v24  ;;  %v1183_v24 = vld [vmem:[#allocation6] ss:$0 sm:$0xff] }
 0x293   : > { %v1195_v25 = vpop.eup %1194 }
 0x294   : > { %v724_v26 = vmul.f32 %v1195_v25, %v1187_v6 }
 0x296   : > { %v725_v27 = vpack.c.bf16 %v724_v26, %v724_v26 }
 0x298   : > { %1106 = vmatmul.msk.bf16.vlgmr.msrb.gmra.mxu2 %vm637_vm1, %v725_v27 }
 0x29c   : > { %v835_v28 = vpop.xlane.xlu0 %834 }
 0x29d   : > { %1196 = vrcp.f32 %v835_v28 }
 0x2a3   : > { %v1197_v30 = vpop.eup %1196 }
 0x2a4   : > { %v837_v31 = vmul.f32 %v1197_v30, %v1189_v14  ;;  %v779_v32 = vpop.xlane.xlu1 %778 }
 0x2a5   : > { %1198 = vrcp.f32 %v779_v32 }
 0x2a6   : > { %v838_v35 = vpack.c.bf16 %v837_v31, %v837_v31  ;;  %1200 = vrcp.f32 %v1321_v1 }
 0x2aa   : > { %v685_v29 = vpop.f32.mrf.mxu0 }
 0x2ab   : > { %v1199_v37 = vpop.eup %1198 }
 0x2ac   : > { %v781_v38 = vmul.f32 %v1199_v37, %v1193_v20  ;;  %v1201_v2 = vpop.eup %1200 }
 0x2ad   : > { %v919_v3 = vmul.f32 32.0, %v1201_v2  ;;  %vm923_vm9 = vweird.f32 %v1201_v2 }
 0x2ae   : > { %v782_v41 = vpack.c.bf16 %v781_v38, %v781_v38 }
 0x2af   : > { %v840_v33 = vpop.permute.xlu0 %839  ;;  %v920_v5 = vsub.f32 1.0, %v919_v3 }
 0x2b0   : > { %v845_v34 = vsel %vm672_vm6, %v840_v33, 0 }
 0x2b1   : > { %854 = vmatpush.bf16.msra.mxu2 %v845_v34  ;;  %v921_v6 = vmul.f32 %v1201_v2, %v920_v5 }
 0x2b2   : > { %v687_v36 = vpop.f32.mrf.mxu0 }
 0x2b3   : > { %v922_v7 = vadd.f32 %v1201_v2, %v921_v6 }
 0x2b4   : > { %1110 = vmatmul.msk.bf16.vlgmr.msra.gmra.mxu2 %vm637_vm1, %v838_v35 }
 0x2b5   : > { %v924_v8 = vsel %vm923_vm9, %v1201_v2, %v922_v7 }
 0x2bc   : > { %v784_v39 = vpop.permute.xlu1 %783 }
 0x2bd   : > { %v789_v40 = vsel %vm672_vm6, %v784_v39, 0 }
 0x2be   : > { %798 = vmatpush.bf16.msra.mxu0 %v789_v40 }
 0x2c1   : > { %1108 = vmatmul.msk.bf16.vlgmr.msra.gmra.mxu0 %vm637_vm1, %v782_v41 }
 0x31b   : > { %v744_v42 = vpop.f32.mrf.mxu2 }
 0x31c   : > { %861 = vrot.lane.b32.xlu2 %v744_v42, %s1318_s14 }
 0x323   : > { %v746_v43 = vpop.f32.mrf.mxu2 }
 0x337   : > { %v856_v44 = vpop.f32.mrf.mxu2 }
 0x338   : > { %869 = vrot.lane.b32.xlu2 %v856_v44, %s1319_s30 }
 0x33e   : > { %v800_v45 = vpop.f32.mrf.mxu0 }
 0x33f   : > { %v858_v46 = vpop.f32.mrf.mxu2  ;;  %865 = vrot.lane.b32.xlu0 %v800_v45, %s1320_s15 }
 0x346   : > { %v802_v47 = vpop.f32.mrf.mxu0 }
 0x376   : > { %v862_v50 = vpop.permute.xlu2 %861 }
 0x377   : > { %v872_v51 = vsel %vm637_vm1, %v685_v29, %v862_v50 }
 0x392   : > { %v870_v53 = vpop.permute.xlu2 %869 }
 0x3b1   : > { %v866_v52 = vpop.permute.xlu0 %865 }
 0x3b2   : > { %v874_v54 = vsel %vm873_vm7, %v872_v51, %v866_v52 }
 0x3b3   : > { %v876_v55 = vsel %vm875_vm8, %v874_v54, %v870_v53 }
 0x3b4   : > { %v877_v56 = vpack.c.bf16 %v876_v55, %v876_v55 }
 0x3b6   : > { %1119 = vmatmul.msk.bf16.vlgmr.msra.gmra.mxu3 %vm536_vm0, %v877_v56 }
 0x439   : > { %v910_v58 = vpop.f32.mrf.mxu3 }
 0x43a   : > { %v911_v59 = vadd.f32 %v1181_v57, %v910_v58 }
 0x43c   : > { %v914_v60 = vadd.f32 %v911_v59, %v1447_v4 }
 0x43e   : > { %v915_v61 = vsel %vm536_vm0, %v914_v60, 0.0  ;;  %v926_v62 = vmul.f32 %v914_v60, %v914_v60 }
 0x43f   : > { %916 = vadd.xlane.f32.xlu1 %v915_v61 }
 0x440   : > { %v927_v63 = vsel %vm536_vm0, %v926_v62, 0.0 }
 0x441   : > { %v912_v0 = vpop.f32.mrf.mxu3  ;;  %928 = vadd.xlane.f32.xlu0 %v927_v63 }
 0x4b2   : > { %v917_v9 = vpop.xlane.xlu1 %916 }
 0x4b3   : > { %v925_v10 = vmul.f32 %v924_v8, %v917_v9 }
 0x4b4   : > { %v929_v4 = vpop.xlane.xlu0 %928 }
 0x4b5   : > { %v931_v11 = vmul.f32 %v925_v10, %v925_v10  ;;  %v930_v12 = vmul.f32 %v929_v4, %v924_v8  ;;  %v933_v21 = vsub.f32 %v914_v60, %v925_v10 }
 0x4b7   : > { %v932_v13 = vsub.f32 %v930_v12, %v931_v11 }
 0x4b9   : > { %v934_v14 = vadd.f32 1e-05, %v932_v13 }
 0x4bb   : > { %1202 = vrsqrt.f32 %v934_v14  ;;  %vm941_vm11 = vweird.f32 %v934_v14 }
 0x4c1   : > { %v1203_v15 = vpop.eup %1202 }
 0x4c2   : > { %v936_v16 = vmul.f32 %v1203_v15, %v934_v14  ;;  %vm942_vm10 = vweird.f32 %v1203_v15 }
 0x4c3   : > { %vm943_vm12 = vmor %vm941_vm11, %vm942_vm10 }
 0x4c4   : > { %v937_v17 = vmul.f32 %v1203_v15, %v936_v16 }
 0x4c6   : > { %v938_v18 = vmul.f32 0.5, %v937_v17 }
 0x4c8   : > { %v939_v19 = vsub.f32 1.5, %v938_v18 }
 0x4ca   : > { %v940_v20 = vmul.f32 %v1203_v15, %v939_v19 }
 0x4cc   : > { %v944_v23 = vsel %vm943_vm12, %v1203_v15, %v940_v20 }
 0x4cd   : > { %v945_v25 = vmul.f32 %v944_v23, %v933_v21 }
 0x4cf   : > { %v950_v26 = vmul.f32 %v1182_v22, %v945_v25 }
 0x4d1   : > { %v955_v27 = vadd.f32 %v1183_v24, %v950_v26 }
 0x4d3   : > { %956 = vst.msk [vmem:[%s510_s29] sm:$0xff] %vm536_vm0, %v955_v27 }
 0x4d4 PF: > { %s25_s25 = sadd.s32 1, %s1308_s25  }
 0x4d5   : > { %p22_p7 = scmp.ge.s32.totalorder %s25_s25, 4  }
 0x4d7   :  { %24 = sbr.rel (!%p22_p7) target bundleno = 2 (0x2), region = 121 }
 0x4dc   :  { %976 = vsyncpa [#allocation3], 1 }
 0x4dd   :  { %978 = vsyncpa [#allocation3 + $0x1], 1 }
 0x4de   :  { %979 = vsyncpa [#allocation5], 1 }

// kernel: transformer_forward.16
= control target key start
LH: loop header
LB: loop body
LE: loop exit
PB: predicated region body
PF: predicated region fallthrough
CT: control target
= control target key end

     0   :  { %s1685_s0 = inlined_call_operand.vmem [shape: f32[2,8,32], index: 0, kind: input, shape index: {}]   ;;  %s1686_s1 = inlined_call_operand.vmem [shape: f32[2,8,32], index: 1, kind: input, shape index: {}]   ;;  %s1687_s2 = inlined_call_operand.vmem [shape: f32[2,1,8], index: 2, kind: input, shape index: {}]   ;;  %s1688_s3 = inlined_call_operand.vmem [shape: bf16[32,32], index: 3, kind: input, shape index: {}]   ;;  %s1689_s4 = inlined_call_operand.vmem [shape: bf16[32,32], index: 4, kind: input, shape index: {}]   ;;  %s1690_s5 = inlined_call_operand.vmem [shape: bf16[32,32], index: 5, kind: input, shape index: {}]   ;;  %s1691_s6 = inlined_call_operand.vmem [shape: bf16[32,32], index: 6, kind: input, shape index: {}]   ;;  %s1692_s7 = inlined_call_operand.vmem [shape: f32[1,32], index: 7, kind: input, shape index: {}]   ;;  %s1693_s8 = inlined_call_operand.hbm [shape: f32[1,32], index: 8, kind: input, shape index: {}]   ;;  %s1694_s9 = inlined_call_operand.hbm [shape: f32[1,32], index: 9, kind: input, shape index: {}]   ;;  %s1695_s10 = inlined_call_operand.hbm [shape: f32[1,32], index: 10, kind: input, shape index: {}]   ;;  %s1696_s11 = inlined_call_operand.hbm [shape: f32[1,32], index: 11, kind: input, shape index: {}]   ;;  %s1697_s12 = inlined_call_operand.hbm [shape: f32[1,32], index: 12, kind: input, shape index: {}]   ;;  %s1698_s13 = inlined_call_operand.vmem [shape: f32[2,8,32], index: 13, kind: output, shape index: {}]  }
   0x1   :  { %1699 = sst [smem:[#allocation13_spill]] %s1693_s8 }
   0x2   :  { %1700 = sst [smem:[#allocation14_spill]] %s1694_s9 }
   0x3   :  { %18 = vsyncpa [#allocation3], 0 }
   0x4   :  { %19 = vsyncpa [#allocation5], 0 }
   0x5   :  { %20 = vsyncpa [#allocation8], 0  ;;  %s1524_s25 = smov 0  }
   0x6 LB: > { %s1701_s9 = sld [smem:[#allocation14_spill]]  ;;  %s1533_s29 = sadd.s32 4294967295, %s1438_s25   ;;  %s1438_s25 = sphi %s1524_s25, %s26_s25  }
   0x7   : > { %p1106_p0 = scmp.ge.s32.totalorder %s1438_s25, 1  ;;  %p345_p1 = scmp.lt.s32.totalorder %s1438_s25, 3 }
   0x8   : > { %p1212_p2 = scmp.eq.s32.totalorder %s1533_s29, 0  ;;  %s1440_s14 = smov [#allocation4]  }
   0x9   : > { %p1538_p3 = pnand %p1106_p0, %p345_p1  ;;  %s386_s15 = sshll.u32 %s1440_s14, 4  ;;  %s387_s15 = int_to_ptr.vmem [resolvable:$true] %s386_s15 }
   0xa   : > { %s408_s18 = sshll.u32 %s1696_s11, 4  ;;  %s1703_s8 = sld [smem:[#allocation13_spill]]  ;;  %s409_s18 = int_to_ptr.hbm [resolvable:$true] %s408_s18 }
   0xb   : > { %p1196_p4 = pneg %p1538_p3  ;;  %s1441_s23 = smov [#allocation7]  }
   0xc   : > { %s384_s28 = sshll.u32 %s1701_s9, 4  ;;  %s410_s24 = sshll.u32 %s1441_s23, 4  ;;  %s385_s28 = int_to_ptr.hbm [resolvable:$true] %s384_s28  ;;  %s411_s24 = int_to_ptr.vmem [resolvable:$true] %s410_s24 }
   0xd   : > { %p1552_p5 = pnand %p1212_p2, %p1196_p4  ;;  %s1442_s26 = smov [#allocation2]  }
   0xe   : > { %s374_s27 = sshll.u32 %s1442_s26, 4  ;;  %s396_s17 = sshll.u32 %s1695_s10, 4  ;;  %s375_s27 = int_to_ptr.vmem [resolvable:$true] %s374_s27  ;;  %s397_s17 = int_to_ptr.hbm [resolvable:$true] %s396_s17 }
   0xf   : > { %1202 = dma.hbm_to_vmem [thread:$0]  (!%p1552_p5), %s385_s28, 16, %s387_s15, [#allocation5]  }
  0x10   : > { %s372_s21 = sshll.u32 %s1703_s8, 4  ;;  %s420_s23 = sshll.u32 %s1697_s12, 4  ;;  %s373_s21 = int_to_ptr.hbm [resolvable:$true] %s372_s21  ;;  %s421_s23 = int_to_ptr.hbm [resolvable:$true] %s420_s23 }
  0x11   : > { %1208 = dma.hbm_to_vmem [thread:$0]  (!%p1552_p5), %s409_s18, 16, %s411_s24, [#allocation8]  }
  0x12   : > { %1199 = dma.hbm_to_vmem [thread:$0]  (!%p1552_p5), %s373_s21, 16, %s375_s27, [#allocation3]  }
  0x13   : > { %s1443_s8 = smov [#allocation6]   ;;  %s1444_s28 = smov [#allocation9]  }
  0x14   : > { %s398_s9 = sshll.u32 %s1443_s8, 4  ;;  %s422_s15 = sshll.u32 %s1444_s28, 4  ;;  %s399_s9 = int_to_ptr.vmem [resolvable:$true] %s398_s9  ;;  %s423_s15 = int_to_ptr.vmem [resolvable:$true] %s422_s15 }
  0x15   : > { %1205 = dma.hbm_to_vmem [thread:$0]  (!%p1552_p5), %s397_s17, 16, %s399_s9, [#allocation5]  }
  0x16   : > { %1211 = dma.hbm_to_vmem [thread:$0]  (!%p1552_p5), %s421_s23, 16, %s423_s15, [#allocation8]  }
  0x17   : > { %455 = sbr.rel (%p1538_p3) target bundleno = 1251 (0x4e3), region = 72 }
  0x1c   : > { %1425 = dma.done.wait (%p1212_p2), [#allocation3], 16  }
  0x1d   : > { %1427 = vsyncadd (%p1212_p2), [#allocation3], 4294967280 }
  0x1e   : > { %1429 = dma.done.wait (%p1212_p2), [#allocation5], 32  }
  0x1f   : > { %1431 = vsyncadd (%p1212_p2), [#allocation5], 4294967264 }
  0x20   : > { %1433 = dma.done.wait (%p1212_p2), [#allocation8], 32  }
  0x21   : > { %1435 = vsyncadd (%p1212_p2), [#allocation8], 4294967264  ;;  %p525_p6 = scmp.lt.s32.totalorder %s1533_s29, 1  ;;  %v1169_v0 = vld [vmem:[%s1688_s3 + $0x8] sm:$0xff]  ;;  %v1168_v2 = vld [vmem:[%s1688_s3] sm:$0xff]  ;;  %vm565_vm0 = vcmask 261120  }
  0x22   : > { %v1171_v1 = vld [vmem:[%s1689_s4 + $0x8] sm:$0xff]  ;;  %v1170_v3 = vld [vmem:[%s1689_s4] sm:$0xff]  ;;  %575 = vmatpush.bf16.msra.mxu0 %v1169_v0  ;;  %vm660_vm1 = vcmask 64512   ;;  %s1445_s9 = smov 112   ;;  %s1446_s30 = smov 120   ;;  %v1448_v28 = vmov 0  }
  0x23   : > { %s1706_s29 = smov (!%p525_p6, %s1533_s29), 1  ;;  %611 = vmatpush.bf16.msra.mxu1 %v1171_v1  ;;  %v1244_v8 = vld [vmem:[%s1692_s7] ss:$0 sm:$0xff]  ;;  %v1449_v32 = vmov 0.0   ;;  %v1173_v38 = vld [vmem:[%s1690_s5 + $0x8] sm:$0xff]  ;;  %vm695_vm4 = vcmask 1043456  }
  0x24   : > { %s1591_s8 = sshll.u32 %s1706_s29, 3  ;;  %v1245_v9 = vld [vmem:[#allocation2] ss:$0 sm:$0xff]  ;;  %644 = vmatpush.bf16.msra.mxu2 %v1173_v38  ;;  %v1246_v57 = vld [vmem:[#allocation4] ss:$0 sm:$0xff]  ;;  %s1450_s16 = smov 8  }
  0x25   : > { %s528_s18 = scalar_lea.vmem %s1685_s0, %s1591_s8  ;;  %s532_s24 = scalar_lea.vmem %s1686_s1, %s1591_s8  ;;  %v1172_v39 = vld [vmem:[%s1690_s5] sm:$0xff]  ;;  %vm896_vm5 = vcmask 130048   ;;  %vm898_vm6 = vcmask 195584  }
  0x26   : > { %v1613_v4 = vld [vmem:[%s528_s18] sm:$0xff]  ;;  %576 = vmatpush.bf16.msra.mxu0 %v1168_v2  ;;  %s1447_s18 = smov 104   ;;  %s1451_s17 = smov 24  }
  0x27   : > { %v542_v5 = vld [vmem:[%s532_s24] sm:$0xff]  ;;  %v543_v6 = vpack.c.bf16 %v1613_v4, %v1613_v4  ;;  %612 = vmatpush.bf16.msra.mxu1 %v1170_v3  ;;  %s535_s24 = scalar_lea.vmem %s1687_s2, %s1706_s29  ;;  %s1452_s19 = smov 16  }
  0x28   : > { %v544_v7 = vpack.c.bf16 %v542_v5, %v542_v5  ;;  %v651_v26 = vld [vmem:[%s535_s24] sm:$0x1]  ;;  %645 = vmatpush.bf16.msra.mxu2 %v1172_v39 }
  0x29   : > { %1130 = vmatmul.msk.bf16.vlgmr.msra.gmra.mxu0 %vm565_vm0, %v543_v6  ;;  %vm652_vm2 = vcmp.gt.f32.partialorder %v651_v26, 0.0 }
  0x2a   : > { %1139 = vmatmul.msk.bf16.vlgmr.msra.gmra.mxu1 %vm565_vm0, %v544_v7  ;;  %v653_v29 = vsel %vm652_vm2, 1, %v1448_v28 }
  0x2b   : > { %v654_v30 = vperm.slane %v653_v29, 0  ;;  %1148 = vmatmul.msk.bf16.vlgmr.msra.gmra.mxu2 %vm565_vm0, %v544_v7 }
  0x2d   : > { %vm655_vm3 = vcmp.eq.s32.totalorder %v654_v30, 1 }
  0x2e   : > { %v656_v33 = vsel %vm655_vm3, -1e+09, %v1449_v32 }
  0xa6   : > { %v578_v10 = vpop.f32.mrf.mxu0 }
  0xa7   : > { %v614_v11 = vpop.f32.mrf.mxu1  ;;  %v579_v12 = vadd.f32 %v1244_v8, %v578_v10 }
  0xa8   : > { %v615_v13 = vadd.f32 %v1245_v9, %v614_v11 }
  0xa9   : > { %v657_v14 = vpack.c.bf16 %v579_v12, %v579_v12 }
  0xaa   : > { %v658_v15 = vpack.c.bf16 %v615_v13, %v615_v13 }
  0xab   : > { %771 = vrot.lane.b32.xlu2 %v657_v14, %s1445_s9 }
  0xac   : > { %773 = vrot.lane.b32.xlu1 %v658_v15, %s1445_s9  ;;  %716 = vrot.lane.b32.xlu0 %v658_v15, %s1446_s30  ;;  %v665_v16 = vsel %vm660_vm1, %v658_v15, 0 }
  0xad   : > { %674 = vmatpush.bf16.xpose.msra.mxu3 %v665_v16 }
  0xae   : > { %v580_v17 = vpop.f32.mrf.mxu0  ;;  %v647_v58 = vpop.f32.mrf.mxu2 }
  0xaf   : > { %v616_v18 = vpop.f32.mrf.mxu1  ;;  %v648_v59 = vadd.f32 %v1246_v57, %v647_v58 }
  0xb1   : > { %v659_v60 = vpack.c.bf16 %v648_v59, %v648_v59 }
  0xb3   : > { %827 = vrot.lane.b32.xlu2 %v657_v14, %s1447_s18  ;;  %v697_v61 = vsel %vm695_vm4, %v659_v60, 0 }
  0xb4   : > { %829 = vrot.lane.b32.xlu1 %v658_v15, %s1447_s18  ;;  %713 = vrot.lane.b32.xlu0 %v657_v14, %s1446_s30 }
  0xb5   : > { %1149 = vmatmul.msk.bf16.vlgmr.msra.gmra.mxu3 %vm660_vm1, %v657_v14  ;;  %706 = vmatpush.bf16.msrb.mxu0 %v697_v61 }
  0xb6   : > { %v649_v63 = vpop.f32.mrf.mxu2 }
 0x105   : > { %v772_v23 = vpop.permute.xlu2 %771 }
 0x10d   : > { %v828_v31 = vpop.permute.xlu2 %827 }
 0x11e   : > { %v774_v19 = vpop.permute.xlu1 %773  ;;  %v717_v20 = vpop.permute.xlu0 %716 }
 0x11f   : > { %v722_v21 = vsel %vm660_vm1, %v717_v20, 0  ;;  %v779_v22 = vsel %vm660_vm1, %v774_v19, 0 }
 0x120   : > { %731 = vmatpush.bf16.xpose.msrb.mxu1 %v722_v21  ;;  %788 = vmatpush.bf16.xpose.msrb.mxu3 %v779_v22 }
 0x126   : > { %v830_v24 = vpop.permute.xlu1 %829  ;;  %v714_v25 = vpop.permute.xlu0 %713 }
 0x127   : > { %v835_v27 = vsel %vm660_vm1, %v830_v24, 0  ;;  %1151 = vmatmul.msk.bf16.vlgmr.msrb.gmra.mxu1 %vm660_vm1, %v714_v25  ;;  %1153 = vmatmul.msk.bf16.vlgmr.msrb.gmra.mxu3 %vm660_vm1, %v772_v23 }
 0x128   : > { %844 = vmatpush.bf16.xpose.msra.mxu1 %v835_v27 }
 0x137   : > { %1155 = vmatmul.msk.bf16.vlgmr.msra.gmra.mxu1 %vm660_vm1, %v828_v31 }
 0x138   : > { %v676_v34 = vpop.f32.mrf.mxu3 }
 0x139   : > { %v677_v35 = vadd.f32 %v676_v34, %v656_v33 }
 0x13b   : > { %v680_v36 = vsel %vm660_vm1, %v677_v35, -inf }
 0x13c   : > { %681 = vmax.xlane.f32.xlu1 %v680_v36 }
 0x140   : > { %v678_v37 = vpop.f32.mrf.mxu3 }
 0x1a4   : > { %v733_v40 = vpop.f32.mrf.mxu1 }
 0x1a5   : > { %v734_v41 = vadd.f32 %v733_v40, %v656_v33 }
 0x1a7   : > { %v737_v42 = vsel %vm660_vm1, %v734_v41, -inf }
 0x1a8   : > { %738 = vmax.xlane.f32.xlu0 %v737_v42 }
 0x1aa   : > { %v790_v43 = vpop.f32.mrf.mxu3 }
 0x1ab   : > { %v791_v53 = vadd.f32 %v790_v43, %v656_v33 }
 0x1ac   : > { %v735_v44 = vpop.f32.mrf.mxu1 }
 0x1ad   : > { %v794_v56 = vsel %vm660_vm1, %v791_v53, -inf }
 0x1af   : > { %v682_v45 = vpop.xlane.xlu1 %681 }
 0x1b0   : > { %v683_v46 = vsub.f32 %v677_v35, %v682_v45  ;;  %v1175_v45 = vld [vmem:[%s1691_s6 + $0x8] sm:$0xff] }
 0x1b1   : > { %930 = vmatpush.bf16.msra.mxu3 %v1175_v45 }
 0x1b2   : > { %v684_v47 = vmul.f32 1.442695, %v683_v46  ;;  %v792_v48 = vpop.f32.mrf.mxu3  ;;  %v1174_v46 = vld [vmem:[%s1691_s6] sm:$0xff] }
 0x1b4   : > { %1250 = vpow2.f32 %v684_v47  ;;  %v846_v49 = vpop.f32.mrf.mxu1 }
 0x1b5   : > { %v847_v50 = vadd.f32 %v846_v49, %v656_v33  ;;  %931 = vmatpush.bf16.msra.mxu3 %v1174_v46 }
 0x1b7   : > { %v850_v51 = vsel %vm660_vm1, %v847_v50, -inf }
 0x1b8   : > { %851 = vmax.xlane.f32.xlu2 %v850_v51 }
 0x1ba   : > { %v1251_v52 = vpop.eup %1250 }
 0x1bb   : > { %v686_v54 = vsel %vm660_vm1, %v1251_v52, 0.0 }
 0x1bc   : > { %687 = vadd.xlane.f32.xlu1 %v686_v54  ;;  %v848_v55 = vpop.f32.mrf.mxu1  ;;  %v1247_v54 = vld [vmem:[#allocation6] ss:$0 sm:$0xff] }
 0x1c0   : > { %795 = vmax.xlane.f32.xlu2 %v794_v56 }
 0x1d8   : > { %750 = vrot.lane.b32.xlu2 %v659_v60, %s1446_s30 }
 0x21b   : > { %v739_v62 = vpop.xlane.xlu0 %738 }
 0x21c   : > { %v740_v0 = vsub.f32 %v734_v41, %v739_v62  ;;  %v1453_v62 = vmov 32.0  }
 0x21e   : > { %v741_v1 = vmul.f32 1.442695, %v740_v0 }
 0x220   : > { %1252 = vpow2.f32 %v741_v1 }
 0x226   : > { %v1253_v2 = vpop.eup %1252 }
 0x227   : > { %v743_v3 = vsel %vm660_vm1, %v1253_v2, 0.0 }
 0x228   : > { %744 = vadd.xlane.f32.xlu0 %v743_v3 }
 0x22b   : > { %v852_v5 = vpop.xlane.xlu2 %851 }
 0x22c   : > { %v853_v6 = vsub.f32 %v847_v50, %v852_v5 }
 0x22e   : > { %v854_v7 = vmul.f32 1.442695, %v853_v6 }
 0x22f   : > { %v688_v8 = vpop.xlane.xlu1 %687 }
 0x230   : > { %1254 = vpow2.f32 %v854_v7 }
 0x231   : > { %1256 = vrcp.f32 %v688_v8 }
 0x233   : > { %v796_v9 = vpop.xlane.xlu2 %795 }
 0x234   : > { %v797_v10 = vsub.f32 %v791_v53, %v796_v9 }
 0x236   : > { %v1255_v11 = vpop.eup %1254  ;;  %v798_v12 = vmul.f32 1.442695, %v797_v10 }
 0x237   : > { %v1257_v13 = vpop.eup %1256  ;;  %v856_v14 = vsel %vm660_vm1, %v1255_v11, 0.0 }
 0x238   : > { %v690_v15 = vmul.f32 %v1257_v13, %v1251_v52  ;;  %1258 = vpow2.f32 %v798_v12  ;;  %857 = vadd.xlane.f32.xlu0 %v856_v14 }
 0x23a   : > { %v691_v16 = vpack.c.bf16 %v690_v15, %v690_v15 }
 0x23b   : > { %v751_v19 = vpop.permute.xlu2 %750 }
 0x23c   : > { %1150 = vmatmul.msk.bf16.vlgmr.msrb.gmra.mxu0 %vm660_vm1, %v691_v16  ;;  %v756_v20 = vsel %vm695_vm4, %v751_v19, 0  ;;  %v1248_v19 = vld [vmem:[#allocation7] ss:$0 sm:$0xff] }
 0x23d   : > { %765 = vmatpush.bf16.msrb.mxu2 %v756_v20 }
 0x23e   : > { %v1259_v17 = vpop.eup %1258 }
 0x23f   : > { %v800_v18 = vsel %vm660_vm1, %v1259_v17, 0.0 }
 0x240   : > { %801 = vadd.xlane.f32.xlu1 %v800_v18 }
 0x24c   : > { %862 = vrot.lane.b32.xlu0 %v659_v60, %s1447_s18  ;;  %s539_s18 = scalar_lea.vmem %s1698_s13, %s1591_s8 }
 0x259   : > { %806 = vrot.lane.b32.xlu1 %v659_v60, %s1445_s9 }
 0x29b   : > { %v745_v21 = vpop.xlane.xlu0 %744 }
 0x29c   : > { %1260 = vrcp.f32 %v745_v21  ;;  %v1249_v21 = vld [vmem:[#allocation9] ss:$0 sm:$0xff] }
 0x2a2   : > { %v1261_v22 = vpop.eup %1260 }
 0x2a3   : > { %v747_v23 = vmul.f32 %v1261_v22, %v1253_v2 }
 0x2a5   : > { %v748_v24 = vpack.c.bf16 %v747_v23, %v747_v23 }
 0x2a7   : > { %1152 = vmatmul.msk.bf16.vlgmr.msrb.gmra.mxu2 %vm660_vm1, %v748_v24 }
 0x2ab   : > { %v858_v25 = vpop.xlane.xlu0 %857 }
 0x2ac   : > { %1262 = vrcp.f32 %v858_v25 }
 0x2b2   : > { %v1263_v27 = vpop.eup %1262 }
 0x2b3   : > { %v860_v28 = vmul.f32 %v1263_v27, %v1255_v11  ;;  %v802_v29 = vpop.xlane.xlu1 %801 }
 0x2b4   : > { %1264 = vrcp.f32 %v802_v29 }
 0x2b5   : > { %v861_v32 = vpack.c.bf16 %v860_v28, %v860_v28  ;;  %1266 = vrcp.f32 %v1453_v62 }
 0x2b9   : > { %v708_v26 = vpop.f32.mrf.mxu0 }
 0x2ba   : > { %v1265_v34 = vpop.eup %1264 }
 0x2bb   : > { %v804_v35 = vmul.f32 %v1265_v34, %v1259_v17  ;;  %v1267_v63 = vpop.eup %1266 }
 0x2bc   : > { %v942_v0 = vmul.f32 32.0, %v1267_v63  ;;  %vm946_vm7 = vweird.f32 %v1267_v63 }
 0x2bd   : > { %v805_v38 = vpack.c.bf16 %v804_v35, %v804_v35 }
 0x2be   : > { %v863_v30 = vpop.permute.xlu0 %862  ;;  %v943_v1 = vsub.f32 1.0, %v942_v0 }
 0x2bf   : > { %v868_v31 = vsel %vm695_vm4, %v863_v30, 0 }
 0x2c0   : > { %877 = vmatpush.bf16.msra.mxu2 %v868_v31  ;;  %v944_v2 = vmul.f32 %v1267_v63, %v943_v1 }
 0x2c1   : > { %v710_v33 = vpop.f32.mrf.mxu0 }
 0x2c2   : > { %v945_v3 = vadd.f32 %v1267_v63, %v944_v2 }
 0x2c3   : > { %1156 = vmatmul.msk.bf16.vlgmr.msra.gmra.mxu2 %vm660_vm1, %v861_v32 }
 0x2c4   : > { %v947_v5 = vsel %vm946_vm7, %v1267_v63, %v945_v3 }
 0x2cb   : > { %v807_v36 = vpop.permute.xlu1 %806 }
 0x2cc   : > { %v812_v37 = vsel %vm695_vm4, %v807_v36, 0 }
 0x2cd   : > { %821 = vmatpush.bf16.msra.mxu0 %v812_v37 }
 0x2d0   : > { %1154 = vmatmul.msk.bf16.vlgmr.msra.gmra.mxu0 %vm660_vm1, %v805_v38 }
 0x32a   : > { %v767_v39 = vpop.f32.mrf.mxu2 }
 0x32b   : > { %884 = vrot.lane.b32.xlu2 %v767_v39, %s1450_s16 }
 0x332   : > { %v769_v40 = vpop.f32.mrf.mxu2 }
 0x346   : > { %v879_v41 = vpop.f32.mrf.mxu2 }
 0x347   : > { %892 = vrot.lane.b32.xlu2 %v879_v41, %s1451_s17 }
 0x34d   : > { %v823_v42 = vpop.f32.mrf.mxu0 }
 0x34e   : > { %v881_v43 = vpop.f32.mrf.mxu2  ;;  %888 = vrot.lane.b32.xlu0 %v823_v42, %s1452_s19 }
 0x355   : > { %v825_v44 = vpop.f32.mrf.mxu0 }
 0x385   : > { %v885_v47 = vpop.permute.xlu2 %884 }
 0x386   : > { %v895_v48 = vsel %vm660_vm1, %v708_v26, %v885_v47 }
 0x3a1   : > { %v893_v50 = vpop.permute.xlu2 %892 }
 0x3c0   : > { %v889_v49 = vpop.permute.xlu0 %888 }
 0x3c1   : > { %v897_v51 = vsel %vm896_vm5, %v895_v48, %v889_v49 }
 0x3c2   : > { %v899_v52 = vsel %vm898_vm6, %v897_v51, %v893_v50 }
 0x3c3   : > { %v900_v53 = vpack.c.bf16 %v899_v52, %v899_v52 }
 0x3c5   : > { %1165 = vmatmul.msk.bf16.vlgmr.msra.gmra.mxu3 %vm565_vm0, %v900_v53 }
 0x448   : > { %v933_v55 = vpop.f32.mrf.mxu3 }
 0x449   : > { %v934_v56 = vadd.f32 %v1247_v54, %v933_v55 }
 0x44b   : > { %v937_v57 = vadd.f32 %v934_v56, %v1613_v4 }
 0x44d   : > { %v938_v58 = vsel %vm565_vm0, %v937_v57, 0.0  ;;  %v949_v59 = vmul.f32 %v937_v57, %v937_v57 }
 0x44e   : > { %939 = vadd.xlane.f32.xlu1 %v938_v58 }
 0x44f   : > { %v950_v60 = vsel %vm565_vm0, %v949_v59, 0.0 }
 0x450   : > { %v935_v61 = vpop.f32.mrf.mxu3  ;;  %951 = vadd.xlane.f32.xlu0 %v950_v60 }
 0x4c1   : > { %v940_v6 = vpop.xlane.xlu1 %939 }
 0x4c2   : > { %v948_v7 = vmul.f32 %v947_v5, %v940_v6 }
 0x4c3   : > { %v952_v4 = vpop.xlane.xlu0 %951 }
 0x4c4   : > { %v954_v8 = vmul.f32 %v948_v7, %v948_v7  ;;  %v953_v9 = vmul.f32 %v952_v4, %v947_v5  ;;  %v956_v18 = vsub.f32 %v937_v57, %v948_v7 }
 0x4c6   : > { %v955_v10 = vsub.f32 %v953_v9, %v954_v8 }
 0x4c8   : > { %v957_v11 = vadd.f32 1e-05, %v955_v10 }
 0x4ca   : > { %1268 = vrsqrt.f32 %v957_v11  ;;  %vm964_vm9 = vweird.f32 %v957_v11 }
 0x4d0   : > { %v1269_v12 = vpop.eup %1268 }
 0x4d1   : > { %v959_v13 = vmul.f32 %v1269_v12, %v957_v11  ;;  %vm965_vm8 = vweird.f32 %v1269_v12 }
 0x4d2   : > { %vm966_vm10 = vmor %vm964_vm9, %vm965_vm8 }
 0x4d3   : > { %v960_v14 = vmul.f32 %v1269_v12, %v959_v13 }
 0x4d5   : > { %v961_v15 = vmul.f32 0.5, %v960_v14 }
 0x4d7   : > { %v962_v16 = vsub.f32 1.5, %v961_v15 }
 0x4d9   : > { %v963_v17 = vmul.f32 %v1269_v12, %v962_v16 }
 0x4db   : > { %v967_v20 = vsel %vm966_vm10, %v1269_v12, %v963_v17 }
 0x4dc   : > { %v968_v22 = vmul.f32 %v967_v20, %v956_v18 }
 0x4de   : > { %v973_v23 = vmul.f32 %v1248_v19, %v968_v22 }
 0x4e0   : > { %v978_v24 = vadd.f32 %v1249_v21, %v973_v23 }
 0x4e2   : > { %979 = vst.msk [vmem:[%s539_s18] sm:$0xff] %vm565_vm0, %v978_v24 }
 0x4e3 PF: > { %s26_s25 = sadd.s32 1, %s1438_s25  }
 0x4e4   : > { %p23_p7 = scmp.ge.s32.totalorder %s26_s25, 4  }
 0x4e6   :  { %25 = sbr.rel (!%p23_p7) target bundleno = 6 (0x6), region = 129 }
 0x4eb   :  { %999 = vsyncpa [#allocation3], 1 }
 0x4ec   :  { %1001 = vsyncpa [#allocation3 + $0x1], 1 }
 0x4ed   :  { %1002 = vsyncpa [#allocation5], 1 }
 0x4ee   :  { %1003 = vsyncpa [#allocation8], 1 }

// kernel: transformer_forward.21
= control target key start
LH: loop header
LB: loop body
LE: loop exit
PB: predicated region body
PF: predicated region fallthrough
CT: control target
= control target key end

     0   :  { %vm38_vm0 = vcmask 261120   ;;  %s115_s1 = inlined_call_operand.vmem [shape: bf16[32,128], index: 1, kind: input, shape index: {}]   ;;  %s116_s0 = inlined_call_operand.vmem [shape: f32[16,32], index: 0, kind: input, shape index: {}]   ;;  %s117_s2 = inlined_call_operand.vmem [shape: f32[1,128], index: 2, kind: input, shape index: {}]   ;;  %s118_s3 = inlined_call_operand.vmem [shape: f32[16,128], index: 3, kind: output, shape index: {}]  }
   0x1   :  { %v72_v0 = vld [vmem:[%s115_s1 + $0x8] sm:$0xff]  ;;  %v71_v1 = vld [vmem:[%s115_s1] sm:$0xff] }
   0x2   :  { %48 = vmatpush.bf16.msra.mxu0 %v72_v0  ;;  %v15_v2 = vld [vmem:[%s116_s0] sm:$0xff]  ;;  %v16_v3 = vld [vmem:[%s116_s0 + $0x8] sm:$0xff] }
   0x3   :  { %v17_v4 = vpack.c.bf16 %v16_v3, %v15_v2  ;;  %v73_v5 = vld [vmem:[%s117_s2] ss:$0 sm:$0xff] }
   0x6   :  { %49 = vmatpush.bf16.msra.mxu0 %v71_v1 }
   0x9   :  { %70 = vmatmul.msk.bf16.vlgmr.msra.gmra.mxu0 %vm38_vm0, %v17_v4 }
  0x86   :  { %v51_v6 = vpop.f32.mrf.mxu0 }
  0x87   :  { %v52_v7 = vadd.f32 %v73_v5, %v51_v6 }
  0x89   :  { %56 = vst [vmem:[%s118_s3] sm:$0xff] %v52_v7 }
  0x8e   :  { %v53_v8 = vpop.f32.mrf.mxu0 }
  0x8f   :  { %v54_v9 = vadd.f32 %v73_v5, %v53_v8 }
  0x91   :  { %57 = vst [vmem:[%s118_s3 + $0x8] sm:$0xff] %v54_v9 }

// kernel: transformer_forward.17
= control target key start
LH: loop header
LB: loop body
LE: loop exit
PB: predicated region body
PF: predicated region fallthrough
CT: control target
= control target key end

     0   :  { %12 = vsyncpa [#allocation3], 0  ;;  %s501_s0 = inlined_call_operand.vmem [shape: f32[16,32], index: 0, kind: input, shape index: {}]   ;;  %s502_s1 = inlined_call_operand.vmem [shape: bf16[32,64], index: 1, kind: input, shape index: {}]   ;;  %s503_s2 = inlined_call_operand.hbm [shape: f32[1,64], index: 2, kind: input, shape index: {}]   ;;  %s504_s3 = inlined_call_operand.vmem [shape: bf16[64,32], index: 3, kind: input, shape index: {}]   ;;  %s505_s4 = inlined_call_operand.hbm [shape: f32[1,32], index: 4, kind: input, shape index: {}]   ;;  %s506_s5 = inlined_call_operand.hbm [shape: f32[1,32], index: 5, kind: input, shape index: {}]   ;;  %s507_s6 = inlined_call_operand.hbm [shape: f32[1,32], index: 6, kind: input, shape index: {}]   ;;  %s508_s7 = inlined_call_operand.vmem [shape: f32[16,32], index: 7, kind: output, shape index: {}]  }
   0x1   :  { %13 = vsyncpa [#allocation5], 0  ;;  %s37_s26 = sshll.u32 %s505_s4, 4  ;;  %s38_s26 = int_to_ptr.hbm [resolvable:$true] %s37_s26 }
   0x2   :  { %14 = vsyncpa [#allocation8], 0  ;;  %s407_s27 = smov [#allocation4]   ;;  %s24_s8 = sshll.u32 %s503_s2, 4  ;;  %s25_s8 = int_to_ptr.hbm [resolvable:$true] %s24_s8 }
   0x3   :  { %s39_s28 = sshll.u32 %s407_s27, 4  ;;  %s408_s9 = smov [#allocation2]   ;;  %s40_s28 = int_to_ptr.vmem [resolvable:$true] %s39_s28 }
   0x4   :  { %42 = dma.hbm_to_vmem [thread:$0]  %s38_s26, 16, %s40_s28, [#allocation5]  }
   0x5   :  { %s26_s10 = sshll.u32 %s408_s9, 4  ;;  %s48_s13 = sshll.u32 %s506_s5, 4  ;;  %s27_s10 = int_to_ptr.vmem [resolvable:$true] %s26_s10  ;;  %s49_s13 = int_to_ptr.hbm [resolvable:$true] %s48_s13 }
   0x6   :  { %29 = dma.hbm_to_vmem [thread:$0]  %s25_s8, 16, %s27_s10, [#allocation3]  }
   0x7   :  { %s59_s15 = sshll.u32 %s507_s6, 4  ;;  %s409_s16 = smov [#allocation6]   ;;  %s60_s15 = int_to_ptr.hbm [resolvable:$true] %s59_s15 }
   0x8   :  { %s50_s17 = sshll.u32 %s409_s16, 4  ;;  %s410_s2 = smov [#allocation7]   ;;  %s51_s17 = int_to_ptr.vmem [resolvable:$true] %s50_s17 }
   0x9   :  { %53 = dma.hbm_to_vmem [thread:$0]  %s49_s13, 16, %s51_s17, [#allocation5]  }
   0xa   :  { %s61_s18 = sshll.u32 %s410_s2, 4  ;;  %s62_s18 = int_to_ptr.vmem [resolvable:$true] %s61_s18 }
   0xb   :  { %64 = dma.hbm_to_vmem [thread:$0]  %s60_s15, 16, %s62_s18, [#allocation8]  }
   0xc   :  { %401 = dma.done.wait [#allocation3], 16  }
   0xd   :  { %402 = vsyncadd [#allocation3], 4294967280 }
   0xe   :  { %403 = dma.done.wait [#allocation5], 32  }
   0xf   :  { %404 = vsyncadd [#allocation5], 4294967264 }
  0x10   :  { %405 = dma.done.wait [#allocation8], 16  }
  0x11   :  { %406 = vsyncadd [#allocation8], 4294967280  ;;  %v285_v0 = vld [vmem:[%s502_s1 + $0x8] sm:$0xff]  ;;  %v284_v1 = vld [vmem:[%s502_s1] sm:$0xff]  ;;  %vm105_vm0 = vcmask 261120   ;;  %vm162_vm1 = vcmask 523264  }
  0x12   :  { %v82_v2 = vld [vmem:[%s501_s0] sm:$0xff]  ;;  %v83_v3 = vld [vmem:[%s501_s0 + $0x8] sm:$0xff]  ;;  %115 = vmatpush.bf16.msra.mxu0 %v285_v0  ;;  %v289_v5 = vld [vmem:[%s504_s3 + $0x18] sm:$0xff]  ;;  %v411_v30 = vmov 32.0  }
  0x13   :  { %v84_v4 = vpack.c.bf16 %v83_v3, %v82_v2  ;;  %170 = vmatpush.bf16.msra.mxu1 %v289_v5  ;;  %v288_v6 = vld [vmem:[%s504_s3 + $0x10] sm:$0xff]  ;;  %v287_v7 = vld [vmem:[%s504_s3 + $0x8] sm:$0xff]  ;;  %v286_v8 = vld [vmem:[%s504_s3] sm:$0xff]  ;;  %299 = vrcp.f32 %v411_v30 }
  0x14   :  { %v295_v10 = vld [vmem:[#allocation2] ss:$0 sm:$0xff]  ;;  %v296_v17 = vld [vmem:[#allocation4] ss:$0 sm:$0xff]  ;;  %v297_v60 = vld [vmem:[#allocation6] ss:$0 sm:$0xff] }
  0x15   :  { %v298_v63 = vld [vmem:[#allocation7] ss:$0 sm:$0xff] }
  0x16   :  { %116 = vmatpush.bf16.msra.mxu0 %v284_v1 }
  0x17   :  { %171 = vmatpush.bf16.msra.mxu1 %v288_v6 }
  0x19   :  { %266 = vmatmul.msk.bf16.vlgmr.msra.gmra.mxu0 %vm105_vm0, %v84_v4  ;;  %v300_v31 = vpop.eup %299 }
  0x1a   :  { %v189_v32 = vmul.f32 32.0, %v300_v31  ;;  %vm193_vm2 = vweird.f32 %v300_v31 }
  0x1b   :  { %172 = vmatpush.bf16.msra.mxu1 %v287_v7 }
  0x1c   :  { %v190_v33 = vsub.f32 1.0, %v189_v32 }
  0x1e   :  { %v191_v34 = vmul.f32 %v300_v31, %v190_v33 }
  0x1f   :  { %173 = vmatpush.bf16.msra.mxu1 %v286_v8 }
  0x20   :  { %v192_v35 = vadd.f32 %v300_v31, %v191_v34 }
  0x22   :  { %v194_v36 = vsel %vm193_vm2, %v300_v31, %v192_v35 }
  0x96   :  { %v118_v9 = vpop.f32.mrf.mxu0 }
  0x97   :  { %v119_v11 = vadd.f32 %v295_v10, %v118_v9 }
  0x99   :  { %v123_v14 = vmax.f32 %v119_v11, 0.0 }
  0x9e   :  { %v120_v12 = vpop.f32.mrf.mxu0 }
  0x9f   :  { %v121_v13 = vadd.f32 %v295_v10, %v120_v12 }
  0xa1   :  { %v124_v15 = vmax.f32 %v121_v13, 0.0 }
  0xa3   :  { %v125_v16 = vpack.c.bf16 %v124_v15, %v123_v14 }
  0xa5   :  { %283 = vmatmul.msk.bf16.vlgmr.msra.gmra.mxu1 %vm162_vm1, %v125_v16 }
 0x122   :  { %v175_v18 = vpop.f32.mrf.mxu1 }
 0x123   :  { %v176_v19 = vadd.f32 %v296_v17, %v175_v18 }
 0x125   :  { %v180_v20 = vadd.f32 %v176_v19, %v82_v2 }
 0x127   :  { %v182_v21 = vsel %vm105_vm0, %v180_v20, 0.0  ;;  %v197_v22 = vmul.f32 %v180_v20, %v180_v20 }
 0x128   :  { %183 = vadd.xlane.f32.xlu0 %v182_v21 }
 0x129   :  { %v199_v23 = vsel %vm105_vm0, %v197_v22, 0.0 }
 0x12a   :  { %v177_v24 = vpop.f32.mrf.mxu1  ;;  %200 = vadd.xlane.f32.xlu1 %v199_v23 }
 0x12b   :  { %v178_v25 = vadd.f32 %v296_v17, %v177_v24 }
 0x12d   :  { %v181_v26 = vadd.f32 %v178_v25, %v83_v3 }
 0x12f   :  { %v185_v27 = vsel %vm105_vm0, %v181_v26, 0.0  ;;  %v198_v28 = vmul.f32 %v181_v26, %v181_v26 }
 0x130   :  { %186 = vadd.xlane.f32.xlu0 %v185_v27 }
 0x131   :  { %v202_v29 = vsel %vm105_vm0, %v198_v28, 0.0 }
 0x132   :  { %203 = vadd.xlane.f32.xlu1 %v202_v29 }
 0x19b   :  { %v184_v37 = vpop.xlane.xlu0 %183 }
 0x19c   :  { %v195_v38 = vmul.f32 %v194_v36, %v184_v37 }
 0x19d   :  { %v201_v39 = vpop.xlane.xlu1 %200 }
 0x19e   :  { %v207_v40 = vmul.f32 %v195_v38, %v195_v38  ;;  %v205_v41 = vmul.f32 %v201_v39, %v194_v36  ;;  %v211_v59 = vsub.f32 %v180_v20, %v195_v38 }
 0x1a0   :  { %v209_v42 = vsub.f32 %v205_v41, %v207_v40 }
 0x1a2   :  { %v213_v43 = vadd.f32 1e-05, %v209_v42 }
 0x1a3   :  { %v187_v44 = vpop.xlane.xlu0 %186 }
 0x1a4   :  { %301 = vrsqrt.f32 %v213_v43  ;;  %v196_v45 = vmul.f32 %v194_v36, %v187_v44  ;;  %vm221_vm4 = vweird.f32 %v213_v43 }
 0x1a5   :  { %v204_v46 = vpop.xlane.xlu1 %203 }
 0x1a6   :  { %v208_v47 = vmul.f32 %v196_v45, %v196_v45  ;;  %v206_v48 = vmul.f32 %v204_v46, %v194_v36  ;;  %v212_v6 = vsub.f32 %v181_v26, %v196_v45 }
 0x1a8   :  { %v210_v49 = vsub.f32 %v206_v48, %v208_v47 }
 0x1aa   :  { %v302_v50 = vpop.eup %301  ;;  %v214_v51 = vadd.f32 1e-05, %v210_v49 }
 0x1ab   :  { %v216_v52 = vmul.f32 %v302_v50, %v213_v43  ;;  %vm222_vm3 = vweird.f32 %v302_v50 }
 0x1ac   :  { %303 = vrsqrt.f32 %v214_v51  ;;  %vm223_vm5 = vmor %vm221_vm4, %vm222_vm3  ;;  %vm231_vm7 = vweird.f32 %v214_v51 }
 0x1ad   :  { %v217_v53 = vmul.f32 %v302_v50, %v216_v52 }
 0x1af   :  { %v218_v54 = vmul.f32 0.5, %v217_v53 }
 0x1b1   :  { %v219_v55 = vsub.f32 1.5, %v218_v54 }
 0x1b2   :  { %v304_v56 = vpop.eup %303 }
 0x1b3   :  { %v220_v57 = vmul.f32 %v302_v50, %v219_v55  ;;  %v226_v58 = vmul.f32 %v304_v56, %v214_v51  ;;  %vm232_vm6 = vweird.f32 %v304_v56 }
 0x1b4   :  { %vm233_vm8 = vmor %vm231_vm7, %vm232_vm6 }
 0x1b5   :  { %v224_v61 = vsel %vm223_vm5, %v302_v50, %v220_v57  ;;  %v227_v62 = vmul.f32 %v304_v56, %v226_v58 }
 0x1b6   :  { %v235_v0 = vmul.f32 %v224_v61, %v211_v59 }
 0x1b7   :  { %v228_v1 = vmul.f32 0.5, %v227_v62 }
 0x1b8   :  { %v241_v2 = vmul.f32 %v297_v60, %v235_v0 }
 0x1b9   :  { %v229_v3 = vsub.f32 1.5, %v228_v1 }
 0x1ba   :  { %v247_v4 = vadd.f32 %v298_v63, %v241_v2 }
 0x1bb   :  { %v230_v5 = vmul.f32 %v304_v56, %v229_v3 }
 0x1bc   :  { %249 = vst.msk [vmem:[%s508_s7] sm:$0xff] %vm105_vm0, %v247_v4 }
 0x1bd   :  { %v234_v7 = vsel %vm233_vm8, %v304_v56, %v230_v5 }
 0x1be   :  { %v236_v8 = vmul.f32 %v234_v7, %v212_v6 }
 0x1c0   :  { %v242_v9 = vmul.f32 %v297_v60, %v236_v8 }
 0x1c2   :  { %v248_v10 = vadd.f32 %v298_v63, %v242_v9 }
 0x1c4   :  { %250 = vst.msk [vmem:[%s508_s7 + $0x8] sm:$0xff] %vm105_vm0, %v248_v10 }
 0x1c5   :  { %255 = vsyncpa [#allocation3], 1 }
 0x1c6   :  { %256 = vsyncpa [#allocation5], 1 }
 0x1c7   :  { %257 = vsyncpa [#allocation8], 1 }

// kernel: transformer_forward.18
= control target key start
LH: loop header
LB: loop body
LE: loop exit
PB: predicated region body
PF: predicated region fallthrough
CT: control target
= control target key end

     0   :  { %s1695_s0 = inlined_call_operand.vmem [shape: f32[2,8,32], index: 0, kind: input, shape index: {}, may-alias: {0,1}]   ;;  %s1696_s1 = inlined_call_operand.vmem [shape: f32[2,8,32], index: 1, kind: input, shape index: {}, may-alias: {0,1}]   ;;  %s1697_s2 = inlined_call_operand.vmem [shape: f32[2,1,8], index: 2, kind: input, shape index: {}]   ;;  %s1698_s3 = inlined_call_operand.vmem [shape: bf16[32,32], index: 3, kind: input, shape index: {}]   ;;  %s1699_s4 = inlined_call_operand.vmem [shape: bf16[32,32], index: 4, kind: input, shape index: {}]   ;;  %s1700_s5 = inlined_call_operand.vmem [shape: bf16[32,32], index: 5, kind: input, shape index: {}]   ;;  %s1701_s6 = inlined_call_operand.vmem [shape: bf16[32,32], index: 6, kind: input, shape index: {}]   ;;  %s1702_s7 = inlined_call_operand.vmem [shape: f32[1,32], index: 7, kind: input, shape index: {}]   ;;  %s1703_s8 = inlined_call_operand.hbm [shape: f32[1,32], index: 8, kind: input, shape index: {}]   ;;  %s1704_s9 = inlined_call_operand.hbm [shape: f32[1,32], index: 9, kind: input, shape index: {}]   ;;  %s1705_s10 = inlined_call_operand.hbm [shape: f32[1,32], index: 10, kind: input, shape index: {}]   ;;  %s1706_s11 = inlined_call_operand.hbm [shape: f32[1,32], index: 11, kind: input, shape index: {}]   ;;  %s1707_s12 = inlined_call_operand.hbm [shape: f32[1,32], index: 12, kind: input, shape index: {}]   ;;  %s1708_s13 = inlined_call_operand.vmem [shape: f32[2,8,32], index: 13, kind: output, shape index: {}]  }
   0x1   :  { %1709 = sst [smem:[#allocation13_spill]] %s1703_s8 }
   0x2   :  { %1710 = sst [smem:[#allocation14_spill]] %s1704_s9 }
   0x3   :  { %18 = vsyncpa [#allocation3], 0 }
   0x4   :  { %19 = vsyncpa [#allocation5], 0 }
   0x5   :  { %20 = vsyncpa [#allocation8], 0  ;;  %s1530_s25 = smov 0  }
   0x6 LB: > { %s1711_s9 = sld [smem:[#allocation14_spill]]  ;;  %s1539_s29 = sadd.s32 4294967295, %s1444_s25   ;;  %s1444_s25 = sphi %s1530_s25, %s26_s25  }
   0x7   : > { %p1112_p0 = scmp.ge.s32.totalorder %s1444_s25, 1  ;;  %p345_p1 = scmp.lt.s32.totalorder %s1444_s25, 3 }
   0x8   : > { %p1218_p2 = scmp.eq.s32.totalorder %s1539_s29, 0  ;;  %s1446_s14 = smov [#allocation4]  }
   0x9   : > { %p1544_p3 = pnand %p1112_p0, %p345_p1  ;;  %s386_s15 = sshll.u32 %s1446_s14, 4  ;;  %s387_s15 = int_to_ptr.vmem [resolvable:$true] %s386_s15 }
   0xa   : > { %s408_s18 = sshll.u32 %s1706_s11, 4  ;;  %s1713_s8 = sld [smem:[#allocation13_spill]]  ;;  %s409_s18 = int_to_ptr.hbm [resolvable:$true] %s408_s18 }
   0xb   : > { %p1202_p4 = pneg %p1544_p3  ;;  %s1447_s23 = smov [#allocation7]  }
   0xc   : > { %s384_s28 = sshll.u32 %s1711_s9, 4  ;;  %s410_s24 = sshll.u32 %s1447_s23, 4  ;;  %s385_s28 = int_to_ptr.hbm [resolvable:$true] %s384_s28  ;;  %s411_s24 = int_to_ptr.vmem [resolvable:$true] %s410_s24 }
   0xd   : > { %p1558_p5 = pnand %p1218_p2, %p1202_p4  ;;  %s1448_s26 = smov [#allocation2]  }
   0xe   : > { %s374_s27 = sshll.u32 %s1448_s26, 4  ;;  %s396_s17 = sshll.u32 %s1705_s10, 4  ;;  %s375_s27 = int_to_ptr.vmem [resolvable:$true] %s374_s27  ;;  %s397_s17 = int_to_ptr.hbm [resolvable:$true] %s396_s17 }
   0xf   : > { %1208 = dma.hbm_to_vmem [thread:$0]  (!%p1558_p5), %s385_s28, 16, %s387_s15, [#allocation5]  }
  0x10   : > { %s372_s21 = sshll.u32 %s1713_s8, 4  ;;  %s420_s23 = sshll.u32 %s1707_s12, 4  ;;  %s373_s21 = int_to_ptr.hbm [resolvable:$true] %s372_s21  ;;  %s421_s23 = int_to_ptr.hbm [resolvable:$true] %s420_s23 }
  0x11   : > { %1214 = dma.hbm_to_vmem [thread:$0]  (!%p1558_p5), %s409_s18, 16, %s411_s24, [#allocation8]  }
  0x12   : > { %1205 = dma.hbm_to_vmem [thread:$0]  (!%p1558_p5), %s373_s21, 16, %s375_s27, [#allocation3]  }
  0x13   : > { %s1449_s8 = smov [#allocation6]   ;;  %s1450_s28 = smov [#allocation9]  }
  0x14   : > { %s398_s9 = sshll.u32 %s1449_s8, 4  ;;  %s422_s15 = sshll.u32 %s1450_s28, 4  ;;  %s399_s9 = int_to_ptr.vmem [resolvable:$true] %s398_s9  ;;  %s423_s15 = int_to_ptr.vmem [resolvable:$true] %s422_s15 }
  0x15   : > { %1211 = dma.hbm_to_vmem [thread:$0]  (!%p1558_p5), %s397_s17, 16, %s399_s9, [#allocation5]  }
  0x16   : > { %1217 = dma.hbm_to_vmem [thread:$0]  (!%p1558_p5), %s421_s23, 16, %s423_s15, [#allocation8]  }
  0x17   : > { %455 = sbr.rel (%p1544_p3) target bundleno = 1251 (0x4e3), region = 72 }
  0x1c   : > { %1431 = dma.done.wait (%p1218_p2), [#allocation3], 16  }
  0x1d   : > { %1433 = vsyncadd (%p1218_p2), [#allocation3], 4294967280 }
  0x1e   : > { %1435 = dma.done.wait (%p1218_p2), [#allocation5], 32  }
  0x1f   : > { %1437 = vsyncadd (%p1218_p2), [#allocation5], 4294967264 }
  0x20   : > { %1439 = dma.done.wait (%p1218_p2), [#allocation8], 32  }
  0x21   : > { %1441 = vsyncadd (%p1218_p2), [#allocation8], 4294967264  ;;  %p525_p6 = scmp.lt.s32.totalorder %s1539_s29, 1  ;;  %v1175_v0 = vld [vmem:[%s1698_s3 + $0x8] sm:$0xff]  ;;  %v1174_v2 = vld [vmem:[%s1698_s3] sm:$0xff]  ;;  %vm565_vm0 = vcmask 261120   ;;  %v656_v28 = vlaneseq }
  0x22   : > { %v1177_v1 = vld [vmem:[%s1699_s4 + $0x8] sm:$0xff]  ;;  %v1176_v3 = vld [vmem:[%s1699_s4] sm:$0xff]  ;;  %575 = vmatpush.bf16.msra.mxu0 %v1175_v0  ;;  %vm666_vm1 = vcmask 64512   ;;  %s1451_s9 = smov 112   ;;  %s1452_s30 = smov 120   ;;  %v1454_v29 = vmov 0  }
  0x23   : > { %s1716_s29 = smov (!%p525_p6, %s1539_s29), 1  ;;  %611 = vmatpush.bf16.msra.mxu1 %v1177_v1  ;;  %v1250_v8 = vld [vmem:[%s1702_s7] ss:$0 sm:$0xff]  ;;  %v657_v32 = vshrl.u32 %v656_v28, 7  ;;  %v659_v33 = vand.u32 127, %v656_v28  ;;  %v1455_v35 = vmov 0.0  }
  0x24   : > { %s1597_s8 = sshll.u32 %s1716_s29, 3  ;;  %v1251_v9 = vld [vmem:[#allocation2] ss:$0 sm:$0xff]  ;;  %v1179_v41 = vld [vmem:[%s1700_s5 + $0x8] sm:$0xff]  ;;  %v1252_v60 = vld [vmem:[#allocation4] ss:$0 sm:$0xff] }
  0x25   : > { %s528_s18 = scalar_lea.vmem %s1695_s0, %s1597_s8  ;;  %s532_s24 = scalar_lea.vmem %s1696_s1, %s1597_s8  ;;  %vm660_vm4 = vcmp.gt.s32.totalorder %v659_v33, %v657_v32  ;;  %644 = vmatpush.bf16.msra.mxu2 %v1179_v41  ;;  %v1178_v42 = vld [vmem:[%s1700_s5] sm:$0xff]  ;;  %vm701_vm6 = vcmask 1043456   ;;  %vm902_vm7 = vcmask 130048   ;;  %vm904_vm8 = vcmask 195584  }
  0x26   : > { %v1619_v4 = vld [vmem:[%s528_s18] sm:$0xff]  ;;  %576 = vmatpush.bf16.msra.mxu0 %v1174_v2  ;;  %s1453_s18 = smov 104   ;;  %s1456_s16 = smov 8  }
  0x27   : > { %v542_v5 = vld [vmem:[%s532_s24] sm:$0xff]  ;;  %v543_v6 = vpack.c.bf16 %v1619_v4, %v1619_v4  ;;  %612 = vmatpush.bf16.msra.mxu1 %v1176_v3  ;;  %s535_s24 = scalar_lea.vmem %s1697_s2, %s1716_s29  ;;  %s1457_s17 = smov 24  }
  0x28   : > { %v1623_v7 = vpack.c.bf16 %v542_v5, %v542_v5  ;;  %v651_v23 = vld [vmem:[%s535_s24] sm:$0x1]  ;;  %s1458_s19 = smov 16  }
  0x29   : > { %1136 = vmatmul.msk.bf16.vlgmr.msra.gmra.mxu0 %vm565_vm0, %v543_v6  ;;  %vm652_vm2 = vcmp.gt.f32.partialorder %v651_v23, 0.0  ;;  %645 = vmatpush.bf16.msra.mxu2 %v1178_v42 }
  0x2a   : > { %1145 = vmatmul.msk.bf16.vlgmr.msra.gmra.mxu1 %vm565_vm0, %v1623_v7  ;;  %v653_v30 = vsel %vm652_vm2, 1, %v1454_v29 }
  0x2b   : > { %v654_v31 = vperm.slane %v653_v30, 0 }
  0x2c   : > { %1154 = vmatmul.msk.bf16.vlgmr.msra.gmra.mxu2 %vm565_vm0, %v1623_v7 }
  0x2d   : > { %vm655_vm3 = vcmp.eq.s32.totalorder %v654_v31, 1 }
  0x2e   : > { %vm661_vm5 = vmor %vm655_vm3, %vm660_vm4 }
  0x2f   : > { %v662_v36 = vsel %vm661_vm5, -1e+09, %v1455_v35 }
  0xa6   : > { %v578_v10 = vpop.f32.mrf.mxu0 }
  0xa7   : > { %v614_v11 = vpop.f32.mrf.mxu1  ;;  %v579_v12 = vadd.f32 %v1250_v8, %v578_v10 }
  0xa8   : > { %v615_v13 = vadd.f32 %v1251_v9, %v614_v11 }
  0xa9   : > { %v663_v14 = vpack.c.bf16 %v579_v12, %v579_v12 }
  0xaa   : > { %v664_v15 = vpack.c.bf16 %v615_v13, %v615_v13 }
  0xab   : > { %777 = vrot.lane.b32.xlu2 %v663_v14, %s1451_s9 }
  0xac   : > { %779 = vrot.lane.b32.xlu1 %v664_v15, %s1451_s9  ;;  %722 = vrot.lane.b32.xlu0 %v664_v15, %s1452_s30  ;;  %v671_v16 = vsel %vm666_vm1, %v664_v15, 0 }
  0xad   : > { %680 = vmatpush.bf16.xpose.msra.mxu3 %v671_v16 }
  0xae   : > { %v580_v17 = vpop.f32.mrf.mxu0 }
  0xaf   : > { %v616_v18 = vpop.f32.mrf.mxu1  ;;  %v647_v61 = vpop.f32.mrf.mxu2 }
  0xb0   : > { %v648_v62 = vadd.f32 %v1252_v60, %v647_v61 }
  0xb2   : > { %v665_v63 = vpack.c.bf16 %v648_v62, %v648_v62 }
  0xb3   : > { %833 = vrot.lane.b32.xlu2 %v663_v14, %s1453_s18 }
  0xb4   : > { %835 = vrot.lane.b32.xlu1 %v664_v15, %s1453_s18  ;;  %719 = vrot.lane.b32.xlu0 %v663_v14, %s1452_s30  ;;  %v703_v0 = vsel %vm701_vm6, %v665_v63, 0 }
  0xb5   : > { %1155 = vmatmul.msk.bf16.vlgmr.msra.gmra.mxu3 %vm666_vm1, %v663_v14  ;;  %712 = vmatpush.bf16.msrb.mxu0 %v703_v0 }
  0xb7   : > { %v649_v2 = vpop.f32.mrf.mxu2 }
 0x105   : > { %v778_v24 = vpop.permute.xlu2 %777 }
 0x10d   : > { %v834_v34 = vpop.permute.xlu2 %833 }
 0x11e   : > { %v780_v19 = vpop.permute.xlu1 %779  ;;  %v723_v20 = vpop.permute.xlu0 %722 }
 0x11f   : > { %v728_v21 = vsel %vm666_vm1, %v723_v20, 0  ;;  %v785_v22 = vsel %vm666_vm1, %v780_v19, 0 }
 0x120   : > { %737 = vmatpush.bf16.xpose.msrb.mxu1 %v728_v21  ;;  %794 = vmatpush.bf16.xpose.msrb.mxu3 %v785_v22 }
 0x126   : > { %v836_v25 = vpop.permute.xlu1 %835  ;;  %v720_v26 = vpop.permute.xlu0 %719 }
 0x127   : > { %v841_v27 = vsel %vm666_vm1, %v836_v25, 0  ;;  %1157 = vmatmul.msk.bf16.vlgmr.msrb.gmra.mxu1 %vm666_vm1, %v720_v26  ;;  %1159 = vmatmul.msk.bf16.vlgmr.msrb.gmra.mxu3 %vm666_vm1, %v778_v24 }
 0x128   : > { %850 = vmatpush.bf16.xpose.msra.mxu1 %v841_v27 }
 0x137   : > { %1161 = vmatmul.msk.bf16.vlgmr.msra.gmra.mxu1 %vm666_vm1, %v834_v34 }
 0x138   : > { %v682_v37 = vpop.f32.mrf.mxu3 }
 0x139   : > { %v683_v38 = vadd.f32 %v682_v37, %v662_v36 }
 0x13b   : > { %v686_v39 = vsel %vm666_vm1, %v683_v38, -inf }
 0x13c   : > { %687 = vmax.xlane.f32.xlu1 %v686_v39 }
 0x140   : > { %v684_v40 = vpop.f32.mrf.mxu3 }
 0x1a4   : > { %v739_v43 = vpop.f32.mrf.mxu1 }
 0x1a5   : > { %v740_v44 = vadd.f32 %v739_v43, %v662_v36 }
 0x1a7   : > { %v743_v45 = vsel %vm666_vm1, %v740_v44, -inf }
 0x1a8   : > { %744 = vmax.xlane.f32.xlu0 %v743_v45 }
 0x1aa   : > { %v796_v46 = vpop.f32.mrf.mxu3 }
 0x1ab   : > { %v797_v56 = vadd.f32 %v796_v46, %v662_v36 }
 0x1ac   : > { %v741_v47 = vpop.f32.mrf.mxu1 }
 0x1ad   : > { %v800_v59 = vsel %vm666_vm1, %v797_v56, -inf }
 0x1af   : > { %v688_v48 = vpop.xlane.xlu1 %687 }
 0x1b0   : > { %v689_v49 = vsub.f32 %v683_v38, %v688_v48  ;;  %v1181_v48 = vld [vmem:[%s1701_s6 + $0x8] sm:$0xff] }
 0x1b1   : > { %936 = vmatpush.bf16.msra.mxu3 %v1181_v48 }
 0x1b2   : > { %v690_v50 = vmul.f32 1.442695, %v689_v49  ;;  %v798_v51 = vpop.f32.mrf.mxu3  ;;  %v1180_v49 = vld [vmem:[%s1701_s6] sm:$0xff] }
 0x1b4   : > { %1256 = vpow2.f32 %v690_v50  ;;  %v852_v52 = vpop.f32.mrf.mxu1 }
 0x1b5   : > { %v853_v53 = vadd.f32 %v852_v52, %v662_v36  ;;  %937 = vmatpush.bf16.msra.mxu3 %v1180_v49 }
 0x1b7   : > { %v856_v54 = vsel %vm666_vm1, %v853_v53, -inf }
 0x1b8   : > { %857 = vmax.xlane.f32.xlu2 %v856_v54 }
 0x1ba   : > { %v1257_v55 = vpop.eup %1256 }
 0x1bb   : > { %v692_v57 = vsel %vm666_vm1, %v1257_v55, 0.0 }
 0x1bc   : > { %693 = vadd.xlane.f32.xlu1 %v692_v57  ;;  %v854_v58 = vpop.f32.mrf.mxu1  ;;  %v1253_v57 = vld [vmem:[#allocation6] ss:$0 sm:$0xff] }
 0x1c0   : > { %801 = vmax.xlane.f32.xlu2 %v800_v59 }
 0x1d8   : > { %756 = vrot.lane.b32.xlu2 %v665_v63, %s1452_s30 }
 0x21b   : > { %v745_v1 = vpop.xlane.xlu0 %744 }
 0x21c   : > { %v746_v3 = vsub.f32 %v740_v44, %v745_v1  ;;  %v1459_v1 = vmov 32.0  }
 0x21e   : > { %v747_v5 = vmul.f32 1.442695, %v746_v3 }
 0x220   : > { %1258 = vpow2.f32 %v747_v5 }
 0x226   : > { %v1259_v6 = vpop.eup %1258 }
 0x227   : > { %v749_v7 = vsel %vm666_vm1, %v1259_v6, 0.0 }
 0x228   : > { %750 = vadd.xlane.f32.xlu0 %v749_v7 }
 0x22b   : > { %v858_v8 = vpop.xlane.xlu2 %857 }
 0x22c   : > { %v859_v9 = vsub.f32 %v853_v53, %v858_v8 }
 0x22e   : > { %v860_v10 = vmul.f32 1.442695, %v859_v9 }
 0x22f   : > { %v694_v11 = vpop.xlane.xlu1 %693 }
 0x230   : > { %1260 = vpow2.f32 %v860_v10 }
 0x231   : > { %1262 = vrcp.f32 %v694_v11 }
 0x233   : > { %v802_v12 = vpop.xlane.xlu2 %801 }
 0x234   : > { %v803_v13 = vsub.f32 %v797_v56, %v802_v12 }
 0x236   : > { %v1261_v14 = vpop.eup %1260  ;;  %v804_v15 = vmul.f32 1.442695, %v803_v13 }
 0x237   : > { %v1263_v16 = vpop.eup %1262  ;;  %v862_v17 = vsel %vm666_vm1, %v1261_v14, 0.0 }
 0x238   : > { %v696_v18 = vmul.f32 %v1263_v16, %v1257_v55  ;;  %1264 = vpow2.f32 %v804_v15  ;;  %863 = vadd.xlane.f32.xlu0 %v862_v17 }
 0x23a   : > { %v697_v19 = vpack.c.bf16 %v696_v18, %v696_v18 }
 0x23b   : > { %v757_v22 = vpop.permute.xlu2 %756 }
 0x23c   : > { %1156 = vmatmul.msk.bf16.vlgmr.msrb.gmra.mxu0 %vm666_vm1, %v697_v19  ;;  %v762_v23 = vsel %vm701_vm6, %v757_v22, 0  ;;  %v1254_v22 = vld [vmem:[#allocation7] ss:$0 sm:$0xff] }
 0x23d   : > { %771 = vmatpush.bf16.msrb.mxu2 %v762_v23 }
 0x23e   : > { %v1265_v20 = vpop.eup %1264 }
 0x23f   : > { %v806_v21 = vsel %vm666_vm1, %v1265_v20, 0.0 }
 0x240   : > { %807 = vadd.xlane.f32.xlu1 %v806_v21 }
 0x24c   : > { %868 = vrot.lane.b32.xlu0 %v665_v63, %s1453_s18  ;;  %s539_s18 = scalar_lea.vmem %s1708_s13, %s1597_s8 }
 0x259   : > { %812 = vrot.lane.b32.xlu1 %v665_v63, %s1451_s9 }
 0x29b   : > { %v751_v24 = vpop.xlane.xlu0 %750 }
 0x29c   : > { %1266 = vrcp.f32 %v751_v24  ;;  %v1255_v24 = vld [vmem:[#allocation9] ss:$0 sm:$0xff] }
 0x2a2   : > { %v1267_v25 = vpop.eup %1266 }
 0x2a3   : > { %v753_v26 = vmul.f32 %v1267_v25, %v1259_v6 }
 0x2a5   : > { %v754_v27 = vpack.c.bf16 %v753_v26, %v753_v26 }
 0x2a7   : > { %1158 = vmatmul.msk.bf16.vlgmr.msrb.gmra.mxu2 %vm666_vm1, %v754_v27 }
 0x2ab   : > { %v864_v28 = vpop.xlane.xlu0 %863 }
 0x2ac   : > { %1268 = vrcp.f32 %v864_v28 }
 0x2b2   : > { %v1269_v30 = vpop.eup %1268 }
 0x2b3   : > { %v866_v31 = vmul.f32 %v1269_v30, %v1261_v14  ;;  %v808_v32 = vpop.xlane.xlu1 %807 }
 0x2b4   : > { %1270 = vrcp.f32 %v808_v32 }
 0x2b5   : > { %v867_v35 = vpack.c.bf16 %v866_v31, %v866_v31  ;;  %1272 = vrcp.f32 %v1459_v1 }
 0x2b9   : > { %v714_v29 = vpop.f32.mrf.mxu0 }
 0x2ba   : > { %v1271_v37 = vpop.eup %1270 }
 0x2bb   : > { %v810_v38 = vmul.f32 %v1271_v37, %v1265_v20  ;;  %v1273_v2 = vpop.eup %1272 }
 0x2bc   : > { %v948_v3 = vmul.f32 32.0, %v1273_v2  ;;  %vm952_vm9 = vweird.f32 %v1273_v2 }
 0x2bd   : > { %v811_v41 = vpack.c.bf16 %v810_v38, %v810_v38 }
 0x2be   : > { %v869_v33 = vpop.permute.xlu0 %868  ;;  %v949_v5 = vsub.f32 1.0, %v948_v3 }
 0x2bf   : > { %v874_v34 = vsel %vm701_vm6, %v869_v33, 0 }
 0x2c0   : > { %883 = vmatpush.bf16.msra.mxu2 %v874_v34  ;;  %v950_v6 = vmul.f32 %v1273_v2, %v949_v5 }
 0x2c1   : > { %v716_v36 = vpop.f32.mrf.mxu0 }
 0x2c2   : > { %v951_v7 = vadd.f32 %v1273_v2, %v950_v6 }
 0x2c3   : > { %1162 = vmatmul.msk.bf16.vlgmr.msra.gmra.mxu2 %vm666_vm1, %v867_v35 }
 0x2c4   : > { %v953_v8 = vsel %vm952_vm9, %v1273_v2, %v951_v7 }
 0x2cb   : > { %v813_v39 = vpop.permute.xlu1 %812 }
 0x2cc   : > { %v818_v40 = vsel %vm701_vm6, %v813_v39, 0 }
 0x2cd   : > { %827 = vmatpush.bf16.msra.mxu0 %v818_v40 }
 0x2d0   : > { %1160 = vmatmul.msk.bf16.vlgmr.msra.gmra.mxu0 %vm666_vm1, %v811_v41 }
 0x32a   : > { %v773_v42 = vpop.f32.mrf.mxu2 }
 0x32b   : > { %890 = vrot.lane.b32.xlu2 %v773_v42, %s1456_s16 }
 0x332   : > { %v775_v43 = vpop.f32.mrf.mxu2 }
 0x346   : > { %v885_v44 = vpop.f32.mrf.mxu2 }
 0x347   : > { %898 = vrot.lane.b32.xlu2 %v885_v44, %s1457_s17 }
 0x34d   : > { %v829_v45 = vpop.f32.mrf.mxu0 }
 0x34e   : > { %v887_v46 = vpop.f32.mrf.mxu2  ;;  %894 = vrot.lane.b32.xlu0 %v829_v45, %s1458_s19 }
 0x355   : > { %v831_v47 = vpop.f32.mrf.mxu0 }
 0x385   : > { %v891_v50 = vpop.permute.xlu2 %890 }
 0x386   : > { %v901_v51 = vsel %vm666_vm1, %v714_v29, %v891_v50 }
 0x3a1   : > { %v899_v53 = vpop.permute.xlu2 %898 }
 0x3c0   : > { %v895_v52 = vpop.permute.xlu0 %894 }
 0x3c1   : > { %v903_v54 = vsel %vm902_vm7, %v901_v51, %v895_v52 }
 0x3c2   : > { %v905_v55 = vsel %vm904_vm8, %v903_v54, %v899_v53 }
 0x3c3   : > { %v906_v56 = vpack.c.bf16 %v905_v55, %v905_v55 }
 0x3c5   : > { %1171 = vmatmul.msk.bf16.vlgmr.msra.gmra.mxu3 %vm565_vm0, %v906_v56 }
 0x448   : > { %v939_v58 = vpop.f32.mrf.mxu3 }
 0x449   : > { %v940_v59 = vadd.f32 %v1253_v57, %v939_v58 }
 0x44b   : > { %v943_v60 = vadd.f32 %v940_v59, %v1619_v4 }
 0x44d   : > { %v944_v61 = vsel %vm565_vm0, %v943_v60, 0.0  ;;  %v955_v62 = vmul.f32 %v943_v60, %v943_v60 }
 0x44e   : > { %945 = vadd.xlane.f32.xlu1 %v944_v61 }
 0x44f   : > { %v956_v63 = vsel %vm565_vm0, %v955_v62, 0.0 }
 0x450   : > { %v941_v0 = vpop.f32.mrf.mxu3  ;;  %957 = vadd.xlane.f32.xlu0 %v956_v63 }
 0x4c1   : > { %v946_v9 = vpop.xlane.xlu1 %945 }
 0x4c2   : > { %v954_v10 = vmul.f32 %v953_v8, %v946_v9 }
 0x4c3   : > { %v958_v4 = vpop.xlane.xlu0 %957 }
 0x4c4   : > { %v960_v11 = vmul.f32 %v954_v10, %v954_v10  ;;  %v959_v12 = vmul.f32 %v958_v4, %v953_v8  ;;  %v962_v21 = vsub.f32 %v943_v60, %v954_v10 }
 0x4c6   : > { %v961_v13 = vsub.f32 %v959_v12, %v960_v11 }
 0x4c8   : > { %v963_v14 = vadd.f32 1e-05, %v961_v13 }
 0x4ca   : > { %1274 = vrsqrt.f32 %v963_v14  ;;  %vm970_vm11 = vweird.f32 %v963_v14 }
 0x4d0   : > { %v1275_v15 = vpop.eup %1274 }
 0x4d1   : > { %v965_v16 = vmul.f32 %v1275_v15, %v963_v14  ;;  %vm971_vm10 = vweird.f32 %v1275_v15 }
 0x4d2   : > { %vm972_vm12 = vmor %vm970_vm11, %vm971_vm10 }
 0x4d3   : > { %v966_v17 = vmul.f32 %v1275_v15, %v965_v16 }
 0x4d5   : > { %v967_v18 = vmul.f32 0.5, %v966_v17 }
 0x4d7   : > { %v968_v19 = vsub.f32 1.5, %v967_v18 }
 0x4d9   : > { %v969_v20 = vmul.f32 %v1275_v15, %v968_v19 }
 0x4db   : > { %v973_v23 = vsel %vm972_vm12, %v1275_v15, %v969_v20 }
 0x4dc   : > { %v974_v25 = vmul.f32 %v973_v23, %v962_v21 }
 0x4de   : > { %v979_v26 = vmul.f32 %v1254_v22, %v974_v25 }
 0x4e0   : > { %v984_v27 = vadd.f32 %v1255_v24, %v979_v26 }
 0x4e2   : > { %985 = vst.msk [vmem:[%s539_s18] sm:$0xff] %vm565_vm0, %v984_v27 }
 0x4e3 PF: > { %s26_s25 = sadd.s32 1, %s1444_s25  }
 0x4e4   : > { %p23_p7 = scmp.ge.s32.totalorder %s26_s25, 4  }
 0x4e6   :  { %25 = sbr.rel (!%p23_p7) target bundleno = 6 (0x6), region = 129 }
 0x4eb   :  { %1005 = vsyncpa [#allocation3], 1 }
 0x4ec   :  { %1007 = vsyncpa [#allocation3 + $0x1], 1 }
 0x4ed   :  { %1008 = vsyncpa [#allocation5], 1 }
 0x4ee   :  { %1009 = vsyncpa [#allocation8], 1 }

</bundles_post_ra>
